<compile_context>
chip_gen: v6e
topology: v6e:2x2x1
jax: 0.10.0
libtpu: 0.0.40
codegen_flags: <defaults>
</compile_context>

<pallas_src>
import functools
import math

import jax
import jax.numpy as jnp
from jax.experimental import pallas as pl
from jax.experimental.pallas import tpu as pltpu


# ----------------------------------------------------------------------------
# Model hyper-parameters (small, consistent with the module's defaults scaled
# down: d_model, nhead, dim_feedforward, num_decoder_layers).
# ----------------------------------------------------------------------------
D_MODEL = 32
NHEAD = 4
DIM_FF = 64
NUM_LAYERS = 2
EPS = 1e-5
NEG_INF = -1e9


# ----------------------------------------------------------------------------
# Fused decoder kernel.
# Grid: (batch,). Each program handles one batch element through ALL layers:
#   per layer: text cross-attn -> norm1 -> visual cross-attn -> norm2(residual)
#              -> FFN -> norm3(residual); stack-norm applied for the output.
# Weight slabs (stacked over layers):
#   attn_w: (L, 8, D, D)  rows: [t_wq,t_wk,t_wv,t_wo, v_wq,v_wk,v_wv,v_wo]
#   attn_b: (L, 8, D)
#   w1/b1/w2/b2: FFN;  norms: (L, 6, D) = [n1w,n1b,n2w,n2b,n3w,n3b]
#   fnorm: (2, D) decoder-stack final LayerNorm (weight, bias)
# ----------------------------------------------------------------------------
def _decoder_kernel(
    # scalar prefetch (SMEM)
    tlen_ref, vlen_ref,
    # per-batch data blocks
    q_ref, qpos_ref, txt_ref, tpos_ref, vis_ref, vpos_ref,
    # packed weights
    attn_w_ref, attn_b_ref, w1_ref, b1_ref, w2_ref, b2_ref,
    norms_ref, fnorm_ref,
    # output
    out_ref,
    *, nhead, head_dim, num_layers,
):
  b = pl.program_id(0)
  scale = 1.0 / math.sqrt(head_dim)
  d_model = nhead * head_dim

  def layernorm(x, w, bias):
    mean = jnp.mean(x, axis=-1, keepdims=True)
    var = jnp.mean(jnp.square(x - mean), axis=-1, keepdims=True)
    return (x - mean) * jax.lax.rsqrt(var + EPS) * w + bias

  def mha(q, k, v, mask3, wq, bq, wk, bk, wv, bv, wo, bo):
    # q: (Nq, D), k/v: (Lk, D), mask3: (1, 1, Lk) additive (-1e9 on padded)
    nq, lk = q.shape[0], k.shape[0]
    qp = jnp.dot(q, wq, preferred_element_type=jnp.float32) + bq
    kp = jnp.dot(k, wk, preferred_element_type=jnp.float32) + bk
    vp = jnp.dot(v, wv, preferred_element_type=jnp.float32) + bv
    # split heads and batch the contractions over heads (no per-head loop/concat)
    qh = qp.reshape(nq, nhead, head_dim).swapaxes(0, 1)   # (H, Nq, hd)
    kh = kp.reshape(lk, nhead, head_dim).swapaxes(0, 1)   # (H, Lk, hd)
    vh = vp.reshape(lk, nhead, head_dim).swapaxes(0, 1)   # (H, Lk, hd)
    s = jnp.einsum("hqd,hkd->hqk", qh, kh,
                   preferred_element_type=jnp.float32) * scale
    s = s + mask3
    s = s - jnp.max(s, axis=-1, keepdims=True)
    p = jnp.exp(s)
    p = p * pl.reciprocal(jnp.sum(p, axis=-1, keepdims=True), approx=True)
    o = jnp.einsum("hqk,hkd->hqd", p, vh,
                   preferred_element_type=jnp.float32)    # (H, Nq, hd)
    o = o.swapaxes(0, 1).reshape(nq, d_model)             # (Nq, D)
    return jnp.dot(o, wo, preferred_element_type=jnp.float32) + bo

  q_in = q_ref[0]        # (Nq, D)
  qpos = qpos_ref[0]
  txt = txt_ref[0]       # (Lt, D)
  tpos = tpos_ref[0]
  vis = vis_ref[0]       # (Lv, D)
  vpos = vpos_ref[0]
  Lt = txt.shape[0]
  Lv = vis.shape[0]

  # Build additive key-padding masks in-kernel from per-batch valid lengths.
  t_valid = tlen_ref[b]
  v_valid = vlen_ref[b]
  tmask = jnp.where(
      jax.lax.broadcasted_iota(jnp.int32, (1, 1, Lt), 2) >= t_valid,
      NEG_INF, 0.0).astype(jnp.float32)
  vmask = jnp.where(
      jax.lax.broadcasted_iota(jnp.int32, (1, 1, Lv), 2) >= v_valid,
      NEG_INF, 0.0).astype(jnp.float32)

  k_text = txt + tpos
  k_vis = vis + vpos
  fn = fnorm_ref[...]    # (2, D)

  output = q_in
  for l in range(num_layers):     # unrolled: layers are a data dependency
    ab = attn_b_ref[l]            # (8, D)
    nm = norms_ref[l]             # (6, D)

    # --- stage 1: attend to text memory ---
    text_info = mha(output + qpos, k_text, txt, tmask,
                    attn_w_ref[l, 0], ab[0:1], attn_w_ref[l, 1], ab[1:2],
                    attn_w_ref[l, 2], ab[2:3], attn_w_ref[l, 3], ab[3:4])
    intermediate = layernorm(text_info, nm[0:1], nm[1:2])   # norm1(dropout1(.))

    # --- stage 2: attend to visual memory (residual is the ORIGINAL query) ---
    visual_info = mha(intermediate + qpos, k_vis, vis, vmask,
                      attn_w_ref[l, 4], ab[4:5], attn_w_ref[l, 5], ab[5:6],
                      attn_w_ref[l, 6], ab[6:7], attn_w_ref[l, 7], ab[7:8])
    x = layernorm(output + visual_info, nm[2:3], nm[3:4])    # norm2

    # --- stage 3: FFN ---
    h = jnp.maximum(
        jnp.dot(x, w1_ref[l], preferred_element_type=jnp.float32) + b1_ref[l],
        0.0)
    ffn = jnp.dot(h, w2_ref[l], preferred_element_type=jnp.float32) + b2_ref[l]
    output = layernorm(x + ffn, nm[4:5], nm[5:6])            # norm3

    # decoder-stack final norm applied to each layer output for the stacking
    out_ref[l, 0] = layernorm(output, fn[0:1], fn[1:2])


def _build_decoder_call(B, Nq, Lt, Lv, D, F, L, H):
  def data_spec(S):
    return pl.BlockSpec((1, S, D), lambda b, *_: (b, 0, 0))

  def full_spec(shape):
    n = len(shape)
    return pl.BlockSpec(shape, lambda b, *_, n=n: (0,) * n)

  in_specs = [
      data_spec(Nq), data_spec(Nq),          # query, query_pos
      data_spec(Lt), data_spec(Lt),          # text_memory, text_pos
      data_spec(Lv), data_spec(Lv),          # visual_memory, visual_pos
      full_spec((L, 8, D, D)),               # attn_w slab
      full_spec((L, 8, D)),                  # attn_b slab
      full_spec((L, D, F)), full_spec((L, 1, F)),   # FFN w1, b1
      full_spec((L, F, D)), full_spec((L, 1, D)),   # FFN w2, b2
      full_spec((L, 6, D)),                  # per-layer norms
      full_spec((2, D)),                     # decoder-stack final norm
  ]
  out_specs = pl.BlockSpec((L, 1, Nq, D), lambda b, *_: (0, b, 0, 0))
  out_shape = jax.ShapeDtypeStruct((L, B, Nq, D), jnp.float32)

  kernel = functools.partial(_decoder_kernel, nhead=H, head_dim=D // H,
                             num_layers=L)
  return pl.pallas_call(
      kernel,
      grid_spec=pltpu.PrefetchScalarGridSpec(
          num_scalar_prefetch=2,       # text / visual valid lengths (SMEM)
          grid=(B,),
          in_specs=in_specs,
          out_specs=out_specs),
      out_shape=out_shape,
      compiler_params=pltpu.CompilerParams(
          dimension_semantics=("parallel",)),
  )


# ----------------------------------------------------------------------------
# Parameter initialization (deterministic, Xavier-uniform for matrices),
# packed directly into the stacked slabs the kernel consumes.
# ----------------------------------------------------------------------------
def _xavier(key, shape):
  fan_in, fan_out = shape[-2], shape[-1]
  limit = math.sqrt(6.0 / (fan_in + fan_out))
  return jax.random.uniform(key, shape, jnp.float32, -limit, limit)


def init_params(key, d_model=D_MODEL, dim_ff=DIM_FF, num_layers=NUM_LAYERS):
  k_attn, k_w1, k_w2 = jax.random.split(key, 3)
  # 8 attention matrices per layer: [t_wq,t_wk,t_wv,t_wo, v_wq,v_wk,v_wv,v_wo]
  attn_w = _xavier(k_attn, (num_layers, 8, d_model, d_model))
  attn_b = jnp.zeros((num_layers, 8, d_model), jnp.float32)
  w1 = _xavier(k_w1, (num_layers, d_model, dim_ff))
  b1 = jnp.zeros((num_layers, 1, dim_ff), jnp.float32)
  w2 = _xavier(k_w2, (num_layers, dim_ff, d_model))
  b2 = jnp.zeros((num_layers, 1, d_model), jnp.float32)
  # per-layer LayerNorms: rows [n1w,n1b,n2w,n2b,n3w,n3b]
  ln_pattern = jnp.tile(
      jnp.stack([jnp.ones((d_model,), jnp.float32),
                 jnp.zeros((d_model,), jnp.float32)]), (3, 1))      # (6, D)
  norms = jnp.tile(ln_pattern[None], (num_layers, 1, 1))            # (L, 6, D)
  fnorm = jnp.stack([jnp.ones((d_model,), jnp.float32),
                     jnp.zeros((d_model,), jnp.float32)])           # (2, D)
  return dict(attn_w=attn_w, attn_b=attn_b, w1=w1, b1=b1, w2=w2, b2=b2,
              norms=norms, fnorm=fnorm)


# ----------------------------------------------------------------------------
# Wrapper: PyTorch layout (seq, batch, d) in/out, layer_idx=None path
# (returns stacked per-layer normalized outputs, shape (L, S, B, D)).
# ----------------------------------------------------------------------------
def vision_language_decoder_forward(params, tgt, query_pos,
                                    text_memory, text_kpm, text_pos,
                                    visual_memory, visual_kpm, visual_pos):
  # torch layout (S, B, D) -> kernel layout (B, S, D)
  to_bsd = lambda x: jnp.transpose(x, (1, 0, 2)).astype(jnp.float32)
  q = to_bsd(tgt)
  qpos = to_bsd(query_pos)
  txt = to_bsd(text_memory)
  tpos = to_bsd(text_pos)
  vis = to_bsd(visual_memory)
  vpos = to_bsd(visual_pos)

  B, Nq, D = q.shape
  Lt = txt.shape[1]
  Lv = vis.shape[1]
  L = params["w1"].shape[0]
  F = params["w1"].shape[-1]

  # key_padding_mask (True = masked) -> per-batch valid lengths for scalar
  # prefetch; masks are rebuilt in-kernel with iota.
  # TODO(synk): assumes the standard trailing-padding key_padding_mask; an
  # arbitrary non-contiguous boolean mask would need a mask-tensor input.
  tlen = (Lt - jnp.sum(text_kpm.astype(jnp.int32), axis=1)).astype(jnp.int32)
  vlen = (Lv - jnp.sum(visual_kpm.astype(jnp.int32), axis=1)).astype(jnp.int32)

  decoder_call = _build_decoder_call(B, Nq, Lt, Lv, D, F, L, NHEAD)
  stacked = decoder_call(
      tlen, vlen, q, qpos, txt, tpos, vis, vpos,
      params["attn_w"], params["attn_b"],
      params["w1"], params["b1"], params["w2"], params["b2"],
      params["norms"], params["fnorm"])                 # (L, B, Nq, D)

  return jnp.transpose(stacked, (0, 2, 1, 3))           # (L, S, B, D) torch layout


# ----------------------------------------------------------------------------
# Main
# ----------------------------------------------------------------------------
if __name__ == "__main__":
  key = jax.random.PRNGKey(0)
  k_params, k_tgt, k_qpos, k_txt, k_tpos, k_vis, k_vpos = jax.random.split(key, 7)

  B, Nq, Lt, Lv = 2, 8, 8, 16
  params = init_params(k_params)

  # torch batch_first=False layout: (seq, batch, d_model)
  tgt = jax.random.normal(k_tgt, (Nq, B, D_MODEL), jnp.float32)
  query_pos = jax.random.normal(k_qpos, (Nq, B, D_MODEL), jnp.float32)
  text_memory = jax.random.normal(k_txt, (Lt, B, D_MODEL), jnp.float32)
  text_pos = jax.random.normal(k_tpos, (Lt, B, D_MODEL), jnp.float32)
  visual_memory = jax.random.normal(k_vis, (Lv, B, D_MODEL), jnp.float32)
  visual_pos = jax.random.normal(k_vpos, (Lv, B, D_MODEL), jnp.float32)

  # key_padding_mask: (batch, seq), True = padded/masked (trailing padding)
  text_kpm = jnp.arange(Lt)[None, :] >= jnp.array([Lt, Lt - 2])[:, None]
  visual_kpm = jnp.arange(Lv)[None, :] >= jnp.array([Lv, Lv - 4])[:, None]

  out = vision_language_decoder_forward(
      params, tgt, query_pos,
      text_memory, text_kpm, text_pos,
      visual_memory, visual_kpm, visual_pos)
  out = jax.block_until_ready(out)
  assert out.shape == (NUM_LAYERS, Nq, B, D_MODEL), out.shape
  assert bool(jnp.all(jnp.isfinite(out)))
  print("KERNEL_OK")
</pallas_src>

<mosaic_0001>
module attributes {stable_mosaic.version = 11 : i64} {
  func.func @_decoder_kernel(%arg0: i32, %arg1: memref<2xi32, #tpu.memory_space<smem>>, %arg2: memref<2xi32, #tpu.memory_space<smem>>, %arg3: memref<1x8x32xf32, #tpu.memory_space<vmem>>, %arg4: memref<1x8x32xf32, #tpu.memory_space<vmem>>, %arg5: memref<1x8x32xf32, #tpu.memory_space<vmem>>, %arg6: memref<1x8x32xf32, #tpu.memory_space<vmem>>, %arg7: memref<1x16x32xf32, #tpu.memory_space<vmem>>, %arg8: memref<1x16x32xf32, #tpu.memory_space<vmem>>, %arg9: memref<2x8x32x32xf32, #tpu.memory_space<vmem>>, %arg10: memref<2x8x32xf32, #tpu.memory_space<vmem>>, %arg11: memref<2x32x64xf32, #tpu.memory_space<vmem>>, %arg12: memref<2x1x64xf32, #tpu.memory_space<vmem>>, %arg13: memref<2x64x32xf32, #tpu.memory_space<vmem>>, %arg14: memref<2x1x32xf32, #tpu.memory_space<vmem>>, %arg15: memref<2x6x32xf32, #tpu.memory_space<vmem>>, %arg16: memref<2x32xf32, #tpu.memory_space<vmem>>, %arg17: memref<2x1x8x32xf32, #tpu.memory_space<vmem>>) attributes {dimension_semantics = [#tpu.dimension_semantics<parallel>], iteration_bounds = array<i64: 2>, scalar_prefetch = 2 : i64, scratch_operands = 0 : i64, tpu.core_type = #tpu.core_type<tc>, window_params = [{transform_indices = @transform_0, window_bounds = array<i64: 1, 8, 32>}, {transform_indices = @transform_1, window_bounds = array<i64: 1, 8, 32>}, {transform_indices = @transform_2, window_bounds = array<i64: 1, 8, 32>}, {transform_indices = @transform_3, window_bounds = array<i64: 1, 8, 32>}, {transform_indices = @transform_4, window_bounds = array<i64: 1, 16, 32>}, {transform_indices = @transform_5, window_bounds = array<i64: 1, 16, 32>}, {pipeline_mode = #tpu.pipeline_mode<synchronous>, transform_indices = @transform_6, window_bounds = array<i64: 2, 8, 32, 32>}, {pipeline_mode = #tpu.pipeline_mode<synchronous>, transform_indices = @transform_7, window_bounds = array<i64: 2, 8, 32>}, {pipeline_mode = #tpu.pipeline_mode<synchronous>, transform_indices = @transform_8, window_bounds = array<i64: 2, 32, 64>}, {pipeline_mode = #tpu.pipeline_mode<synchronous>, transform_indices = @transform_9, window_bounds = array<i64: 2, 1, 64>}, {pipeline_mode = #tpu.pipeline_mode<synchronous>, transform_indices = @transform_10, window_bounds = array<i64: 2, 64, 32>}, {pipeline_mode = #tpu.pipeline_mode<synchronous>, transform_indices = @transform_11, window_bounds = array<i64: 2, 1, 32>}, {pipeline_mode = #tpu.pipeline_mode<synchronous>, transform_indices = @transform_12, window_bounds = array<i64: 2, 6, 32>}, {pipeline_mode = #tpu.pipeline_mode<synchronous>, transform_indices = @transform_13, window_bounds = array<i64: 2, 32>}, {transform_indices = @transform_14, window_bounds = array<i64: 2, 1, 8, 32>}]} {
    %c0 = arith.constant 0 : index
    %c0_0 = arith.constant 0 : index
    %c0_1 = arith.constant 0 : index
    %0 = vector.load %arg3[%c0, %c0_0, %c0_1] : memref<1x8x32xf32, #tpu.memory_space<vmem>>, vector<1x8x32xf32>
    %1 = vector.shape_cast %0 : vector<1x8x32xf32> to vector<8x32xf32>
    %c0_2 = arith.constant 0 : index
    %c0_3 = arith.constant 0 : index
    %c0_4 = arith.constant 0 : index
    %2 = vector.load %arg4[%c0_2, %c0_3, %c0_4] : memref<1x8x32xf32, #tpu.memory_space<vmem>>, vector<1x8x32xf32>
    %3 = vector.shape_cast %2 : vector<1x8x32xf32> to vector<8x32xf32>
    %c0_5 = arith.constant 0 : index
    %c0_6 = arith.constant 0 : index
    %c0_7 = arith.constant 0 : index
    %4 = vector.load %arg5[%c0_5, %c0_6, %c0_7] : memref<1x8x32xf32, #tpu.memory_space<vmem>>, vector<1x8x32xf32>
    %5 = vector.shape_cast %4 : vector<1x8x32xf32> to vector<8x32xf32>
    %c0_8 = arith.constant 0 : index
    %c0_9 = arith.constant 0 : index
    %c0_10 = arith.constant 0 : index
    %6 = vector.load %arg6[%c0_8, %c0_9, %c0_10] : memref<1x8x32xf32, #tpu.memory_space<vmem>>, vector<1x8x32xf32>
    %7 = vector.shape_cast %6 : vector<1x8x32xf32> to vector<8x32xf32>
    %c0_11 = arith.constant 0 : index
    %c0_12 = arith.constant 0 : index
    %c0_13 = arith.constant 0 : index
    %8 = vector.load %arg7[%c0_11, %c0_12, %c0_13] : memref<1x16x32xf32, #tpu.memory_space<vmem>>, vector<1x16x32xf32>
    %9 = vector.shape_cast %8 : vector<1x16x32xf32> to vector<16x32xf32>
    %c0_14 = arith.constant 0 : index
    %c0_15 = arith.constant 0 : index
    %c0_16 = arith.constant 0 : index
    %10 = vector.load %arg8[%c0_14, %c0_15, %c0_16] : memref<1x16x32xf32, #tpu.memory_space<vmem>>, vector<1x16x32xf32>
    %11 = vector.shape_cast %10 : vector<1x16x32xf32> to vector<16x32xf32>
    %12 = arith.index_cast %arg0 : i32 to index
    %13 = memref.load %arg1[%12] : memref<2xi32, #tpu.memory_space<smem>>
    %14 = arith.index_cast %arg0 : i32 to index
    %15 = memref.load %arg2[%14] : memref<2xi32, #tpu.memory_space<smem>>
    %16 = tpu.iota {dimensions = array<i32: 2>} : vector<1x1x8xi32>
    %17 = vector.broadcast %13 : i32 to vector<1x1x8xi32>
    %18 = arith.cmpi sge, %16, %17 : vector<1x1x8xi32>
    %cst = arith.constant -1.000000e+09 : f32
    %cst_17 = arith.constant 0.000000e+00 : f32
    %19 = vector.broadcast %cst : f32 to vector<1x1x8xf32>
    %20 = vector.broadcast %cst_17 : f32 to vector<1x1x8xf32>
    %21 = arith.select %18, %19, %20 : vector<1x1x8xi1>, vector<1x1x8xf32>
    %22 = tpu.iota {dimensions = array<i32: 2>} : vector<1x1x16xi32>
    %23 = vector.broadcast %15 : i32 to vector<1x1x16xi32>
    %24 = arith.cmpi sge, %22, %23 : vector<1x1x16xi32>
    %cst_18 = arith.constant -1.000000e+09 : f32
    %cst_19 = arith.constant 0.000000e+00 : f32
    %25 = vector.broadcast %cst_18 : f32 to vector<1x1x16xf32>
    %26 = vector.broadcast %cst_19 : f32 to vector<1x1x16xf32>
    %27 = arith.select %24, %25, %26 : vector<1x1x16xi1>, vector<1x1x16xf32>
    %28 = arith.addf %5, %7 : vector<8x32xf32>
    %29 = arith.addf %9, %11 : vector<16x32xf32>
    %c0_20 = arith.constant 0 : index
    %c0_21 = arith.constant 0 : index
    %30 = vector.load %arg16[%c0_20, %c0_21] : memref<2x32xf32, #tpu.memory_space<vmem>>, vector<2x32xf32>
    %c0_22 = arith.constant 0 : index
    %c0_23 = arith.constant 0 : index
    %c0_24 = arith.constant 0 : index
    %31 = vector.load %arg10[%c0_22, %c0_23, %c0_24] : memref<2x8x32xf32, #tpu.memory_space<vmem>>, vector<1x8x32xf32>
    %32 = vector.shape_cast %31 : vector<1x8x32xf32> to vector<8x32xf32>
    %c0_25 = arith.constant 0 : index
    %c0_26 = arith.constant 0 : index
    %c0_27 = arith.constant 0 : index
    %33 = vector.load %arg15[%c0_25, %c0_26, %c0_27] : memref<2x6x32xf32, #tpu.memory_space<vmem>>, vector<1x6x32xf32>
    %34 = vector.shape_cast %33 : vector<1x6x32xf32> to vector<6x32xf32>
    %35 = arith.addf %1, %3 : vector<8x32xf32>
    %c0_28 = arith.constant 0 : index
    %c0_29 = arith.constant 0 : index
    %c0_30 = arith.constant 0 : index
    %c0_31 = arith.constant 0 : index
    %36 = vector.load %arg9[%c0_28, %c0_29, %c0_30, %c0_31] : memref<2x8x32x32xf32, #tpu.memory_space<vmem>>, vector<1x1x32x32xf32>
    %37 = vector.shape_cast %36 : vector<1x1x32x32xf32> to vector<32x32xf32>
    %38 = vector.extract_strided_slice %32 {offsets = [0, 0], sizes = [1, 32], strides = [1, 1]} : vector<8x32xf32> to vector<1x32xf32>
    %c0_32 = arith.constant 0 : index
    %c1 = arith.constant 1 : index
    %c0_33 = arith.constant 0 : index
    %c0_34 = arith.constant 0 : index
    %39 = vector.load %arg9[%c0_32, %c1, %c0_33, %c0_34] : memref<2x8x32x32xf32, #tpu.memory_space<vmem>>, vector<1x1x32x32xf32>
    %40 = vector.shape_cast %39 : vector<1x1x32x32xf32> to vector<32x32xf32>
    %41 = vector.extract_strided_slice %32 {offsets = [1, 0], sizes = [1, 32], strides = [1, 1]} : vector<8x32xf32> to vector<1x32xf32>
    %c0_35 = arith.constant 0 : index
    %c2 = arith.constant 2 : index
    %c0_36 = arith.constant 0 : index
    %c0_37 = arith.constant 0 : index
    %42 = vector.load %arg9[%c0_35, %c2, %c0_36, %c0_37] : memref<2x8x32x32xf32, #tpu.memory_space<vmem>>, vector<1x1x32x32xf32>
    %43 = vector.shape_cast %42 : vector<1x1x32x32xf32> to vector<32x32xf32>
    %44 = vector.extract_strided_slice %32 {offsets = [2, 0], sizes = [1, 32], strides = [1, 1]} : vector<8x32xf32> to vector<1x32xf32>
    %c0_38 = arith.constant 0 : index
    %c3 = arith.constant 3 : index
    %c0_39 = arith.constant 0 : index
    %c0_40 = arith.constant 0 : index
    %45 = vector.load %arg9[%c0_38, %c3, %c0_39, %c0_40] : memref<2x8x32x32xf32, #tpu.memory_space<vmem>>, vector<1x1x32x32xf32>
    %46 = vector.shape_cast %45 : vector<1x1x32x32xf32> to vector<32x32xf32>
    %47 = vector.extract_strided_slice %32 {offsets = [3, 0], sizes = [1, 32], strides = [1, 1]} : vector<8x32xf32> to vector<1x32xf32>
    %cst_41 = arith.constant dense<0.000000e+00> : vector<8x32xf32>
    %48 = tpu.matmul %35, %37, %cst_41 {dimension_numbers = #tpu.dot_dimension_numbers<[1], [0], [0], [1], [0, 0, 1, 1], [], []>} : vector<8x32xf32>, vector<32x32xf32>, vector<8x32xf32> -> vector<8x32xf32>
    %49 = vector.broadcast %38 : vector<1x32xf32> to vector<8x32xf32>
    %50 = arith.addf %48, %49 : vector<8x32xf32>
    %cst_42 = arith.constant dense<0.000000e+00> : vector<8x32xf32>
    %51 = tpu.matmul %28, %40, %cst_42 {dimension_numbers = #tpu.dot_dimension_numbers<[1], [0], [0], [1], [0, 0, 1, 1], [], []>} : vector<8x32xf32>, vector<32x32xf32>, vector<8x32xf32> -> vector<8x32xf32>
    %52 = vector.broadcast %41 : vector<1x32xf32> to vector<8x32xf32>
    %53 = arith.addf %51, %52 : vector<8x32xf32>
    %cst_43 = arith.constant dense<0.000000e+00> : vector<8x32xf32>
    %54 = tpu.matmul %5, %43, %cst_43 {dimension_numbers = #tpu.dot_dimension_numbers<[1], [0], [0], [1], [0, 0, 1, 1], [], []>} : vector<8x32xf32>, vector<32x32xf32>, vector<8x32xf32> -> vector<8x32xf32>
    %55 = vector.broadcast %44 : vector<1x32xf32> to vector<8x32xf32>
    %56 = arith.addf %54, %55 : vector<8x32xf32>
    %57 = vector.shape_cast %50 : vector<8x32xf32> to vector<8x4x8xf32>
    %58 = tpu.transpose %57, [1, 0, 2] : vector<8x4x8xf32> -> vector<4x8x8xf32>
    %59 = vector.shape_cast %53 : vector<8x32xf32> to vector<8x4x8xf32>
    %60 = tpu.transpose %59, [1, 0, 2] : vector<8x4x8xf32> -> vector<4x8x8xf32>
    %61 = vector.shape_cast %56 : vector<8x32xf32> to vector<8x4x8xf32>
    %62 = tpu.transpose %61, [1, 0, 2] : vector<8x4x8xf32> -> vector<4x8x8xf32>
    "tpu.trace_start"() <{level = 10 : i32, message = "hqd,hkd->hqk"}> : () -> ()
    %cst_44 = arith.constant dense<0.000000e+00> : vector<4x8x8xf32>
    %63 = tpu.matmul %58, %60, %cst_44 {dimension_numbers = #tpu.dot_dimension_numbers<[2], [2], [1], [1], [0, 0, 0, 1, 1, 1], [0], [0]>} : vector<4x8x8xf32>, vector<4x8x8xf32>, vector<4x8x8xf32> -> vector<4x8x8xf32>
    "tpu.trace_stop"() : () -> ()
    %cst_45 = arith.constant 0.353553385 : f32
    %64 = vector.broadcast %cst_45 : f32 to vector<4x8x8xf32>
    %65 = arith.mulf %63, %64 : vector<4x8x8xf32>
    %66 = vector.broadcast %21 : vector<1x1x8xf32> to vector<4x8x8xf32>
    %67 = arith.addf %65, %66 : vector<4x8x8xf32>
    %cst_46 = arith.constant dense<0xFF800000> : vector<4x8xf32>
    %68 = vector.multi_reduction <maximumf>, %67, %cst_46 [2] : vector<4x8x8xf32> to vector<4x8xf32>
    %69 = vector.shape_cast %68 : vector<4x8xf32> to vector<4x8x1xf32>
    %70 = vector.broadcast %69 : vector<4x8x1xf32> to vector<4x8x8xf32>
    %71 = arith.subf %67, %70 : vector<4x8x8xf32>
    %72 = math.exp %71 : vector<4x8x8xf32>
    %cst_47 = arith.constant dense<0.000000e+00> : vector<4x8xf32>
    %73 = vector.multi_reduction <add>, %72, %cst_47 [2] : vector<4x8x8xf32> to vector<4x8xf32>
    %74 = vector.shape_cast %73 : vector<4x8xf32> to vector<4x8x1xf32>
    %75 = tpu.reciprocal %74 {approx = true} : vector<4x8x1xf32> -> vector<4x8x1xf32>
    %76 = vector.broadcast %75 : vector<4x8x1xf32> to vector<4x8x8xf32>
    %77 = arith.mulf %72, %76 : vector<4x8x8xf32>
    "tpu.trace_start"() <{level = 10 : i32, message = "hqk,hkd->hqd"}> : () -> ()
    %cst_48 = arith.constant dense<0.000000e+00> : vector<4x8x8xf32>
    %78 = tpu.matmul %77, %62, %cst_48 {dimension_numbers = #tpu.dot_dimension_numbers<[2], [1], [1], [2], [0, 0, 0, 1, 1, 2], [0], [0]>} : vector<4x8x8xf32>, vector<4x8x8xf32>, vector<4x8x8xf32> -> vector<4x8x8xf32>
    "tpu.trace_stop"() : () -> ()
    %79 = tpu.transpose %78, [1, 0, 2] : vector<4x8x8xf32> -> vector<8x4x8xf32>
    %80 = vector.shape_cast %79 : vector<8x4x8xf32> to vector<8x32xf32>
    %cst_49 = arith.constant dense<0.000000e+00> : vector<8x32xf32>
    %81 = tpu.matmul %80, %46, %cst_49 {dimension_numbers = #tpu.dot_dimension_numbers<[1], [0], [0], [1], [0, 0, 1, 1], [], []>} : vector<8x32xf32>, vector<32x32xf32>, vector<8x32xf32> -> vector<8x32xf32>
    %82 = vector.broadcast %47 : vector<1x32xf32> to vector<8x32xf32>
    %83 = arith.addf %81, %82 : vector<8x32xf32>
    %84 = vector.extract_strided_slice %34 {offsets = [0, 0], sizes = [1, 32], strides = [1, 1]} : vector<6x32xf32> to vector<1x32xf32>
    %85 = vector.extract_strided_slice %34 {offsets = [1, 0], sizes = [1, 32], strides = [1, 1]} : vector<6x32xf32> to vector<1x32xf32>
    %cst_50 = arith.constant dense<0.000000e+00> : vector<8xf32>
    %86 = vector.multi_reduction <add>, %83, %cst_50 [1] : vector<8x32xf32> to vector<8xf32>
    %87 = vector.shape_cast %86 : vector<8xf32> to vector<8x1xf32>
    %cst_51 = arith.constant 3.200000e+01 : f32
    %88 = vector.broadcast %cst_51 : f32 to vector<8x1xf32>
    %89 = arith.divf %87, %88 : vector<8x1xf32>
    %90 = vector.broadcast %89 : vector<8x1xf32> to vector<8x32xf32>
    %91 = arith.subf %83, %90 : vector<8x32xf32>
    %92 = arith.mulf %91, %91 : vector<8x32xf32>
    %cst_52 = arith.constant dense<0.000000e+00> : vector<8xf32>
    %93 = vector.multi_reduction <add>, %92, %cst_52 [1] : vector<8x32xf32> to vector<8xf32>
    %94 = vector.shape_cast %93 : vector<8xf32> to vector<8x1xf32>
    %cst_53 = arith.constant 3.200000e+01 : f32
    %95 = vector.broadcast %cst_53 : f32 to vector<8x1xf32>
    %96 = arith.divf %94, %95 : vector<8x1xf32>
    %97 = vector.broadcast %89 : vector<8x1xf32> to vector<8x32xf32>
    %98 = arith.subf %83, %97 : vector<8x32xf32>
    %cst_54 = arith.constant 9.99999974E-6 : f32
    %99 = vector.broadcast %cst_54 : f32 to vector<8x1xf32>
    %100 = arith.addf %96, %99 : vector<8x1xf32>
    %101 = math.rsqrt %100 : vector<8x1xf32>
    %102 = vector.broadcast %101 : vector<8x1xf32> to vector<8x32xf32>
    %103 = arith.mulf %98, %102 : vector<8x32xf32>
    %104 = vector.broadcast %84 : vector<1x32xf32> to vector<8x32xf32>
    %105 = arith.mulf %103, %104 : vector<8x32xf32>
    %106 = vector.broadcast %85 : vector<1x32xf32> to vector<8x32xf32>
    %107 = arith.addf %105, %106 : vector<8x32xf32>
    %108 = arith.addf %107, %3 : vector<8x32xf32>
    %c0_55 = arith.constant 0 : index
    %c4 = arith.constant 4 : index
    %c0_56 = arith.constant 0 : index
    %c0_57 = arith.constant 0 : index
    %109 = vector.load %arg9[%c0_55, %c4, %c0_56, %c0_57] : memref<2x8x32x32xf32, #tpu.memory_space<vmem>>, vector<1x1x32x32xf32>
    %110 = vector.shape_cast %109 : vector<1x1x32x32xf32> to vector<32x32xf32>
    %111 = vector.extract_strided_slice %32 {offsets = [4, 0], sizes = [1, 32], strides = [1, 1]} : vector<8x32xf32> to vector<1x32xf32>
    %c0_58 = arith.constant 0 : index
    %c5 = arith.constant 5 : index
    %c0_59 = arith.constant 0 : index
    %c0_60 = arith.constant 0 : index
    %112 = vector.load %arg9[%c0_58, %c5, %c0_59, %c0_60] : memref<2x8x32x32xf32, #tpu.memory_space<vmem>>, vector<1x1x32x32xf32>
    %113 = vector.shape_cast %112 : vector<1x1x32x32xf32> to vector<32x32xf32>
    %114 = vector.extract_strided_slice %32 {offsets = [5, 0], sizes = [1, 32], strides = [1, 1]} : vector<8x32xf32> to vector<1x32xf32>
    %c0_61 = arith.constant 0 : index
    %c6 = arith.constant 6 : index
    %c0_62 = arith.constant 0 : index
    %c0_63 = arith.constant 0 : index
    %115 = vector.load %arg9[%c0_61, %c6, %c0_62, %c0_63] : memref<2x8x32x32xf32, #tpu.memory_space<vmem>>, vector<1x1x32x32xf32>
    %116 = vector.shape_cast %115 : vector<1x1x32x32xf32> to vector<32x32xf32>
    %117 = vector.extract_strided_slice %32 {offsets = [6, 0], sizes = [1, 32], strides = [1, 1]} : vector<8x32xf32> to vector<1x32xf32>
    %c0_64 = arith.constant 0 : index
    %c7 = arith.constant 7 : index
    %c0_65 = arith.constant 0 : index
    %c0_66 = arith.constant 0 : index
    %118 = vector.load %arg9[%c0_64, %c7, %c0_65, %c0_66] : memref<2x8x32x32xf32, #tpu.memory_space<vmem>>, vector<1x1x32x32xf32>
    %119 = vector.shape_cast %118 : vector<1x1x32x32xf32> to vector<32x32xf32>
    %120 = vector.extract_strided_slice %32 {offsets = [7, 0], sizes = [1, 32], strides = [1, 1]} : vector<8x32xf32> to vector<1x32xf32>
    %cst_67 = arith.constant dense<0.000000e+00> : vector<8x32xf32>
    %121 = tpu.matmul %108, %110, %cst_67 {dimension_numbers = #tpu.dot_dimension_numbers<[1], [0], [0], [1], [0, 0, 1, 1], [], []>} : vector<8x32xf32>, vector<32x32xf32>, vector<8x32xf32> -> vector<8x32xf32>
    %122 = vector.broadcast %111 : vector<1x32xf32> to vector<8x32xf32>
    %123 = arith.addf %121, %122 : vector<8x32xf32>
    %cst_68 = arith.constant dense<0.000000e+00> : vector<16x32xf32>
    %124 = tpu.matmul %29, %113, %cst_68 {dimension_numbers = #tpu.dot_dimension_numbers<[1], [0], [0], [1], [0, 0, 1, 1], [], []>} : vector<16x32xf32>, vector<32x32xf32>, vector<16x32xf32> -> vector<16x32xf32>
    %125 = vector.broadcast %114 : vector<1x32xf32> to vector<16x32xf32>
    %126 = arith.addf %124, %125 : vector<16x32xf32>
    %cst_69 = arith.constant dense<0.000000e+00> : vector<16x32xf32>
    %127 = tpu.matmul %9, %116, %cst_69 {dimension_numbers = #tpu.dot_dimension_numbers<[1], [0], [0], [1], [0, 0, 1, 1], [], []>} : vector<16x32xf32>, vector<32x32xf32>, vector<16x32xf32> -> vector<16x32xf32>
    %128 = vector.broadcast %117 : vector<1x32xf32> to vector<16x32xf32>
    %129 = arith.addf %127, %128 : vector<16x32xf32>
    %130 = vector.shape_cast %123 : vector<8x32xf32> to vector<8x4x8xf32>
    %131 = tpu.transpose %130, [1, 0, 2] : vector<8x4x8xf32> -> vector<4x8x8xf32>
    %132 = vector.shape_cast %126 : vector<16x32xf32> to vector<16x4x8xf32>
    %133 = tpu.transpose %132, [1, 0, 2] : vector<16x4x8xf32> -> vector<4x16x8xf32>
    %134 = vector.shape_cast %129 : vector<16x32xf32> to vector<16x4x8xf32>
    %135 = tpu.transpose %134, [1, 0, 2] : vector<16x4x8xf32> -> vector<4x16x8xf32>
    "tpu.trace_start"() <{level = 10 : i32, message = "hqd,hkd->hqk"}> : () -> ()
    %cst_70 = arith.constant dense<0.000000e+00> : vector<4x8x16xf32>
    %136 = tpu.matmul %131, %133, %cst_70 {dimension_numbers = #tpu.dot_dimension_numbers<[2], [2], [1], [1], [0, 0, 0, 1, 1, 1], [0], [0]>} : vector<4x8x8xf32>, vector<4x16x8xf32>, vector<4x8x16xf32> -> vector<4x8x16xf32>
    "tpu.trace_stop"() : () -> ()
    %cst_71 = arith.constant 0.353553385 : f32
    %137 = vector.broadcast %cst_71 : f32 to vector<4x8x16xf32>
    %138 = arith.mulf %136, %137 : vector<4x8x16xf32>
    %139 = vector.broadcast %27 : vector<1x1x16xf32> to vector<4x8x16xf32>
    %140 = arith.addf %138, %139 : vector<4x8x16xf32>
    %cst_72 = arith.constant dense<0xFF800000> : vector<4x8xf32>
    %141 = vector.multi_reduction <maximumf>, %140, %cst_72 [2] : vector<4x8x16xf32> to vector<4x8xf32>
    %142 = vector.shape_cast %141 : vector<4x8xf32> to vector<4x8x1xf32>
    %143 = vector.broadcast %142 : vector<4x8x1xf32> to vector<4x8x16xf32>
    %144 = arith.subf %140, %143 : vector<4x8x16xf32>
    %145 = math.exp %144 : vector<4x8x16xf32>
    %cst_73 = arith.constant dense<0.000000e+00> : vector<4x8xf32>
    %146 = vector.multi_reduction <add>, %145, %cst_73 [2] : vector<4x8x16xf32> to vector<4x8xf32>
    %147 = vector.shape_cast %146 : vector<4x8xf32> to vector<4x8x1xf32>
    %148 = tpu.reciprocal %147 {approx = true} : vector<4x8x1xf32> -> vector<4x8x1xf32>
    %149 = vector.broadcast %148 : vector<4x8x1xf32> to vector<4x8x16xf32>
    %150 = arith.mulf %145, %149 : vector<4x8x16xf32>
    "tpu.trace_start"() <{level = 10 : i32, message = "hqk,hkd->hqd"}> : () -> ()
    %cst_74 = arith.constant dense<0.000000e+00> : vector<4x8x8xf32>
    %151 = tpu.matmul %150, %135, %cst_74 {dimension_numbers = #tpu.dot_dimension_numbers<[2], [1], [1], [2], [0, 0, 0, 1, 1, 2], [0], [0]>} : vector<4x8x16xf32>, vector<4x16x8xf32>, vector<4x8x8xf32> -> vector<4x8x8xf32>
    "tpu.trace_stop"() : () -> ()
    %152 = tpu.transpose %151, [1, 0, 2] : vector<4x8x8xf32> -> vector<8x4x8xf32>
    %153 = vector.shape_cast %152 : vector<8x4x8xf32> to vector<8x32xf32>
    %cst_75 = arith.constant dense<0.000000e+00> : vector<8x32xf32>
    %154 = tpu.matmul %153, %119, %cst_75 {dimension_numbers = #tpu.dot_dimension_numbers<[1], [0], [0], [1], [0, 0, 1, 1], [], []>} : vector<8x32xf32>, vector<32x32xf32>, vector<8x32xf32> -> vector<8x32xf32>
    %155 = vector.broadcast %120 : vector<1x32xf32> to vector<8x32xf32>
    %156 = arith.addf %154, %155 : vector<8x32xf32>
    %157 = arith.addf %1, %156 : vector<8x32xf32>
    %158 = vector.extract_strided_slice %34 {offsets = [2, 0], sizes = [1, 32], strides = [1, 1]} : vector<6x32xf32> to vector<1x32xf32>
    %159 = vector.extract_strided_slice %34 {offsets = [3, 0], sizes = [1, 32], strides = [1, 1]} : vector<6x32xf32> to vector<1x32xf32>
    %cst_76 = arith.constant dense<0.000000e+00> : vector<8xf32>
    %160 = vector.multi_reduction <add>, %157, %cst_76 [1] : vector<8x32xf32> to vector<8xf32>
    %161 = vector.shape_cast %160 : vector<8xf32> to vector<8x1xf32>
    %cst_77 = arith.constant 3.200000e+01 : f32
    %162 = vector.broadcast %cst_77 : f32 to vector<8x1xf32>
    %163 = arith.divf %161, %162 : vector<8x1xf32>
    %164 = vector.broadcast %163 : vector<8x1xf32> to vector<8x32xf32>
    %165 = arith.subf %157, %164 : vector<8x32xf32>
    %166 = arith.mulf %165, %165 : vector<8x32xf32>
    %cst_78 = arith.constant dense<0.000000e+00> : vector<8xf32>
    %167 = vector.multi_reduction <add>, %166, %cst_78 [1] : vector<8x32xf32> to vector<8xf32>
    %168 = vector.shape_cast %167 : vector<8xf32> to vector<8x1xf32>
    %cst_79 = arith.constant 3.200000e+01 : f32
    %169 = vector.broadcast %cst_79 : f32 to vector<8x1xf32>
    %170 = arith.divf %168, %169 : vector<8x1xf32>
    %171 = vector.broadcast %163 : vector<8x1xf32> to vector<8x32xf32>
    %172 = arith.subf %157, %171 : vector<8x32xf32>
    %cst_80 = arith.constant 9.99999974E-6 : f32
    %173 = vector.broadcast %cst_80 : f32 to vector<8x1xf32>
    %174 = arith.addf %170, %173 : vector<8x1xf32>
    %175 = math.rsqrt %174 : vector<8x1xf32>
    %176 = vector.broadcast %175 : vector<8x1xf32> to vector<8x32xf32>
    %177 = arith.mulf %172, %176 : vector<8x32xf32>
    %178 = vector.broadcast %158 : vector<1x32xf32> to vector<8x32xf32>
    %179 = arith.mulf %177, %178 : vector<8x32xf32>
    %180 = vector.broadcast %159 : vector<1x32xf32> to vector<8x32xf32>
    %181 = arith.addf %179, %180 : vector<8x32xf32>
    %c0_81 = arith.constant 0 : index
    %c0_82 = arith.constant 0 : index
    %c0_83 = arith.constant 0 : index
    %182 = vector.load %arg11[%c0_81, %c0_82, %c0_83] : memref<2x32x64xf32, #tpu.memory_space<vmem>>, vector<1x32x64xf32>
    %183 = vector.shape_cast %182 : vector<1x32x64xf32> to vector<32x64xf32>
    %cst_84 = arith.constant dense<0.000000e+00> : vector<8x64xf32>
    %184 = tpu.matmul %181, %183, %cst_84 {dimension_numbers = #tpu.dot_dimension_numbers<[1], [0], [0], [1], [0, 0, 1, 1], [], []>} : vector<8x32xf32>, vector<32x64xf32>, vector<8x64xf32> -> vector<8x64xf32>
    %c0_85 = arith.constant 0 : index
    %c0_86 = arith.constant 0 : index
    %c0_87 = arith.constant 0 : index
    %185 = vector.load %arg12[%c0_85, %c0_86, %c0_87] : memref<2x1x64xf32, #tpu.memory_space<vmem>>, vector<1x1x64xf32>
    %186 = vector.shape_cast %185 : vector<1x1x64xf32> to vector<1x64xf32>
    %187 = vector.broadcast %186 : vector<1x64xf32> to vector<8x64xf32>
    %188 = arith.addf %184, %187 : vector<8x64xf32>
    %cst_88 = arith.constant 0.000000e+00 : f32
    %189 = vector.broadcast %cst_88 : f32 to vector<8x64xf32>
    %190 = arith.maximumf %188, %189 : vector<8x64xf32>
    %c0_89 = arith.constant 0 : index
    %c0_90 = arith.constant 0 : index
    %c0_91 = arith.constant 0 : index
    %191 = vector.load %arg13[%c0_89, %c0_90, %c0_91] : memref<2x64x32xf32, #tpu.memory_space<vmem>>, vector<1x64x32xf32>
    %192 = vector.shape_cast %191 : vector<1x64x32xf32> to vector<64x32xf32>
    %cst_92 = arith.constant dense<0.000000e+00> : vector<8x32xf32>
    %193 = tpu.matmul %190, %192, %cst_92 {dimension_numbers = #tpu.dot_dimension_numbers<[1], [0], [0], [1], [0, 0, 1, 1], [], []>} : vector<8x64xf32>, vector<64x32xf32>, vector<8x32xf32> -> vector<8x32xf32>
    %c0_93 = arith.constant 0 : index
    %c0_94 = arith.constant 0 : index
    %c0_95 = arith.constant 0 : index
    %194 = vector.load %arg14[%c0_93, %c0_94, %c0_95] : memref<2x1x32xf32, #tpu.memory_space<vmem>>, vector<1x1x32xf32>
    %195 = vector.shape_cast %194 : vector<1x1x32xf32> to vector<1x32xf32>
    %196 = vector.broadcast %195 : vector<1x32xf32> to vector<8x32xf32>
    %197 = arith.addf %193, %196 : vector<8x32xf32>
    %198 = arith.addf %181, %197 : vector<8x32xf32>
    %199 = vector.extract_strided_slice %34 {offsets = [4, 0], sizes = [1, 32], strides = [1, 1]} : vector<6x32xf32> to vector<1x32xf32>
    %200 = vector.extract_strided_slice %34 {offsets = [5, 0], sizes = [1, 32], strides = [1, 1]} : vector<6x32xf32> to vector<1x32xf32>
    %cst_96 = arith.constant dense<0.000000e+00> : vector<8xf32>
    %201 = vector.multi_reduction <add>, %198, %cst_96 [1] : vector<8x32xf32> to vector<8xf32>
    %202 = vector.shape_cast %201 : vector<8xf32> to vector<8x1xf32>
    %cst_97 = arith.constant 3.200000e+01 : f32
    %203 = vector.broadcast %cst_97 : f32 to vector<8x1xf32>
    %204 = arith.divf %202, %203 : vector<8x1xf32>
    %205 = vector.broadcast %204 : vector<8x1xf32> to vector<8x32xf32>
    %206 = arith.subf %198, %205 : vector<8x32xf32>
    %207 = arith.mulf %206, %206 : vector<8x32xf32>
    %cst_98 = arith.constant dense<0.000000e+00> : vector<8xf32>
    %208 = vector.multi_reduction <add>, %207, %cst_98 [1] : vector<8x32xf32> to vector<8xf32>
    %209 = vector.shape_cast %208 : vector<8xf32> to vector<8x1xf32>
    %cst_99 = arith.constant 3.200000e+01 : f32
    %210 = vector.broadcast %cst_99 : f32 to vector<8x1xf32>
    %211 = arith.divf %209, %210 : vector<8x1xf32>
    %212 = vector.broadcast %204 : vector<8x1xf32> to vector<8x32xf32>
    %213 = arith.subf %198, %212 : vector<8x32xf32>
    %cst_100 = arith.constant 9.99999974E-6 : f32
    %214 = vector.broadcast %cst_100 : f32 to vector<8x1xf32>
    %215 = arith.addf %211, %214 : vector<8x1xf32>
    %216 = math.rsqrt %215 : vector<8x1xf32>
    %217 = vector.broadcast %216 : vector<8x1xf32> to vector<8x32xf32>
    %218 = arith.mulf %213, %217 : vector<8x32xf32>
    %219 = vector.broadcast %199 : vector<1x32xf32> to vector<8x32xf32>
    %220 = arith.mulf %218, %219 : vector<8x32xf32>
    %221 = vector.broadcast %200 : vector<1x32xf32> to vector<8x32xf32>
    %222 = arith.addf %220, %221 : vector<8x32xf32>
    %223 = vector.extract_strided_slice %30 {offsets = [0, 0], sizes = [1, 32], strides = [1, 1]} : vector<2x32xf32> to vector<1x32xf32>
    %224 = vector.extract_strided_slice %30 {offsets = [1, 0], sizes = [1, 32], strides = [1, 1]} : vector<2x32xf32> to vector<1x32xf32>
    %cst_101 = arith.constant dense<0.000000e+00> : vector<8xf32>
    %225 = vector.multi_reduction <add>, %222, %cst_101 [1] : vector<8x32xf32> to vector<8xf32>
    %226 = vector.shape_cast %225 : vector<8xf32> to vector<8x1xf32>
    %cst_102 = arith.constant 3.200000e+01 : f32
    %227 = vector.broadcast %cst_102 : f32 to vector<8x1xf32>
    %228 = arith.divf %226, %227 : vector<8x1xf32>
    %229 = vector.broadcast %228 : vector<8x1xf32> to vector<8x32xf32>
    %230 = arith.subf %222, %229 : vector<8x32xf32>
    %231 = arith.mulf %230, %230 : vector<8x32xf32>
    %cst_103 = arith.constant dense<0.000000e+00> : vector<8xf32>
    %232 = vector.multi_reduction <add>, %231, %cst_103 [1] : vector<8x32xf32> to vector<8xf32>
    %233 = vector.shape_cast %232 : vector<8xf32> to vector<8x1xf32>
    %cst_104 = arith.constant 3.200000e+01 : f32
    %234 = vector.broadcast %cst_104 : f32 to vector<8x1xf32>
    %235 = arith.divf %233, %234 : vector<8x1xf32>
    %236 = vector.broadcast %228 : vector<8x1xf32> to vector<8x32xf32>
    %237 = arith.subf %222, %236 : vector<8x32xf32>
    %cst_105 = arith.constant 9.99999974E-6 : f32
    %238 = vector.broadcast %cst_105 : f32 to vector<8x1xf32>
    %239 = arith.addf %235, %238 : vector<8x1xf32>
    %240 = math.rsqrt %239 : vector<8x1xf32>
    %241 = vector.broadcast %240 : vector<8x1xf32> to vector<8x32xf32>
    %242 = arith.mulf %237, %241 : vector<8x32xf32>
    %243 = vector.broadcast %223 : vector<1x32xf32> to vector<8x32xf32>
    %244 = arith.mulf %242, %243 : vector<8x32xf32>
    %245 = vector.broadcast %224 : vector<1x32xf32> to vector<8x32xf32>
    %246 = arith.addf %244, %245 : vector<8x32xf32>
    %c0_106 = arith.constant 0 : index
    %c0_107 = arith.constant 0 : index
    %c0_108 = arith.constant 0 : index
    %c0_109 = arith.constant 0 : index
    %247 = vector.load %arg17[%c0_106, %c0_107, %c0_108, %c0_109] : memref<2x1x8x32xf32, #tpu.memory_space<vmem>>, vector<1x1x8x32xf32>
    %248 = vector.shape_cast %247 : vector<1x1x8x32xf32> to vector<8x32xf32>
    %249 = vector.shape_cast %246 : vector<8x32xf32> to vector<1x1x8x32xf32>
    tpu.vector_store %arg17[%c0_106, %c0_107, %c0_108, %c0_109], %249 {strides = array<i32>} : memref<2x1x8x32xf32, #tpu.memory_space<vmem>>, vector<1x1x8x32xf32>,
    %c1_110 = arith.constant 1 : index
    %c0_111 = arith.constant 0 : index
    %c0_112 = arith.constant 0 : index
    %250 = vector.load %arg10[%c1_110, %c0_111, %c0_112] : memref<2x8x32xf32, #tpu.memory_space<vmem>>, vector<1x8x32xf32>
    %251 = vector.shape_cast %250 : vector<1x8x32xf32> to vector<8x32xf32>
    %c1_113 = arith.constant 1 : index
    %c0_114 = arith.constant 0 : index
    %c0_115 = arith.constant 0 : index
    %252 = vector.load %arg15[%c1_113, %c0_114, %c0_115] : memref<2x6x32xf32, #tpu.memory_space<vmem>>, vector<1x6x32xf32>
    %253 = vector.shape_cast %252 : vector<1x6x32xf32> to vector<6x32xf32>
    %254 = arith.addf %222, %3 : vector<8x32xf32>
    %c1_116 = arith.constant 1 : index
    %c0_117 = arith.constant 0 : index
    %c0_118 = arith.constant 0 : index
    %c0_119 = arith.constant 0 : index
    %255 = vector.load %arg9[%c1_116, %c0_117, %c0_118, %c0_119] : memref<2x8x32x32xf32, #tpu.memory_space<vmem>>, vector<1x1x32x32xf32>
    %256 = vector.shape_cast %255 : vector<1x1x32x32xf32> to vector<32x32xf32>
    %257 = vector.extract_strided_slice %251 {offsets = [0, 0], sizes = [1, 32], strides = [1, 1]} : vector<8x32xf32> to vector<1x32xf32>
    %c1_120 = arith.constant 1 : index
    %c1_121 = arith.constant 1 : index
    %c0_122 = arith.constant 0 : index
    %c0_123 = arith.constant 0 : index
    %258 = vector.load %arg9[%c1_120, %c1_121, %c0_122, %c0_123] : memref<2x8x32x32xf32, #tpu.memory_space<vmem>>, vector<1x1x32x32xf32>
    %259 = vector.shape_cast %258 : vector<1x1x32x32xf32> to vector<32x32xf32>
    %260 = vector.extract_strided_slice %251 {offsets = [1, 0], sizes = [1, 32], strides = [1, 1]} : vector<8x32xf32> to vector<1x32xf32>
    %c1_124 = arith.constant 1 : index
    %c2_125 = arith.constant 2 : index
    %c0_126 = arith.constant 0 : index
    %c0_127 = arith.constant 0 : index
    %261 = vector.load %arg9[%c1_124, %c2_125, %c0_126, %c0_127] : memref<2x8x32x32xf32, #tpu.memory_space<vmem>>, vector<1x1x32x32xf32>
    %262 = vector.shape_cast %261 : vector<1x1x32x32xf32> to vector<32x32xf32>
    %263 = vector.extract_strided_slice %251 {offsets = [2, 0], sizes = [1, 32], strides = [1, 1]} : vector<8x32xf32> to vector<1x32xf32>
    %c1_128 = arith.constant 1 : index
    %c3_129 = arith.constant 3 : index
    %c0_130 = arith.constant 0 : index
    %c0_131 = arith.constant 0 : index
    %264 = vector.load %arg9[%c1_128, %c3_129, %c0_130, %c0_131] : memref<2x8x32x32xf32, #tpu.memory_space<vmem>>, vector<1x1x32x32xf32>
    %265 = vector.shape_cast %264 : vector<1x1x32x32xf32> to vector<32x32xf32>
    %266 = vector.extract_strided_slice %251 {offsets = [3, 0], sizes = [1, 32], strides = [1, 1]} : vector<8x32xf32> to vector<1x32xf32>
    %cst_132 = arith.constant dense<0.000000e+00> : vector<8x32xf32>
    %267 = tpu.matmul %254, %256, %cst_132 {dimension_numbers = #tpu.dot_dimension_numbers<[1], [0], [0], [1], [0, 0, 1, 1], [], []>} : vector<8x32xf32>, vector<32x32xf32>, vector<8x32xf32> -> vector<8x32xf32>
    %268 = vector.broadcast %257 : vector<1x32xf32> to vector<8x32xf32>
    %269 = arith.addf %267, %268 : vector<8x32xf32>
    %cst_133 = arith.constant dense<0.000000e+00> : vector<8x32xf32>
    %270 = tpu.matmul %28, %259, %cst_133 {dimension_numbers = #tpu.dot_dimension_numbers<[1], [0], [0], [1], [0, 0, 1, 1], [], []>} : vector<8x32xf32>, vector<32x32xf32>, vector<8x32xf32> -> vector<8x32xf32>
    %271 = vector.broadcast %260 : vector<1x32xf32> to vector<8x32xf32>
    %272 = arith.addf %270, %271 : vector<8x32xf32>
    %cst_134 = arith.constant dense<0.000000e+00> : vector<8x32xf32>
    %273 = tpu.matmul %5, %262, %cst_134 {dimension_numbers = #tpu.dot_dimension_numbers<[1], [0], [0], [1], [0, 0, 1, 1], [], []>} : vector<8x32xf32>, vector<32x32xf32>, vector<8x32xf32> -> vector<8x32xf32>
    %274 = vector.broadcast %263 : vector<1x32xf32> to vector<8x32xf32>
    %275 = arith.addf %273, %274 : vector<8x32xf32>
    %276 = vector.shape_cast %269 : vector<8x32xf32> to vector<8x4x8xf32>
    %277 = tpu.transpose %276, [1, 0, 2] : vector<8x4x8xf32> -> vector<4x8x8xf32>
    %278 = vector.shape_cast %272 : vector<8x32xf32> to vector<8x4x8xf32>
    %279 = tpu.transpose %278, [1, 0, 2] : vector<8x4x8xf32> -> vector<4x8x8xf32>
    %280 = vector.shape_cast %275 : vector<8x32xf32> to vector<8x4x8xf32>
    %281 = tpu.transpose %280, [1, 0, 2] : vector<8x4x8xf32> -> vector<4x8x8xf32>
    "tpu.trace_start"() <{level = 10 : i32, message = "hqd,hkd->hqk"}> : () -> ()
    %cst_135 = arith.constant dense<0.000000e+00> : vector<4x8x8xf32>
    %282 = tpu.matmul %277, %279, %cst_135 {dimension_numbers = #tpu.dot_dimension_numbers<[2], [2], [1], [1], [0, 0, 0, 1, 1, 1], [0], [0]>} : vector<4x8x8xf32>, vector<4x8x8xf32>, vector<4x8x8xf32> -> vector<4x8x8xf32>
    "tpu.trace_stop"() : () -> ()
    %cst_136 = arith.constant 0.353553385 : f32
    %283 = vector.broadcast %cst_136 : f32 to vector<4x8x8xf32>
    %284 = arith.mulf %282, %283 : vector<4x8x8xf32>
    %285 = vector.broadcast %21 : vector<1x1x8xf32> to vector<4x8x8xf32>
    %286 = arith.addf %284, %285 : vector<4x8x8xf32>
    %cst_137 = arith.constant dense<0xFF800000> : vector<4x8xf32>
    %287 = vector.multi_reduction <maximumf>, %286, %cst_137 [2] : vector<4x8x8xf32> to vector<4x8xf32>
    %288 = vector.shape_cast %287 : vector<4x8xf32> to vector<4x8x1xf32>
    %289 = vector.broadcast %288 : vector<4x8x1xf32> to vector<4x8x8xf32>
    %290 = arith.subf %286, %289 : vector<4x8x8xf32>
    %291 = math.exp %290 : vector<4x8x8xf32>
    %cst_138 = arith.constant dense<0.000000e+00> : vector<4x8xf32>
    %292 = vector.multi_reduction <add>, %291, %cst_138 [2] : vector<4x8x8xf32> to vector<4x8xf32>
    %293 = vector.shape_cast %292 : vector<4x8xf32> to vector<4x8x1xf32>
    %294 = tpu.reciprocal %293 {approx = true} : vector<4x8x1xf32> -> vector<4x8x1xf32>
    %295 = vector.broadcast %294 : vector<4x8x1xf32> to vector<4x8x8xf32>
    %296 = arith.mulf %291, %295 : vector<4x8x8xf32>
    "tpu.trace_start"() <{level = 10 : i32, message = "hqk,hkd->hqd"}> : () -> ()
    %cst_139 = arith.constant dense<0.000000e+00> : vector<4x8x8xf32>
    %297 = tpu.matmul %296, %281, %cst_139 {dimension_numbers = #tpu.dot_dimension_numbers<[2], [1], [1], [2], [0, 0, 0, 1, 1, 2], [0], [0]>} : vector<4x8x8xf32>, vector<4x8x8xf32>, vector<4x8x8xf32> -> vector<4x8x8xf32>
    "tpu.trace_stop"() : () -> ()
    %298 = tpu.transpose %297, [1, 0, 2] : vector<4x8x8xf32> -> vector<8x4x8xf32>
    %299 = vector.shape_cast %298 : vector<8x4x8xf32> to vector<8x32xf32>
    %cst_140 = arith.constant dense<0.000000e+00> : vector<8x32xf32>
    %300 = tpu.matmul %299, %265, %cst_140 {dimension_numbers = #tpu.dot_dimension_numbers<[1], [0], [0], [1], [0, 0, 1, 1], [], []>} : vector<8x32xf32>, vector<32x32xf32>, vector<8x32xf32> -> vector<8x32xf32>
    %301 = vector.broadcast %266 : vector<1x32xf32> to vector<8x32xf32>
    %302 = arith.addf %300, %301 : vector<8x32xf32>
    %303 = vector.extract_strided_slice %253 {offsets = [0, 0], sizes = [1, 32], strides = [1, 1]} : vector<6x32xf32> to vector<1x32xf32>
    %304 = vector.extract_strided_slice %253 {offsets = [1, 0], sizes = [1, 32], strides = [1, 1]} : vector<6x32xf32> to vector<1x32xf32>
    %cst_141 = arith.constant dense<0.000000e+00> : vector<8xf32>
    %305 = vector.multi_reduction <add>, %302, %cst_141 [1] : vector<8x32xf32> to vector<8xf32>
    %306 = vector.shape_cast %305 : vector<8xf32> to vector<8x1xf32>
    %cst_142 = arith.constant 3.200000e+01 : f32
    %307 = vector.broadcast %cst_142 : f32 to vector<8x1xf32>
    %308 = arith.divf %306, %307 : vector<8x1xf32>
    %309 = vector.broadcast %308 : vector<8x1xf32> to vector<8x32xf32>
    %310 = arith.subf %302, %309 : vector<8x32xf32>
    %311 = arith.mulf %310, %310 : vector<8x32xf32>
    %cst_143 = arith.constant dense<0.000000e+00> : vector<8xf32>
    %312 = vector.multi_reduction <add>, %311, %cst_143 [1] : vector<8x32xf32> to vector<8xf32>
    %313 = vector.shape_cast %312 : vector<8xf32> to vector<8x1xf32>
    %cst_144 = arith.constant 3.200000e+01 : f32
    %314 = vector.broadcast %cst_144 : f32 to vector<8x1xf32>
    %315 = arith.divf %313, %314 : vector<8x1xf32>
    %316 = vector.broadcast %308 : vector<8x1xf32> to vector<8x32xf32>
    %317 = arith.subf %302, %316 : vector<8x32xf32>
    %cst_145 = arith.constant 9.99999974E-6 : f32
    %318 = vector.broadcast %cst_145 : f32 to vector<8x1xf32>
    %319 = arith.addf %315, %318 : vector<8x1xf32>
    %320 = math.rsqrt %319 : vector<8x1xf32>
    %321 = vector.broadcast %320 : vector<8x1xf32> to vector<8x32xf32>
    %322 = arith.mulf %317, %321 : vector<8x32xf32>
    %323 = vector.broadcast %303 : vector<1x32xf32> to vector<8x32xf32>
    %324 = arith.mulf %322, %323 : vector<8x32xf32>
    %325 = vector.broadcast %304 : vector<1x32xf32> to vector<8x32xf32>
    %326 = arith.addf %324, %325 : vector<8x32xf32>
    %327 = arith.addf %326, %3 : vector<8x32xf32>
    %c1_146 = arith.constant 1 : index
    %c4_147 = arith.constant 4 : index
    %c0_148 = arith.constant 0 : index
    %c0_149 = arith.constant 0 : index
    %328 = vector.load %arg9[%c1_146, %c4_147, %c0_148, %c0_149] : memref<2x8x32x32xf32, #tpu.memory_space<vmem>>, vector<1x1x32x32xf32>
    %329 = vector.shape_cast %328 : vector<1x1x32x32xf32> to vector<32x32xf32>
    %330 = vector.extract_strided_slice %251 {offsets = [4, 0], sizes = [1, 32], strides = [1, 1]} : vector<8x32xf32> to vector<1x32xf32>
    %c1_150 = arith.constant 1 : index
    %c5_151 = arith.constant 5 : index
    %c0_152 = arith.constant 0 : index
    %c0_153 = arith.constant 0 : index
    %331 = vector.load %arg9[%c1_150, %c5_151, %c0_152, %c0_153] : memref<2x8x32x32xf32, #tpu.memory_space<vmem>>, vector<1x1x32x32xf32>
    %332 = vector.shape_cast %331 : vector<1x1x32x32xf32> to vector<32x32xf32>
    %333 = vector.extract_strided_slice %251 {offsets = [5, 0], sizes = [1, 32], strides = [1, 1]} : vector<8x32xf32> to vector<1x32xf32>
    %c1_154 = arith.constant 1 : index
    %c6_155 = arith.constant 6 : index
    %c0_156 = arith.constant 0 : index
    %c0_157 = arith.constant 0 : index
    %334 = vector.load %arg9[%c1_154, %c6_155, %c0_156, %c0_157] : memref<2x8x32x32xf32, #tpu.memory_space<vmem>>, vector<1x1x32x32xf32>
    %335 = vector.shape_cast %334 : vector<1x1x32x32xf32> to vector<32x32xf32>
    %336 = vector.extract_strided_slice %251 {offsets = [6, 0], sizes = [1, 32], strides = [1, 1]} : vector<8x32xf32> to vector<1x32xf32>
    %c1_158 = arith.constant 1 : index
    %c7_159 = arith.constant 7 : index
    %c0_160 = arith.constant 0 : index
    %c0_161 = arith.constant 0 : index
    %337 = vector.load %arg9[%c1_158, %c7_159, %c0_160, %c0_161] : memref<2x8x32x32xf32, #tpu.memory_space<vmem>>, vector<1x1x32x32xf32>
    %338 = vector.shape_cast %337 : vector<1x1x32x32xf32> to vector<32x32xf32>
    %339 = vector.extract_strided_slice %251 {offsets = [7, 0], sizes = [1, 32], strides = [1, 1]} : vector<8x32xf32> to vector<1x32xf32>
    %cst_162 = arith.constant dense<0.000000e+00> : vector<8x32xf32>
    %340 = tpu.matmul %327, %329, %cst_162 {dimension_numbers = #tpu.dot_dimension_numbers<[1], [0], [0], [1], [0, 0, 1, 1], [], []>} : vector<8x32xf32>, vector<32x32xf32>, vector<8x32xf32> -> vector<8x32xf32>
    %341 = vector.broadcast %330 : vector<1x32xf32> to vector<8x32xf32>
    %342 = arith.addf %340, %341 : vector<8x32xf32>
    %cst_163 = arith.constant dense<0.000000e+00> : vector<16x32xf32>
    %343 = tpu.matmul %29, %332, %cst_163 {dimension_numbers = #tpu.dot_dimension_numbers<[1], [0], [0], [1], [0, 0, 1, 1], [], []>} : vector<16x32xf32>, vector<32x32xf32>, vector<16x32xf32> -> vector<16x32xf32>
    %344 = vector.broadcast %333 : vector<1x32xf32> to vector<16x32xf32>
    %345 = arith.addf %343, %344 : vector<16x32xf32>
    %cst_164 = arith.constant dense<0.000000e+00> : vector<16x32xf32>
    %346 = tpu.matmul %9, %335, %cst_164 {dimension_numbers = #tpu.dot_dimension_numbers<[1], [0], [0], [1], [0, 0, 1, 1], [], []>} : vector<16x32xf32>, vector<32x32xf32>, vector<16x32xf32> -> vector<16x32xf32>
    %347 = vector.broadcast %336 : vector<1x32xf32> to vector<16x32xf32>
    %348 = arith.addf %346, %347 : vector<16x32xf32>
    %349 = vector.shape_cast %342 : vector<8x32xf32> to vector<8x4x8xf32>
    %350 = tpu.transpose %349, [1, 0, 2] : vector<8x4x8xf32> -> vector<4x8x8xf32>
    %351 = vector.shape_cast %345 : vector<16x32xf32> to vector<16x4x8xf32>
    %352 = tpu.transpose %351, [1, 0, 2] : vector<16x4x8xf32> -> vector<4x16x8xf32>
    %353 = vector.shape_cast %348 : vector<16x32xf32> to vector<16x4x8xf32>
    %354 = tpu.transpose %353, [1, 0, 2] : vector<16x4x8xf32> -> vector<4x16x8xf32>
    "tpu.trace_start"() <{level = 10 : i32, message = "hqd,hkd->hqk"}> : () -> ()
    %cst_165 = arith.constant dense<0.000000e+00> : vector<4x8x16xf32>
    %355 = tpu.matmul %350, %352, %cst_165 {dimension_numbers = #tpu.dot_dimension_numbers<[2], [2], [1], [1], [0, 0, 0, 1, 1, 1], [0], [0]>} : vector<4x8x8xf32>, vector<4x16x8xf32>, vector<4x8x16xf32> -> vector<4x8x16xf32>
    "tpu.trace_stop"() : () -> ()
    %cst_166 = arith.constant 0.353553385 : f32
    %356 = vector.broadcast %cst_166 : f32 to vector<4x8x16xf32>
    %357 = arith.mulf %355, %356 : vector<4x8x16xf32>
    %358 = vector.broadcast %27 : vector<1x1x16xf32> to vector<4x8x16xf32>
    %359 = arith.addf %357, %358 : vector<4x8x16xf32>
    %cst_167 = arith.constant dense<0xFF800000> : vector<4x8xf32>
    %360 = vector.multi_reduction <maximumf>, %359, %cst_167 [2] : vector<4x8x16xf32> to vector<4x8xf32>
    %361 = vector.shape_cast %360 : vector<4x8xf32> to vector<4x8x1xf32>
    %362 = vector.broadcast %361 : vector<4x8x1xf32> to vector<4x8x16xf32>
    %363 = arith.subf %359, %362 : vector<4x8x16xf32>
    %364 = math.exp %363 : vector<4x8x16xf32>
    %cst_168 = arith.constant dense<0.000000e+00> : vector<4x8xf32>
    %365 = vector.multi_reduction <add>, %364, %cst_168 [2] : vector<4x8x16xf32> to vector<4x8xf32>
    %366 = vector.shape_cast %365 : vector<4x8xf32> to vector<4x8x1xf32>
    %367 = tpu.reciprocal %366 {approx = true} : vector<4x8x1xf32> -> vector<4x8x1xf32>
    %368 = vector.broadcast %367 : vector<4x8x1xf32> to vector<4x8x16xf32>
    %369 = arith.mulf %364, %368 : vector<4x8x16xf32>
    "tpu.trace_start"() <{level = 10 : i32, message = "hqk,hkd->hqd"}> : () -> ()
    %cst_169 = arith.constant dense<0.000000e+00> : vector<4x8x8xf32>
    %370 = tpu.matmul %369, %354, %cst_169 {dimension_numbers = #tpu.dot_dimension_numbers<[2], [1], [1], [2], [0, 0, 0, 1, 1, 2], [0], [0]>} : vector<4x8x16xf32>, vector<4x16x8xf32>, vector<4x8x8xf32> -> vector<4x8x8xf32>
    "tpu.trace_stop"() : () -> ()
    %371 = tpu.transpose %370, [1, 0, 2] : vector<4x8x8xf32> -> vector<8x4x8xf32>
    %372 = vector.shape_cast %371 : vector<8x4x8xf32> to vector<8x32xf32>
    %cst_170 = arith.constant dense<0.000000e+00> : vector<8x32xf32>
    %373 = tpu.matmul %372, %338, %cst_170 {dimension_numbers = #tpu.dot_dimension_numbers<[1], [0], [0], [1], [0, 0, 1, 1], [], []>} : vector<8x32xf32>, vector<32x32xf32>, vector<8x32xf32> -> vector<8x32xf32>
    %374 = vector.broadcast %339 : vector<1x32xf32> to vector<8x32xf32>
    %375 = arith.addf %373, %374 : vector<8x32xf32>
    %376 = arith.addf %222, %375 : vector<8x32xf32>
    %377 = vector.extract_strided_slice %253 {offsets = [2, 0], sizes = [1, 32], strides = [1, 1]} : vector<6x32xf32> to vector<1x32xf32>
    %378 = vector.extract_strided_slice %253 {offsets = [3, 0], sizes = [1, 32], strides = [1, 1]} : vector<6x32xf32> to vector<1x32xf32>
    %cst_171 = arith.constant dense<0.000000e+00> : vector<8xf32>
    %379 = vector.multi_reduction <add>, %376, %cst_171 [1] : vector<8x32xf32> to vector<8xf32>
    %380 = vector.shape_cast %379 : vector<8xf32> to vector<8x1xf32>
    %cst_172 = arith.constant 3.200000e+01 : f32
    %381 = vector.broadcast %cst_172 : f32 to vector<8x1xf32>
    %382 = arith.divf %380, %381 : vector<8x1xf32>
    %383 = vector.broadcast %382 : vector<8x1xf32> to vector<8x32xf32>
    %384 = arith.subf %376, %383 : vector<8x32xf32>
    %385 = arith.mulf %384, %384 : vector<8x32xf32>
    %cst_173 = arith.constant dense<0.000000e+00> : vector<8xf32>
    %386 = vector.multi_reduction <add>, %385, %cst_173 [1] : vector<8x32xf32> to vector<8xf32>
    %387 = vector.shape_cast %386 : vector<8xf32> to vector<8x1xf32>
    %cst_174 = arith.constant 3.200000e+01 : f32
    %388 = vector.broadcast %cst_174 : f32 to vector<8x1xf32>
    %389 = arith.divf %387, %388 : vector<8x1xf32>
    %390 = vector.broadcast %382 : vector<8x1xf32> to vector<8x32xf32>
    %391 = arith.subf %376, %390 : vector<8x32xf32>
    %cst_175 = arith.constant 9.99999974E-6 : f32
    %392 = vector.broadcast %cst_175 : f32 to vector<8x1xf32>
    %393 = arith.addf %389, %392 : vector<8x1xf32>
    %394 = math.rsqrt %393 : vector<8x1xf32>
    %395 = vector.broadcast %394 : vector<8x1xf32> to vector<8x32xf32>
    %396 = arith.mulf %391, %395 : vector<8x32xf32>
    %397 = vector.broadcast %377 : vector<1x32xf32> to vector<8x32xf32>
    %398 = arith.mulf %396, %397 : vector<8x32xf32>
    %399 = vector.broadcast %378 : vector<1x32xf32> to vector<8x32xf32>
    %400 = arith.addf %398, %399 : vector<8x32xf32>
    %c1_176 = arith.constant 1 : index
    %c0_177 = arith.constant 0 : index
    %c0_178 = arith.constant 0 : index
    %401 = vector.load %arg11[%c1_176, %c0_177, %c0_178] : memref<2x32x64xf32, #tpu.memory_space<vmem>>, vector<1x32x64xf32>
    %402 = vector.shape_cast %401 : vector<1x32x64xf32> to vector<32x64xf32>
    %cst_179 = arith.constant dense<0.000000e+00> : vector<8x64xf32>
    %403 = tpu.matmul %400, %402, %cst_179 {dimension_numbers = #tpu.dot_dimension_numbers<[1], [0], [0], [1], [0, 0, 1, 1], [], []>} : vector<8x32xf32>, vector<32x64xf32>, vector<8x64xf32> -> vector<8x64xf32>
    %c1_180 = arith.constant 1 : index
    %c0_181 = arith.constant 0 : index
    %c0_182 = arith.constant 0 : index
    %404 = vector.load %arg12[%c1_180, %c0_181, %c0_182] : memref<2x1x64xf32, #tpu.memory_space<vmem>>, vector<1x1x64xf32>
    %405 = vector.shape_cast %404 : vector<1x1x64xf32> to vector<1x64xf32>
    %406 = vector.broadcast %405 : vector<1x64xf32> to vector<8x64xf32>
    %407 = arith.addf %403, %406 : vector<8x64xf32>
    %cst_183 = arith.constant 0.000000e+00 : f32
    %408 = vector.broadcast %cst_183 : f32 to vector<8x64xf32>
    %409 = arith.maximumf %407, %408 : vector<8x64xf32>
    %c1_184 = arith.constant 1 : index
    %c0_185 = arith.constant 0 : index
    %c0_186 = arith.constant 0 : index
    %410 = vector.load %arg13[%c1_184, %c0_185, %c0_186] : memref<2x64x32xf32, #tpu.memory_space<vmem>>, vector<1x64x32xf32>
    %411 = vector.shape_cast %410 : vector<1x64x32xf32> to vector<64x32xf32>
    %cst_187 = arith.constant dense<0.000000e+00> : vector<8x32xf32>
    %412 = tpu.matmul %409, %411, %cst_187 {dimension_numbers = #tpu.dot_dimension_numbers<[1], [0], [0], [1], [0, 0, 1, 1], [], []>} : vector<8x64xf32>, vector<64x32xf32>, vector<8x32xf32> -> vector<8x32xf32>
    %c1_188 = arith.constant 1 : index
    %c0_189 = arith.constant 0 : index
    %c0_190 = arith.constant 0 : index
    %413 = vector.load %arg14[%c1_188, %c0_189, %c0_190] : memref<2x1x32xf32, #tpu.memory_space<vmem>>, vector<1x1x32xf32>
    %414 = vector.shape_cast %413 : vector<1x1x32xf32> to vector<1x32xf32>
    %415 = vector.broadcast %414 : vector<1x32xf32> to vector<8x32xf32>
    %416 = arith.addf %412, %415 : vector<8x32xf32>
    %417 = arith.addf %400, %416 : vector<8x32xf32>
    %418 = vector.extract_strided_slice %253 {offsets = [4, 0], sizes = [1, 32], strides = [1, 1]} : vector<6x32xf32> to vector<1x32xf32>
    %419 = vector.extract_strided_slice %253 {offsets = [5, 0], sizes = [1, 32], strides = [1, 1]} : vector<6x32xf32> to vector<1x32xf32>
    %cst_191 = arith.constant dense<0.000000e+00> : vector<8xf32>
    %420 = vector.multi_reduction <add>, %417, %cst_191 [1] : vector<8x32xf32> to vector<8xf32>
    %421 = vector.shape_cast %420 : vector<8xf32> to vector<8x1xf32>
    %cst_192 = arith.constant 3.200000e+01 : f32
    %422 = vector.broadcast %cst_192 : f32 to vector<8x1xf32>
    %423 = arith.divf %421, %422 : vector<8x1xf32>
    %424 = vector.broadcast %423 : vector<8x1xf32> to vector<8x32xf32>
    %425 = arith.subf %417, %424 : vector<8x32xf32>
    %426 = arith.mulf %425, %425 : vector<8x32xf32>
    %cst_193 = arith.constant dense<0.000000e+00> : vector<8xf32>
    %427 = vector.multi_reduction <add>, %426, %cst_193 [1] : vector<8x32xf32> to vector<8xf32>
    %428 = vector.shape_cast %427 : vector<8xf32> to vector<8x1xf32>
    %cst_194 = arith.constant 3.200000e+01 : f32
    %429 = vector.broadcast %cst_194 : f32 to vector<8x1xf32>
    %430 = arith.divf %428, %429 : vector<8x1xf32>
    %431 = vector.broadcast %423 : vector<8x1xf32> to vector<8x32xf32>
    %432 = arith.subf %417, %431 : vector<8x32xf32>
    %cst_195 = arith.constant 9.99999974E-6 : f32
    %433 = vector.broadcast %cst_195 : f32 to vector<8x1xf32>
    %434 = arith.addf %430, %433 : vector<8x1xf32>
    %435 = math.rsqrt %434 : vector<8x1xf32>
    %436 = vector.broadcast %435 : vector<8x1xf32> to vector<8x32xf32>
    %437 = arith.mulf %432, %436 : vector<8x32xf32>
    %438 = vector.broadcast %418 : vector<1x32xf32> to vector<8x32xf32>
    %439 = arith.mulf %437, %438 : vector<8x32xf32>
    %440 = vector.broadcast %419 : vector<1x32xf32> to vector<8x32xf32>
    %441 = arith.addf %439, %440 : vector<8x32xf32>
    %442 = vector.extract_strided_slice %30 {offsets = [0, 0], sizes = [1, 32], strides = [1, 1]} : vector<2x32xf32> to vector<1x32xf32>
    %443 = vector.extract_strided_slice %30 {offsets = [1, 0], sizes = [1, 32], strides = [1, 1]} : vector<2x32xf32> to vector<1x32xf32>
    %cst_196 = arith.constant dense<0.000000e+00> : vector<8xf32>
    %444 = vector.multi_reduction <add>, %441, %cst_196 [1] : vector<8x32xf32> to vector<8xf32>
    %445 = vector.shape_cast %444 : vector<8xf32> to vector<8x1xf32>
    %cst_197 = arith.constant 3.200000e+01 : f32
    %446 = vector.broadcast %cst_197 : f32 to vector<8x1xf32>
    %447 = arith.divf %445, %446 : vector<8x1xf32>
    %448 = vector.broadcast %447 : vector<8x1xf32> to vector<8x32xf32>
    %449 = arith.subf %441, %448 : vector<8x32xf32>
    %450 = arith.mulf %449, %449 : vector<8x32xf32>
    %cst_198 = arith.constant dense<0.000000e+00> : vector<8xf32>
    %451 = vector.multi_reduction <add>, %450, %cst_198 [1] : vector<8x32xf32> to vector<8xf32>
    %452 = vector.shape_cast %451 : vector<8xf32> to vector<8x1xf32>
    %cst_199 = arith.constant 3.200000e+01 : f32
    %453 = vector.broadcast %cst_199 : f32 to vector<8x1xf32>
    %454 = arith.divf %452, %453 : vector<8x1xf32>
    %455 = vector.broadcast %447 : vector<8x1xf32> to vector<8x32xf32>
    %456 = arith.subf %441, %455 : vector<8x32xf32>
    %cst_200 = arith.constant 9.99999974E-6 : f32
    %457 = vector.broadcast %cst_200 : f32 to vector<8x1xf32>
    %458 = arith.addf %454, %457 : vector<8x1xf32>
    %459 = math.rsqrt %458 : vector<8x1xf32>
    %460 = vector.broadcast %459 : vector<8x1xf32> to vector<8x32xf32>
    %461 = arith.mulf %456, %460 : vector<8x32xf32>
    %462 = vector.broadcast %442 : vector<1x32xf32> to vector<8x32xf32>
    %463 = arith.mulf %461, %462 : vector<8x32xf32>
    %464 = vector.broadcast %443 : vector<1x32xf32> to vector<8x32xf32>
    %465 = arith.addf %463, %464 : vector<8x32xf32>
    %c1_201 = arith.constant 1 : index
    %c0_202 = arith.constant 0 : index
    %c0_203 = arith.constant 0 : index
    %c0_204 = arith.constant 0 : index
    %466 = vector.load %arg17[%c1_201, %c0_202, %c0_203, %c0_204] : memref<2x1x8x32xf32, #tpu.memory_space<vmem>>, vector<1x1x8x32xf32>
    %467 = vector.shape_cast %466 : vector<1x1x8x32xf32> to vector<8x32xf32>
    %468 = vector.shape_cast %465 : vector<8x32xf32> to vector<1x1x8x32xf32>
    tpu.vector_store %arg17[%c1_201, %c0_202, %c0_203, %c0_204], %468 {strides = array<i32>} : memref<2x1x8x32xf32, #tpu.memory_space<vmem>>, vector<1x1x8x32xf32>,
    return
  }
  func.func @transform_0(%arg0: i32, %arg1: memref<2xi32, #tpu.memory_space<smem>>, %arg2: memref<2xi32, #tpu.memory_space<smem>>) -> (i32, i32, i32) {
    %c0_i32 = arith.constant 0 : i32
    %c0_i32_0 = arith.constant 0 : i32
    %c0_i32_1 = arith.constant 0 : i32
    return %arg0, %c0_i32, %c0_i32_0 : i32, i32, i32
  }
  func.func @transform_1(%arg0: i32, %arg1: memref<2xi32, #tpu.memory_space<smem>>, %arg2: memref<2xi32, #tpu.memory_space<smem>>) -> (i32, i32, i32) {
    %c0_i32 = arith.constant 0 : i32
    %c0_i32_0 = arith.constant 0 : i32
    %c0_i32_1 = arith.constant 0 : i32
    return %arg0, %c0_i32, %c0_i32_0 : i32, i32, i32
  }
  func.func @transform_2(%arg0: i32, %arg1: memref<2xi32, #tpu.memory_space<smem>>, %arg2: memref<2xi32, #tpu.memory_space<smem>>) -> (i32, i32, i32) {
    %c0_i32 = arith.constant 0 : i32
    %c0_i32_0 = arith.constant 0 : i32
    %c0_i32_1 = arith.constant 0 : i32
    return %arg0, %c0_i32, %c0_i32_0 : i32, i32, i32
  }
  func.func @transform_3(%arg0: i32, %arg1: memref<2xi32, #tpu.memory_space<smem>>, %arg2: memref<2xi32, #tpu.memory_space<smem>>) -> (i32, i32, i32) {
    %c0_i32 = arith.constant 0 : i32
    %c0_i32_0 = arith.constant 0 : i32
    %c0_i32_1 = arith.constant 0 : i32
    return %arg0, %c0_i32, %c0_i32_0 : i32, i32, i32
  }
  func.func @transform_4(%arg0: i32, %arg1: memref<2xi32, #tpu.memory_space<smem>>, %arg2: memref<2xi32, #tpu.memory_space<smem>>) -> (i32, i32, i32) {
    %c0_i32 = arith.constant 0 : i32
    %c0_i32_0 = arith.constant 0 : i32
    %c0_i32_1 = arith.constant 0 : i32
    return %arg0, %c0_i32, %c0_i32_0 : i32, i32, i32
  }
  func.func @transform_5(%arg0: i32, %arg1: memref<2xi32, #tpu.memory_space<smem>>, %arg2: memref<2xi32, #tpu.memory_space<smem>>) -> (i32, i32, i32) {
    %c0_i32 = arith.constant 0 : i32
    %c0_i32_0 = arith.constant 0 : i32
    %c0_i32_1 = arith.constant 0 : i32
    return %arg0, %c0_i32, %c0_i32_0 : i32, i32, i32
  }
  func.func @transform_6(%arg0: i32, %arg1: memref<2xi32, #tpu.memory_space<smem>>, %arg2: memref<2xi32, #tpu.memory_space<smem>>) -> (i32, i32, i32, i32) {
    %c0_i32 = arith.constant 0 : i32
    %c0_i32_0 = arith.constant 0 : i32
    %c0_i32_1 = arith.constant 0 : i32
    %c0_i32_2 = arith.constant 0 : i32
    %c0_i32_3 = arith.constant 0 : i32
    return %c0_i32, %c0_i32_0, %c0_i32_1, %c0_i32_2 : i32, i32, i32, i32
  }
  func.func @transform_7(%arg0: i32, %arg1: memref<2xi32, #tpu.memory_space<smem>>, %arg2: memref<2xi32, #tpu.memory_space<smem>>) -> (i32, i32, i32) {
    %c0_i32 = arith.constant 0 : i32
    %c0_i32_0 = arith.constant 0 : i32
    %c0_i32_1 = arith.constant 0 : i32
    %c0_i32_2 = arith.constant 0 : i32
    return %c0_i32, %c0_i32_0, %c0_i32_1 : i32, i32, i32
  }
  func.func @transform_8(%arg0: i32, %arg1: memref<2xi32, #tpu.memory_space<smem>>, %arg2: memref<2xi32, #tpu.memory_space<smem>>) -> (i32, i32, i32) {
    %c0_i32 = arith.constant 0 : i32
    %c0_i32_0 = arith.constant 0 : i32
    %c0_i32_1 = arith.constant 0 : i32
    %c0_i32_2 = arith.constant 0 : i32
    return %c0_i32, %c0_i32_0, %c0_i32_1 : i32, i32, i32
  }
  func.func @transform_9(%arg0: i32, %arg1: memref<2xi32, #tpu.memory_space<smem>>, %arg2: memref<2xi32, #tpu.memory_space<smem>>) -> (i32, i32, i32) {
    %c0_i32 = arith.constant 0 : i32
    %c0_i32_0 = arith.constant 0 : i32
    %c0_i32_1 = arith.constant 0 : i32
    %c0_i32_2 = arith.constant 0 : i32
    return %c0_i32, %c0_i32_0, %c0_i32_1 : i32, i32, i32
  }
  func.func @transform_10(%arg0: i32, %arg1: memref<2xi32, #tpu.memory_space<smem>>, %arg2: memref<2xi32, #tpu.memory_space<smem>>) -> (i32, i32, i32) {
    %c0_i32 = arith.constant 0 : i32
    %c0_i32_0 = arith.constant 0 : i32
    %c0_i32_1 = arith.constant 0 : i32
    %c0_i32_2 = arith.constant 0 : i32
    return %c0_i32, %c0_i32_0, %c0_i32_1 : i32, i32, i32
  }
  func.func @transform_11(%arg0: i32, %arg1: memref<2xi32, #tpu.memory_space<smem>>, %arg2: memref<2xi32, #tpu.memory_space<smem>>) -> (i32, i32, i32) {
    %c0_i32 = arith.constant 0 : i32
    %c0_i32_0 = arith.constant 0 : i32
    %c0_i32_1 = arith.constant 0 : i32
    %c0_i32_2 = arith.constant 0 : i32
    return %c0_i32, %c0_i32_0, %c0_i32_1 : i32, i32, i32
  }
  func.func @transform_12(%arg0: i32, %arg1: memref<2xi32, #tpu.memory_space<smem>>, %arg2: memref<2xi32, #tpu.memory_space<smem>>) -> (i32, i32, i32) {
    %c0_i32 = arith.constant 0 : i32
    %c0_i32_0 = arith.constant 0 : i32
    %c0_i32_1 = arith.constant 0 : i32
    %c0_i32_2 = arith.constant 0 : i32
    return %c0_i32, %c0_i32_0, %c0_i32_1 : i32, i32, i32
  }
  func.func @transform_13(%arg0: i32, %arg1: memref<2xi32, #tpu.memory_space<smem>>, %arg2: memref<2xi32, #tpu.memory_space<smem>>) -> (i32, i32) {
    %c0_i32 = arith.constant 0 : i32
    %c0_i32_0 = arith.constant 0 : i32
    %c0_i32_1 = arith.constant 0 : i32
    return %c0_i32, %c0_i32_0 : i32, i32
  }
  func.func @transform_14(%arg0: i32, %arg1: memref<2xi32, #tpu.memory_space<smem>>, %arg2: memref<2xi32, #tpu.memory_space<smem>>) -> (i32, i32, i32, i32) {
    %c0_i32 = arith.constant 0 : i32
    %c0_i32_0 = arith.constant 0 : i32
    %c0_i32_1 = arith.constant 0 : i32
    %c0_i32_2 = arith.constant 0 : i32
    return %c0_i32, %arg0, %c0_i32_0, %c0_i32_1 : i32, i32, i32, i32
  }
}

</mosaic_0001>

<bundles_post_ra>
// kernel: tpu_custom_call.1
= control target key start
LH: loop header
LB: loop body
LE: loop exit
PB: predicated region body
PF: predicated region fallthrough
CT: control target
= control target key end

     0   :  { %s10643_s0 = inlined_call_operand.vmem [shape: s32[2], index: 0, kind: input, shape index: {}]   ;;  %s10644_s2 = inlined_call_operand.vmem [shape: f32[2,8,32], index: 2, kind: input, shape index: {}]   ;;  %s10645_s3 = inlined_call_operand.vmem [shape: f32[2,8,32], index: 3, kind: input, shape index: {}]   ;;  %s10646_s4 = inlined_call_operand.vmem [shape: f32[2,8,32], index: 4, kind: input, shape index: {}]   ;;  %s10647_s5 = inlined_call_operand.vmem [shape: f32[2,8,32], index: 5, kind: input, shape index: {}]   ;;  %s10648_s6 = inlined_call_operand.vmem [shape: f32[2,16,32], index: 6, kind: input, shape index: {}]   ;;  %s10649_s7 = inlined_call_operand.vmem [shape: f32[2,16,32], index: 7, kind: input, shape index: {}]   ;;  %s10650_s8 = inlined_call_operand.hbm [shape: f32[2,8,32,32], index: 8, kind: input, shape index: {}]   ;;  %s10651_s9 = inlined_call_operand.vmem [shape: f32[2,8,32], index: 9, kind: input, shape index: {}]   ;;  %s10652_s10 = inlined_call_operand.vmem [shape: f32[2,32,64], index: 10, kind: input, shape index: {}]   ;;  %s10653_s11 = inlined_call_operand.vmem [shape: f32[2,1,64], index: 11, kind: input, shape index: {}]   ;;  %s10654_s12 = inlined_call_operand.vmem [shape: f32[2,64,32], index: 12, kind: input, shape index: {}]   ;;  %s10655_s13 = inlined_call_operand.vmem [shape: f32[2,1,32], index: 13, kind: input, shape index: {}]   ;;  %s10656_s14 = inlined_call_operand.vmem [shape: f32[2,6,32], index: 14, kind: input, shape index: {}]   ;;  %s10657_s15 = inlined_call_operand.vmem [shape: f32[2,32], index: 15, kind: input, shape index: {}]   ;;  %s10658_s16 = inlined_call_operand.hbm [shape: f32[2,2,8,32], index: 16, kind: output, shape index: {}]   ;;  %s10659_s1 = inlined_call_operand.vmem [shape: s32[2], index: 1, kind: input, shape index: {}]  }
   0x1   :  { %10674 = sst [smem:[#allocation14_spill]] %s10643_s0  ;;  %s25_s26 = sshll.u32 %s10659_s1, 4  ;;  %s26_s26 = int_to_ptr.vmem [resolvable:$true] %s25_s26 }
   0x2   :  { %10675 = sst [smem:[#allocation15_spill]] %s10644_s2 }
   0x3   :  { %10676 = sst [smem:[#allocation16_spill]] %s10645_s3 }
   0x4   :  { %10677 = sst [smem:[#allocation17_spill]] %s10646_s4 }
   0x5   :  { %10678 = sst [smem:[#allocation18_spill]] %s10647_s5 }
   0x6   :  { %10679 = sst [smem:[#allocation19_spill]] %s10648_s6 }
   0x7   :  { %10680 = sst [smem:[#allocation20_spill]] %s10649_s7 }
   0x8   :  { %10681 = sst [smem:[#allocation21_spill]] %s10650_s8 }
   0x9   :  { %10682 = sst [smem:[#allocation22_spill]] %s10653_s11 }
   0xa   :  { %s10683_s23 = sld [smem:[#allocation14_spill]] }
  0x10   :  { %s21_s11 = sshll.u32 %s10683_s23, 4  ;;  %s22_s11 = int_to_ptr.vmem [resolvable:$true] %s21_s11 }
  0x11   :  { %s9117_s27 = scalar_lea.vmem %s22_s11, 16  ;;  %p9122_p1 = scmp.lt.s32.totalorder %s22_s11, %s22_s11 }
  0x12   :  { %p9118_p0 = scmp.ne.s32.totalorder %s22_s11, %s9117_s27  ;;  %p9123_p2 = scmp.lt.s32.totalorder %s9117_s27, %s9117_s27 }
  0x14   :  { %p9124_p3 = por %p9123_p2, %p9122_p1 }
  0x16   :  { %p9125_p4 = pnand %p9124_p3, %p9118_p0 }
  0x18   :  { %9128 = shalt.err (!%p9125_p4)  }
  0x19   :  { %s9235_s28 = smov [#allocation3]   ;;  %s9129_s29 = scalar_lea.vmem %s26_s26, 16 }
  0x1a   :  { %24 = dma.vmem_to_smem %s22_s11, 16, %s9235_s28, [#allocation2] }
  0x1b   :  { %p9130_p5 = scmp.ne.s32.totalorder %s26_s26, %s9129_s29  ;;  %p9134_p6 = scmp.lt.s32.totalorder %s26_s26, %s26_s26 }
  0x1c   :  { %p9135_p7 = scmp.lt.s32.totalorder %s9129_s29, %s9129_s29 }
  0x1e   :  { %p9136_p8 = por %p9135_p7, %p9134_p6 }
  0x20   :  { %p9137_p9 = pnand %p9136_p8, %p9130_p5 }
  0x22   :  { %9140 = shalt.err (!%p9137_p9)  }
  0x23   :  { %s9236_s30 = smov [#allocation4]  }
  0x24   :  { %28 = dma.vmem_to_smem %s26_s26, 16, %s9236_s30, [#allocation2] }
  0x25   :  { %9209 = dma.done.wait [#allocation2], 32 }
  0x26   :  { %9210 = vsyncadd [#allocation2], 4294967264 }
  0x27   :  { %30 = sfence }
  0x28   :  { %31 = vsyncpa [#allocation6], 0 }
  0x29   :  { %32 = vsyncpa [#allocation7], 0 }
  0x2a   :  { %34 = vsyncpa [#allocation7 + $0x1], 0  ;;  %s9344_s1 = smov 0   ;;  %s9346_s0 = smov 0  }
  0x2b   :  { %s9348_s11 = smov 0   ;;  %s9350_s17 = smov 0  }
  0x2c LB: > { %10684 = sst [smem:[#allocation12_spill]] %s9229_s11  ;;  %s9365_s18 = sadd.s32 4294967295, %s9233_s17   ;;  %s9233_s17 = sphi %s9350_s17, %s10708_s17   ;;  %s9229_s11 = sphi %s9348_s11, %s10705_s11   ;;  %s9225_s0 = sphi %s9346_s0, %s10707_s0   ;;  %s9221_s1 = sphi %s9344_s1, %s10706_s1  }
  0x2d   : > { %s8180_s19 = sadd.s32 4294967294, %s9233_s17   ;;  %s9369_s20 = sadd.s32 1, %s9233_s17  }
  0x2e   : > { %s371_s21 = sadd.s32 1, %s9229_s11  ;;  %s368_s22 = ssub.s32 %s9233_s17, %s9369_s20 }
  0x2f   : > { %p381_p10 = scmp.ne.s32.totalorder %s9229_s11, %s9225_s0  ;;  %p369_p11 = scmp.eq.s32.totalorder %s368_s22, 0 }
  0x30   : > { %p382_p12 = scmp.eq.s32.totalorder %s9365_s18, 1  ;;  %p387_p13 = scmp.ne.s32.totalorder %s9225_s0, %s9221_s1 }
  0x31   : > { %p388_p0 = scmp.eq.s32.totalorder %s8180_s19, 1  ;;  %p8181_p3 = scmp.ge.s32.totalorder %s9233_s17, 1 }
  0x32   : > { %s9380_s23 = scalar_select %p369_p11, %s9229_s11, %s371_s21  }
  0x33   : > { %p9382_p1 = por %p382_p12, %p381_p10  ;;  %p9386_p2 = por %p388_p0, %p387_p13 }
  0x34   : > { %10685 = sst [smem:[#allocation13_spill]] %s9380_s23  ;;  %p395_p4 = scmp.lt.s32.totalorder %s9233_s17, 3 }
  0x35   : > { %s10687_s25 = scalar_select %p9386_p2, 1, 0 }
  0x36   : > { %p8976_p5 = scmp.eq.s32.totalorder %s9365_s18, 0  ;;  %p9393_p6 = pnand %p8181_p3, %p395_p4 }
  0x37   : > { %s9237_s27 = smov [#allocation5]  }
  0x38   : > { %s407_s28 = sshll.u32 %s9237_s27, 4  ;;  %p8968_p7 = pneg %p9393_p6  ;;  %s408_s28 = int_to_ptr.vmem [resolvable:$true] %s407_s28 }
  0x39   : > { %s9152_s29 = scalar_lea.vmem %s408_s28, 8192  ;;  %p9160_p13 = scmp.lt.s32.totalorder %s408_s28, %s408_s28 }
  0x3a   : > { %p8969_p8 = pnand %p8976_p5, %p8968_p7  ;;  %p9153_p10 = scmp.ne.s32.totalorder %s408_s28, %s9152_s29 }
  0x3b   : > { %p9161_p0 = scmp.lt.s32.totalorder %s9152_s29, %s9152_s29 }
  0x3c   : > { %p9143_p9 = pneg %p8969_p8 }
  0x3d   : > { %p9162_p2 = por %p9161_p0, %p9160_p13 }
  0x3e   : > { %p9155_p11 = pnand %p9153_p10, %p9143_p9 }
  0x40   : > { %p9156_p12 = pneg %p9155_p11 }
  0x42   : > { %p9163_p3 = pnand %p9162_p2, %p9156_p12 }
  0x44   : > { %9166 = shalt.err (!%p9163_p3)
}
  0x45   : > { %s9238_s30 = smov 128   ;;  %s9239_s19 = smov 8  }
  0x46   : > { %s10689_s8 = sld [smem:[#allocation21_spill]] }
  0x48   : > { %488 = sbr.rel (%p9393_p6) target bundleno = 8634 (0x21ba), region = 76 }
  0x4c   : > { %8971 = dma.hbm_to_vmem [thread:$0]  (!%p8969_p8), %s10689_s8, 8192, %s408_s28, [#allocation6], %s9238_s30, %s9238_s30, %s9239_s19  }
  0x4d   : > { %9212 = dma.done.wait (%p8976_p5), [#allocation6], 8192  }
  0x4e   : > { %9214 = vsyncadd (%p8976_p5), [#allocation6], 4294959104  ;;  %p555_p4 = scmp.lt.s32.totalorder %s9365_s18, 1  ;;  %v9240_v0 = vmov 0.0   ;;  %vm9241_vm0 = vmmov 0   ;;  %s10690_s2 = sld [smem:[#allocation15_spill]]  ;;  %v591_v15 = vlaneseq }
  0x4f   : > { %8534 = vmatprep.subr.mxu1 %v9240_v0  ;;  %8542 = vmatprep.mubr.msk.f32.mxu1 %vm9241_vm0, %v9240_v0  ;;  %s10691_s3 = sld [smem:[#allocation16_spill]]  ;;  %v609_v1 = vld [vmem:[#allocation5 + $0x18] sm:$0xff]  ;;  %v608_v2 = vld [vmem:[#allocation5 + $0x10] sm:$0xff]  ;;  %v607_v5 = vld [vmem:[#allocation5 + $0x8] sm:$0xff]  ;;  %vm629_vm1 = vcmask 261120   ;;  %s10667_s28 = smov 104  }
  0x50   : > { %s9415_s27 = scalar_select %p555_p4, %s9365_s18, 1  ;;  %8556 = vmatprep.subr.mxu0 %v9240_v0  ;;  %8564 = vmatprep.mubr.msk.f32.mxu0 %vm9241_vm0, %v9240_v0  ;;  %v606_v6 = vld [vmem:[#allocation5] sm:$0xff]  ;;  %v614_v8 = vld [vmem:[#allocation5 + $0x38] sm:$0xff]  ;;  %v613_v9 = vld [vmem:[#allocation5 + $0x30] sm:$0xff]  ;;  %v9463_v16 = vshrl.u32 %v591_v15, 7  ;;  %vm1295_vm2 = vcmask 64512  }
  0x51   : > { %8535 = vmatpush3.msra.mxu1 %v609_v1  ;;  %s10692_s4 = sld [smem:[#allocation17_spill]]  ;;  %v612_v12 = vld [vmem:[#allocation5 + $0x28] sm:$0xff]  ;;  %v611_v13 = vld [vmem:[#allocation5 + $0x20] sm:$0xff]  ;;  %v619_v28 = vld [vmem:[#allocation5 + $0x58] sm:$0xff]  ;;  %s10671_s29 = smov 112   ;;  %vm2093_vm4 = vcmask 130048  }
  0x52   : > { %s8187_s26 = sshll.u32 %s9415_s27, 3  ;;  %8536 = vmatprep.subr.mxu1 %v9240_v0  ;;  %s10693_s5 = sld [smem:[#allocation18_spill]]  ;;  %v9466_v17 = vsub.s32 0, %v9463_v16  ;;  %v9471_v18 = vld [vmem:[%s10651_s9] sm:$0xff]  ;;  %v9478_v22 = vsub.s32 1, %v9463_v16  ;;  %8557 = vmatpush3.msra.mxu0 %v619_v28  ;;  %v618_v29 = vld [vmem:[#allocation5 + $0x50] sm:$0xff] }
  0x53   : > { %8537 = vmatpush3.msra.mxu1 %v608_v2  ;;  %8558 = vmatprep.subr.mxu0 %v9240_v0  ;;  %v617_v30 = vld [vmem:[#allocation5 + $0x48] sm:$0xff]  ;;  %v616_v31 = vld [vmem:[#allocation5 + $0x40] sm:$0xff]  ;;  %v9245_v32 = vmov 1983009808   ;;  %v9246_v35 = vmov 1934713408  }
  0x54   : > { %s9424_s30 = scalar_lea.vmem %s10690_s2, %s8187_s26  ;;  %8538 = vmatprep.subr.mxu1 %v9240_v0  ;;  %v628_v19 = vrot.slane %v9471_v18, %v9466_v17  ;;  %v706_v24 = vrot.slane %v9471_v18, %v9478_v22  ;;  %8559 = vmatpush3.msra.mxu0 %v618_v29  ;;  %v870_v33 = vunpack.c.l.s4 %v9245_v32  ;;  %v902_v36 = vunpack.c.l.s4 %v9246_v35  ;;  %s589_s21 = sld [smem:[#allocation3 + %s9365_s18]] }
  0x55   : > { %s9429_s22 = scalar_lea.vmem %s10691_s3, %s8187_s26  ;;  %v581_v3 = vld [vmem:[%s9424_s30] sm:$0xff]  ;;  %8539 = vmatpush3.msra.mxu1 %v607_v5  ;;  %8560 = vmatprep.subr.mxu0 %v9240_v0  ;;  %s10665_s2 = smov 16   ;;  %vm2095_vm5 = vcmask 195584   ;;  %vm4208_vm7 = vcmask 523264  }
  0x56   : > { %v9433_v4 = vld [vmem:[%s9429_s22] sm:$0xff]  ;;  %8540 = vmatprep.subr.mxu1 %v9240_v0  ;;  %8561 = vmatpush3.msra.mxu0 %v617_v30  ;;  %v871_v37 = vunpack.c.0.s8 %v870_v33  ;;  %v903_v40 = vunpack.c.0.s8 %v902_v36  ;;  %s10694_s6 = sld [smem:[#allocation19_spill]] }
  0x57   : > { %v605_v7 = vadd.f32 %v9433_v4, %v581_v3  ;;  %s9442_s19 = scalar_lea.vmem %s10692_s4, %s8187_s26  ;;  %8541 = vmatpush3.msra.mxu1 %v606_v6  ;;  %8562 = vmatprep.subr.mxu0 %v9240_v0  ;;  %s10695_s7 = sld [smem:[#allocation20_spill]] }
  0x58   : > { %s570_s3 = scalar_lea.vmem %s10693_s5, %s8187_s26  ;;  %8545 = vmatprep.subr.mxu1 %v9240_v0  ;;  %v583_v10 = vld [vmem:[%s9442_s19] sm:$0xff]  ;;  %s10669_s26 = smov 120   ;;  %8563 = vmatpush3.msra.mxu0 %v616_v31  ;;  %v9499_v41 = vsub.s32 %v871_v37, %v9463_v16  ;;  %v9502_v48 = vsub.s32 %v903_v40, %v9463_v16 }
  0x59   : > { %8543 = vmatmul.mubr.msk.f32.vlgmr.msra.gmra.mxu1 %vm629_vm1, %v605_v7  ;;  %v584_v11 = vld [vmem:[%s570_s3] sm:$0xff]  ;;  %8577 = vmatprep.subr.mxu0 %v9240_v0  ;;  %s10663_s3 = smov 8  }
  0x5a   : > { %8546 = vmatpush3.msra.mxu1 %v614_v8  ;;  %8553 = vmatprep.mubr.msk.f32.mxu1 %vm9241_vm0, %v9240_v0  ;;  %v9454_v14 = vadd.f32 %v584_v11, %v583_v10 }
  0x5b   : > { %8547 = vmatprep.subr.mxu1 %v9240_v0  ;;  %8565 = vmatmul.mubr.msk.f32.vlgmr.msra.gmra.mxu0 %vm629_vm1, %v583_v10 }
  0x5c   : > { %8548 = vmatpush3.msra.mxu1 %v613_v9  ;;  %8579 = vmatprep.mubr.msk.f32.mxu0 %vm9241_vm0, %v9240_v0 }
  0x5d   : > { %8549 = vmatprep.subr.mxu1 %v9240_v0 }
  0x5e   : > { %8550 = vmatpush3.msra.mxu1 %v612_v12 }
  0x5f   : > { %8551 = vmatprep.subr.mxu1 %v9240_v0 }
  0x60   : > { %8552 = vmatpush3.msra.mxu1 %v611_v13 }
  0x61   : > { %8554 = vmatmul.mubr.msk.f32.vlgmr.msra.gmra.mxu1 %vm629_vm1, %v9454_v14  ;;  %8567 = vmatprep.subr.mxu1 %v9240_v0 }
  0x62   : > { %8569 = vmatprep.mubr.msk.f32.mxu1 %vm9241_vm0, %v9240_v0 }
 0x119   : > { %v699_v20 = vpop.f32.mrf.mxu1 }
 0x11a   : > { %v9475_v21 = vadd.f32 %v699_v20, %v628_v19 }
 0x11b   : > { %v8544_v23 = vpop.f32.mrf.mxu1 }
 0x11c   : > { %858 = vrot.lane.b32.xlu1 %v9475_v21, %s10669_s26 }
 0x121   : > { %v776_v25 = vpop.f32.mrf.mxu1 }
 0x122   : > { %v777_v26 = vadd.f32 %v776_v25, %v706_v24 }
 0x123   : > { %v8555_v27 = vpop.f32.mrf.mxu1 }
 0x124   : > { %1010 = vrot.lane.b32.xlu1 %v777_v26, %s10667_s28  ;;  %1004 = vrot.lane.b32.xlu0 %v777_v26, %s10669_s26 }
 0x128   : > { %864 = vrot.lane.b32.xlu1 %v9475_v21, %s10667_s28  ;;  %1007 = vrot.lane.b32.xlu0 %v777_v26, %s10671_s29 }
 0x12c   : > { %861 = vrot.lane.b32.xlu0 %v9475_v21, %s10671_s29 }
 0x18e   : > { %v859_v34 = vpop.permute.xlu1 %858 }
 0x196   : > { %v1011_v38 = vpop.permute.xlu1 %1010  ;;  %v1005_v39 = vpop.permute.xlu0 %1004 }
 0x197   : > { %v1029_v42 = vcombine.low %v1005_v39, %v1011_v38  ;;  %v1030_v43 = vcombine.high %v1005_v39, %v1011_v38 }
 0x199   : > { %v1037_v49 = vrot.slane %v1029_v42, %v9499_v41  ;;  %v1044_v50 = vrot.slane %v1030_v43, %v9499_v41 }
 0x19a   : > { %v1008_v44 = vpop.permute.xlu0 %1007  ;;  %v865_v45 = vpop.permute.xlu1 %864 }
 0x19b   : > { %v1013_v46 = vcombine.low %v777_v26, %v1008_v44  ;;  %v1014_v47 = vcombine.high %v777_v26, %v1008_v44  ;;  %v883_v53 = vcombine.low %v859_v34, %v865_v45  ;;  %v884_v54 = vcombine.high %v859_v34, %v865_v45 }
 0x19d   : > { %v1021_v51 = vrot.slane %v1013_v46, %v9499_v41  ;;  %v1028_v52 = vrot.slane %v1014_v47, %v9499_v41  ;;  %v891_v3 = vrot.slane %v883_v53, %v9499_v41  ;;  %v898_v5 = vrot.slane %v884_v54, %v9499_v41 }
 0x19e   : > { %v862_v55 = vpop.permute.xlu0 %861 }
 0x19f   : > { %v1045_v56 = vcombine.low %v1021_v51, %v1037_v49  ;;  %v1046_v57 = vcombine.high %v1021_v51, %v1037_v49  ;;  %v1061_v58 = vcombine.low %v1028_v52, %v1044_v50  ;;  %v1062_v59 = vcombine.high %v1028_v52, %v1044_v50 }
 0x1a0   : > { %v867_v60 = vcombine.low %v9475_v21, %v862_v55  ;;  %v868_v61 = vcombine.high %v9475_v21, %v862_v55 }
 0x1a1   : > { %v1053_v62 = vrot.slane %v1045_v56, %v9502_v48  ;;  %v1060_v63 = vrot.slane %v1046_v57, %v9502_v48  ;;  %v1069_v1 = vrot.slane %v1061_v58, %v9502_v48  ;;  %v1076_v2 = vrot.slane %v1062_v59, %v9502_v48 }
 0x1a2   : > { %v875_v6 = vrot.slane %v867_v60, %v9499_v41  ;;  %v882_v7 = vrot.slane %v868_v61, %v9499_v41 }
 0x1a3   : > { %v1081_v8 = vcombine.low %v1053_v62, %v1060_v63  ;;  %v8200_v9 = vcombine.high %v1053_v62, %v1060_v63  ;;  %v1097_v10 = vcombine.low %v1069_v1, %v1076_v2  ;;  %v8201_v11 = vcombine.high %v1069_v1, %v1076_v2  ;;  %v853_v1 = vpop.f32.mrf.mxu0 }
 0x1a4   : > { %v899_v12 = vcombine.low %v875_v6, %v891_v3  ;;  %v900_v13 = vcombine.high %v875_v6, %v891_v3  ;;  %v915_v19 = vcombine.low %v882_v7, %v898_v5  ;;  %v916_v20 = vcombine.high %v882_v7, %v898_v5 }
 0x1a5   : > { %v1088_v21 = vrot.slane %v1081_v8, %v9499_v41  ;;  %v1096_v23 = vrot.slane %v8200_v9, %v9499_v41  ;;  %v1104_v24 = vrot.slane %v1097_v10, %v9499_v41  ;;  %v1112_v25 = vrot.slane %v8201_v11, %v9499_v41  ;;  %v8566_v2 = vpop.f32.mrf.mxu0 }
 0x1a6   : > { %v907_v26 = vrot.slane %v899_v12, %v9502_v48  ;;  %v914_v27 = vrot.slane %v900_v13, %v9502_v48  ;;  %v923_v28 = vrot.slane %v915_v19, %v9502_v48  ;;  %v930_v29 = vrot.slane %v916_v20, %v9502_v48 }
 0x1a7   : > { %v1113_v30 = vcombine.low %v1088_v21, %v1096_v23  ;;  %v1114_v31 = vcombine.high %v1088_v21, %v1096_v23  ;;  %v1129_v32 = vcombine.low %v1104_v24, %v1112_v25  ;;  %v1130_v33 = vcombine.high %v1104_v24, %v1112_v25 }
 0x1a8   : > { %v935_v34 = vcombine.low %v907_v26, %v914_v27  ;;  %v8198_v35 = vcombine.high %v907_v26, %v914_v27  ;;  %v951_v36 = vcombine.low %v923_v28, %v930_v29  ;;  %v8199_v37 = vcombine.high %v923_v28, %v930_v29 }
 0x1a9   : > { %v1121_v38 = vrot.slane %v1113_v30, %v9502_v48  ;;  %v1137_v39 = vrot.slane %v1129_v32, %v9502_v48  ;;  %v1128_v40 = vrot.slane %v1114_v31, %v9502_v48  ;;  %v1144_v42 = vrot.slane %v1130_v33, %v9502_v48 }
 0x1aa   : > { %v942_v43 = vrot.slane %v935_v34, %v9499_v41  ;;  %v950_v44 = vrot.slane %v8198_v35, %v9499_v41  ;;  %v958_v45 = vrot.slane %v951_v36, %v9499_v41  ;;  %v966_v46 = vrot.slane %v8199_v37, %v9499_v41 }
 0x1ab   : > { %v1145_v47 = vcombine.low %v1121_v38, %v1137_v39  ;;  %v1147_v49 = vcombine.low %v1128_v40, %v1144_v42  ;;  %v1146_v60 = vcombine.high %v1121_v38, %v1137_v39  ;;  %v1148_v62 = vcombine.high %v1128_v40, %v1144_v42 }
 0x1ac   : > { %v967_v50 = vcombine.low %v942_v43, %v950_v44  ;;  %v968_v51 = vcombine.high %v942_v43, %v950_v44  ;;  %v983_v52 = vcombine.low %v958_v45, %v966_v46  ;;  %v984_v53 = vcombine.high %v958_v45, %v966_v46 }
 0x1ad   : > { %8568 = vmatpush3.xpose.msk.msra.mxu1 %vm1295_vm2, %v1145_v47  ;;  %8578 = vmatpush3.xpose.msk.msra.mxu0 %vm1295_vm2, %v1147_v49  ;;  %v9560_v3 = vand.u32 127, %v591_v15  ;;  %v593_v5 = vstv %s589_s21  ;;  %v9575_v32 = vsub.s32 2, %v9463_v16  ;;  %s10661_s21 = smov 24  }
 0x1ae   : > { %8572 = vmatprep.subr.mxu1 %v9240_v0  ;;  %v975_v54 = vrot.slane %v967_v50, %v9502_v48  ;;  %v991_v55 = vrot.slane %v983_v52, %v9502_v48  ;;  %v982_v56 = vrot.slane %v968_v51, %v9502_v48  ;;  %v998_v57 = vrot.slane %v984_v53, %v9502_v48 }
 0x1af   : > { %8587 = vmatprep.subr.mxu0 %v9240_v0  ;;  %vm594_vm3 = vcmp.ge.s32.totalorder %v9560_v3, %v593_v5  ;;  %v783_v33 = vrot.slane %v9471_v18, %v9575_v32 }
 0x1b0   : > { %v999_v58 = vcombine.low %v975_v54, %v991_v55  ;;  %v1001_v59 = vcombine.low %v982_v56, %v998_v57  ;;  %v1000_v61 = vcombine.high %v975_v54, %v991_v55  ;;  %v1002_v63 = vcombine.high %v982_v56, %v998_v57 }
 0x1b1   : > { %v9564_v8 = vsel %vm594_vm3, -1e+09, %v9240_v0  ;;  %v854_v34 = vadd.f32 %v853_v1, %v783_v33 }
 0x1b2   : > { %8570 = vmatmul.mubr.msk.f32.vlgmr.msra.gmra.mxu1 %vm1295_vm2, %v999_v58  ;;  %8580 = vmatmul.mubr.msk.f32.vlgmr.msra.gmra.mxu0 %vm1295_vm2, %v1001_v59 }
 0x1b3   : > { %8573 = vmatpush3.xpose.msk.msra.mxu1 %vm1295_vm2, %v1146_v60  ;;  %8574 = vmatprep.mubr.msk.f32.mxu1 %vm9241_vm0, %v9240_v0 }
 0x1b4   : > { %8582 = vmatprep.subr.mxu1 %v9240_v0  ;;  %8589 = vmatprep.mubr.msk.f32.mxu0 %vm9241_vm0, %v9240_v0 }
 0x1b6   : > { %8575 = vmatmul.mubr.msk.f32.vlgmr.msra.gmra.mxu1 %vm1295_vm2, %v1000_v61 }
 0x1b7   : > { %8583 = vmatpush3.xpose.msk.msra.mxu1 %vm1295_vm2, %v1148_v62  ;;  %8584 = vmatprep.mubr.msk.f32.mxu1 %vm9241_vm0, %v9240_v0 }
 0x1b8   : > { %8592 = vmatprep.subr.mxu1 %v9240_v0 }
 0x1ba   : > { %8585 = vmatmul.mubr.msk.f32.vlgmr.msra.gmra.mxu1 %vm1295_vm2, %v1002_v63 }
 0x1bb   : > { %8594 = vmatprep.mubr.msk.f32.mxu1 %vm9241_vm0, %v9240_v0 }
 0x272   : > { %v1368_v6 = vpop.f32.mrf.mxu1  ;;  %v1520_v7 = vpop.f32.mrf.mxu0 }
 0x273   : > { %v1600_v9 = vmul.f32 0.35355338, %v1368_v6  ;;  %v1602_v10 = vmul.f32 0.35355338, %v1520_v7 }
 0x274   : > { %v8571_v11 = vpop.f32.mrf.mxu1  ;;  %v8581_v12 = vpop.f32.mrf.mxu0 }
 0x275   : > { %v1604_v13 = vadd.f32 %v1600_v9, %v9564_v8  ;;  %v1606_v15 = vadd.f32 %v1602_v10, %v9564_v8 }
 0x276   : > { %v1444_v19 = vpop.f32.mrf.mxu1 }
 0x277   : > { %v1601_v20 = vmul.f32 0.35355338, %v1444_v19  ;;  %v1608_v21 = vsel %vm1295_vm2, %v1604_v13, -inf  ;;  %v1614_v27 = vsel %vm1295_vm2, %v1606_v15, -inf }
 0x278   : > { %1609 = vmax.xlane.f32.xlu0 %v1608_v21  ;;  %v8576_v23 = vpop.f32.mrf.mxu1 }
 0x279   : > { %v1605_v24 = vadd.f32 %v1601_v20, %v9564_v8 }
 0x27a   : > { %v1596_v25 = vpop.f32.mrf.mxu1 }
 0x27b   : > { %v1603_v26 = vmul.f32 0.35355338, %v1596_v25  ;;  %v1611_v28 = vsel %vm1295_vm2, %v1605_v24, -inf }
 0x27c   : > { %1615 = vmax.xlane.f32.xlu0 %v1614_v27  ;;  %1612 = vmax.xlane.f32.xlu1 %v1611_v28  ;;  %v8586_v29 = vpop.f32.mrf.mxu1 }
 0x27d   : > { %v1607_v30 = vadd.f32 %v1603_v26, %v9564_v8 }
 0x27f   : > { %v1617_v31 = vsel %vm1295_vm2, %v1607_v30, -inf }
 0x280   : > { %1618 = vmax.xlane.f32.xlu0 %v1617_v31 }
 0x28d   : > { %1150 = vrot.lane.b32.xlu1 %v854_v34, %s10669_s26  ;;  %s10698_s26 = smov 104  }
 0x301   : > { %v1610_v35 = vpop.xlane.xlu0 %1609 }
 0x302   : > { %v1620_v36 = vsub.f32 %v1604_v13, %v1610_v35 }
 0x304   : > { %v1624_v37 = vmul.f32 1.442695, %v1620_v36 }
 0x305   : > { %v1616_v38 = vpop.xlane.xlu0 %1615  ;;  %v1613_v39 = vpop.xlane.xlu1 %1612 }
 0x306   : > { %9028 = vpow2.f32 %v1624_v37  ;;  %v1622_v40 = vsub.f32 %v1606_v15, %v1616_v38  ;;  %v1621_v42 = vsub.f32 %v1605_v24, %v1613_v39 }
 0x308   : > { %v1628_v43 = vmul.f32 1.442695, %v1622_v40  ;;  %v1626_v44 = vmul.f32 1.442695, %v1621_v42 }
 0x309   : > { %v1619_v45 = vpop.xlane.xlu0 %1618  ;;  %v1151_v57 = vpop.permute.xlu1 %1150 }
 0x30a   : > { %9030 = vpow2.f32 %v1628_v43  ;;  %v1623_v46 = vsub.f32 %v1607_v30, %v1619_v45 }
 0x30b   : > { %9032 = vpow2.f32 %v1626_v44 }
 0x30c   : > { %v1630_v47 = vmul.f32 1.442695, %v1623_v46 }
 0x30e   : > { %9034 = vpow2.f32 %v1630_v47 }
 0x313   : > { %v9029_v49 = vpop.eup %9028 }
 0x314   : > { %v1632_v50 = vsel %vm1295_vm2, %v9029_v49, 0.0 }
 0x315   : > { %1633 = vadd.xlane.f32.xlu1 %v1632_v50 }
 0x317   : > { %v9581_v51 = vpop.eup %9030 }
 0x318   : > { %v9033_v52 = vpop.eup %9032  ;;  %v1638_v53 = vsel %vm1295_vm2, %v9581_v51, 0.0 }
 0x319   : > { %1639 = vadd.xlane.f32.xlu1 %v1638_v53  ;;  %v1635_v54 = vsel %vm1295_vm2, %v9033_v52, 0.0 }
 0x31a   : > { %1636 = vadd.xlane.f32.xlu0 %v1635_v54 }
 0x31b   : > { %v9586_v55 = vpop.eup %9034 }
 0x31c   : > { %v1641_v56 = vsel %vm1295_vm2, %v9586_v55, 0.0 }
 0x31e   : > { %1642 = vadd.xlane.f32.xlu0 %v1641_v56 }
 0x32a   : > { %1156 = vrot.lane.b32.xlu1 %v854_v34, %s10667_s28 }
 0x334   : > { %1153 = vrot.lane.b32.xlu0 %v854_v34, %s10671_s29  ;;  %s590_s29 = sld [smem:[#allocation4 + %s9365_s18]] }
 0x39e   : > { %v1634_v58 = vpop.xlane.xlu1 %1633 }
 0x39f   : > { %9036 = vrcp.f32 %v1634_v58 }
 0x3a2   : > { %v1640_v59 = vpop.xlane.xlu1 %1639 }
 0x3a3   : > { %v1637_v60 = vpop.xlane.xlu0 %1636 }
 0x3a4   : > { %9038 = vrcp.f32 %v1637_v60 }
 0x3a5   : > { %9040 = vrcp.f32 %v1640_v59 }
 0x3a6   : > { %v1157_v61 = vpop.permute.xlu1 %1156 }
 0x3a7   : > { %v1643_v62 = vpop.xlane.xlu0 %1642  ;;  %v1175_v63 = vcombine.low %v1151_v57, %v1157_v61  ;;  %v1176_v1 = vcombine.high %v1151_v57, %v1157_v61 }
 0x3a8   : > { %9042 = vrcp.f32 %v1643_v62 }
 0x3a9   : > { %v1183_v7 = vrot.slane %v1175_v63, %v9499_v41  ;;  %v1190_v9 = vrot.slane %v1176_v1, %v9499_v41 }
 0x3ab   : > { %v1154_v2 = vpop.permute.xlu0 %1153 }
 0x3ac   : > { %v1159_v5 = vcombine.low %v854_v34, %v1154_v2  ;;  %v1160_v6 = vcombine.high %v854_v34, %v1154_v2  ;;  %v9037_v38 = vpop.eup %9036 }
 0x3ad   : > { %v1648_v50 = vmul.f32 %v9037_v38, %v9029_v49 }
 0x3ae   : > { %v1167_v10 = vrot.slane %v1159_v5, %v9499_v41  ;;  %v1174_v11 = vrot.slane %v1160_v6, %v9499_v41 }
 0x3b0   : > { %v1191_v12 = vcombine.low %v1167_v10, %v1183_v7  ;;  %v1192_v13 = vcombine.high %v1167_v10, %v1183_v7  ;;  %v1207_v19 = vcombine.low %v1174_v11, %v1190_v9  ;;  %v1208_v20 = vcombine.high %v1174_v11, %v1190_v9 }
 0x3b1   : > { %v9039_v39 = vpop.eup %9038 }
 0x3b2   : > { %v1199_v21 = vrot.slane %v1191_v12, %v9502_v48  ;;  %v1206_v15 = vrot.slane %v1192_v13, %v9502_v48  ;;  %v1215_v23 = vrot.slane %v1207_v19, %v9502_v48  ;;  %v1222_v24 = vrot.slane %v1208_v20, %v9502_v48  ;;  %v9041_v45 = vpop.eup %9040 }
 0x3b3   : > { %v1649_v53 = vmul.f32 %v9039_v39, %v9033_v52  ;;  %v1650_v58 = vmul.f32 %v9041_v45, %v9581_v51  ;;  %v624_v51 = vld [vmem:[#allocation5 + $0x78] sm:$0xff] }
 0x3b4   : > { %v1227_v25 = vcombine.low %v1199_v21, %v1206_v15  ;;  %v8202_v26 = vcombine.high %v1199_v21, %v1206_v15  ;;  %v1243_v27 = vcombine.low %v1215_v23, %v1222_v24  ;;  %v8203_v28 = vcombine.high %v1215_v23, %v1222_v24  ;;  %v623_v15 = vld [vmem:[#allocation5 + $0x70] sm:$0xff]  ;;  %v622_v23 = vld [vmem:[#allocation5 + $0x68] sm:$0xff] }
 0x3b5   : > { %v9043_v54 = vpop.eup %9042 }
 0x3b6   : > { %v1234_v29 = vrot.slane %v1227_v25, %v9499_v41  ;;  %v1242_v30 = vrot.slane %v8202_v26, %v9499_v41  ;;  %v1250_v31 = vrot.slane %v1243_v27, %v9499_v41  ;;  %v1258_v33 = vrot.slane %v8203_v28, %v9499_v41 }
 0x3b7   : > { %v1651_v49 = vmul.f32 %v9043_v54, %v9586_v55 }
 0x3b8   : > { %v1259_v34 = vcombine.low %v1234_v29, %v1242_v30  ;;  %v1275_v35 = vcombine.low %v1250_v31, %v1258_v33  ;;  %v1260_v36 = vcombine.high %v1234_v29, %v1242_v30  ;;  %v1276_v37 = vcombine.high %v1250_v31, %v1258_v33  ;;  %v621_v33 = vld [vmem:[#allocation5 + $0x60] sm:$0xff] }
 0x3ba   : > { %v1267_v40 = vrot.slane %v1259_v34, %v9502_v48  ;;  %v1283_v42 = vrot.slane %v1275_v35, %v9502_v48  ;;  %v1274_v43 = vrot.slane %v1260_v36, %v9502_v48  ;;  %v1290_v44 = vrot.slane %v1276_v37, %v9502_v48 }
 0x3bc   : > { %v1291_v46 = vcombine.low %v1267_v40, %v1283_v42  ;;  %v1292_v47 = vcombine.high %v1267_v40, %v1283_v42  ;;  %v1293_v56 = vcombine.low %v1274_v43, %v1290_v44  ;;  %v1294_v57 = vcombine.high %v1274_v43, %v1290_v44 }
 0x3be   : > { %8588 = vmatpush3.msra.mxu0 %v1291_v46  ;;  %8593 = vmatpush3.msra.mxu1 %v1292_v47 }
 0x3bf   : > { %8590 = vmatmul.mubr.msk.f32.vlgmr.msra.gmra.mxu0 %vm1295_vm2, %v1648_v50  ;;  %8595 = vmatmul.mubr.msk.f32.vlgmr.msra.gmra.mxu1 %vm1295_vm2, %v1649_v53 }
 0x3c0   : > { %8597 = vmatprep.subr.mxu0 %v9240_v0  ;;  %8602 = vmatprep.subr.mxu1 %v9240_v0 }
 0x3c1   : > { %8598 = vmatpush3.msra.mxu0 %v1293_v56  ;;  %8603 = vmatpush3.msra.mxu1 %v1294_v57 }
 0x3c2   : > { %8599 = vmatprep.mubr.msk.f32.mxu0 %vm9241_vm0, %v9240_v0  ;;  %8604 = vmatprep.mubr.msk.f32.mxu1 %vm9241_vm0, %v9240_v0 }
 0x3c3   : > { %8600 = vmatmul.mubr.msk.f32.vlgmr.msra.gmra.mxu0 %vm1295_vm2, %v1650_v58  ;;  %8605 = vmatmul.mubr.msk.f32.vlgmr.msra.gmra.mxu1 %vm1295_vm2, %v1651_v49 }
 0x3c4   : > { %8607 = vmatprep.subr.mxu0 %v9240_v0  ;;  %8615 = vmatprep.mubr.msk.f32.mxu0 %vm9241_vm0, %v9240_v0 }
 0x3c5   : > { %8618 = vmatprep.subr.mxu1 %v9240_v0  ;;  %8626 = vmatprep.mubr.msk.f32.mxu1 %vm9241_vm0, %v9240_v0 }
 0x3c6   : > { %8608 = vmatpush3.msra.mxu0 %v624_v51 }
 0x3c7   : > { %8609 = vmatprep.subr.mxu0 %v9240_v0 }
 0x3c8   : > { %8610 = vmatpush3.msra.mxu0 %v623_v15 }
 0x3c9   : > { %8611 = vmatprep.subr.mxu0 %v9240_v0 }
 0x3ca   : > { %8612 = vmatpush3.msra.mxu0 %v622_v23 }
 0x3cb   : > { %8613 = vmatprep.subr.mxu0 %v9240_v0 }
 0x3cc   : > { %8614 = vmatpush3.msra.mxu0 %v621_v33 }
 0x47f   : > { %v1721_v52 = vpop.f32.mrf.mxu0  ;;  %v1794_v55 = vpop.f32.mrf.mxu1 }
 0x481   : > { %v8591_v59 = vpop.f32.mrf.mxu0  ;;  %v8596_v60 = vpop.f32.mrf.mxu1 }
 0x483   : > { %v1867_v61 = vpop.f32.mrf.mxu0  ;;  %v1940_v62 = vpop.f32.mrf.mxu1 }
 0x484   : > { %v1944_v63 = vcombine.low %v1721_v52, %v1867_v61  ;;  %v1945_v1 = vcombine.high %v1721_v52, %v1867_v61  ;;  %v1960_v2 = vcombine.low %v1794_v55, %v1940_v62  ;;  %v1961_v5 = vcombine.high %v1794_v55, %v1940_v62 }
 0x485   : > { %v8601_v6 = vpop.f32.mrf.mxu0  ;;  %v8606_v7 = vpop.f32.mrf.mxu1  ;;  %v9653_v55 = vsub.s32 3, %v9463_v16 }
 0x486   : > { %v1952_v9 = vrot.slane %v1944_v63, %v9499_v41  ;;  %v1959_v10 = vrot.slane %v1945_v1, %v9499_v41  ;;  %v1968_v11 = vrot.slane %v1960_v2, %v9499_v41  ;;  %v1975_v12 = vrot.slane %v1961_v5, %v9499_v41  ;;  %v2208_v1 = vld [vmem:[#allocation5 + $0xb8] sm:$0xff]  ;;  %v2207_v2 = vld [vmem:[#allocation5 + $0xb0] sm:$0xff]  ;;  %v2206_v5 = vld [vmem:[#allocation5 + $0xa8] sm:$0xff] }
 0x487   : > { %v2100_v59 = vrot.slane %v9471_v18, %v9653_v55  ;;  %8629 = vmatprep.subr.mxu0 %v2208_v1 }
 0x488   : > { %v1976_v13 = vcombine.low %v1952_v9, %v1968_v11  ;;  %v1977_v19 = vcombine.high %v1952_v9, %v1968_v11  ;;  %v1992_v20 = vcombine.low %v1959_v10, %v1975_v12  ;;  %v1993_v21 = vcombine.high %v1959_v10, %v1975_v12  ;;  %v2205_v12 = vld [vmem:[#allocation5 + $0xa0] sm:$0xff] }
 0x48a   : > { %v1984_v24 = vrot.slane %v1976_v13, %v9502_v48  ;;  %v1991_v25 = vrot.slane %v1977_v19, %v9502_v48  ;;  %v2000_v26 = vrot.slane %v1992_v20, %v9502_v48  ;;  %v2007_v27 = vrot.slane %v1993_v21, %v9502_v48 }
 0x48c   : > { %v2012_v28 = vcombine.low %v1984_v24, %v1991_v25  ;;  %v8216_v29 = vcombine.high %v1984_v24, %v1991_v25  ;;  %v2028_v30 = vcombine.low %v2000_v26, %v2007_v27  ;;  %v8217_v31 = vcombine.high %v2000_v26, %v2007_v27  ;;  %v2203_v24 = vld [vmem:[#allocation5 + $0x98] sm:$0xff]  ;;  %v2202_v25 = vld [vmem:[#allocation5 + $0x90] sm:$0xff]  ;;  %v2201_v26 = vld [vmem:[#allocation5 + $0x88] sm:$0xff] }
 0x48d   : > { %8619 = vmatpush3.msra.mxu1 %v2203_v24  ;;  %v2200_v27 = vld [vmem:[#allocation5 + $0x80] sm:$0xff] }
 0x48e   : > { %v2019_v34 = vrot.slane %v2012_v28, %v9499_v41  ;;  %v2027_v35 = vrot.slane %v8216_v29, %v9499_v41  ;;  %v2035_v36 = vrot.slane %v2028_v30, %v9499_v41  ;;  %v2043_v37 = vrot.slane %v8217_v31, %v9499_v41  ;;  %8620 = vmatprep.subr.mxu1 %v9240_v0 }
 0x48f   : > { %8621 = vmatpush3.msra.mxu1 %v2202_v25  ;;  %v9691_v28 = vsub.s32 5, %v9463_v16 }
 0x490   : > { %v2045_v38 = vcombine.high %v2019_v34, %v2027_v35  ;;  %v2061_v39 = vcombine.high %v2035_v36, %v2043_v37  ;;  %v2044_v40 = vcombine.low %v2019_v34, %v2027_v35  ;;  %v2060_v42 = vcombine.low %v2035_v36, %v2043_v37  ;;  %8622 = vmatprep.subr.mxu1 %v9240_v0  ;;  %v2213_v35 = vld [vmem:[#allocation5 + $0xd8] sm:$0xff] }
 0x491   : > { %8623 = vmatpush3.msra.mxu1 %v2201_v26  ;;  %v2299_v29 = vrot.slane %v9471_v18, %v9691_v28 }
 0x492   : > { %v2059_v43 = vrot.slane %v2045_v38, %v9502_v48  ;;  %v2075_v44 = vrot.slane %v2061_v39, %v9502_v48  ;;  %v2052_v45 = vrot.slane %v2044_v40, %v9502_v48  ;;  %v2068_v46 = vrot.slane %v2060_v42, %v9502_v48  ;;  %8624 = vmatprep.subr.mxu1 %v9240_v0  ;;  %v9704_v38 = vld [vmem:[%s10656_s14] sm:$0x3f] }
 0x493   : > { %8625 = vmatpush3.msra.mxu1 %v2200_v27  ;;  %v2191_v39 = vrot.slane %v9704_v38, %v9466_v17 }
 0x494   : > { %v2078_v47 = vcombine.low %v2059_v43, %v2075_v44  ;;  %v2077_v50 = vcombine.high %v2052_v45, %v2068_v46  ;;  %v2076_v53 = vcombine.low %v2052_v45, %v2068_v46  ;;  %v2079_v54 = vcombine.high %v2059_v43, %v2075_v44  ;;  %8640 = vmatprep.subr.mxu1 %v2213_v35 }
 0x495   : > { %v2196_v43 = vrot.slane %v9704_v38, %v9478_v22 }
 0x496   : > { %2085 = vrot.lane.b32.xlu0 %v2078_v47, %s10665_s2  ;;  %2081 = vrot.lane.b32.xlu1 %v2077_v50, %s10663_s3  ;;  %v2212_v47 = vld [vmem:[#allocation5 + $0xd0] sm:$0xff]  ;;  %s10699_s2 = smov 16   ;;  %s10700_s3 = smov 8  }
 0x49a   : > { %2089 = vrot.lane.b32.xlu1 %v2079_v54, %s10661_s21  ;;  %s8340_s21 = sshll.u32 %s9415_s27, 4  ;;  %s10697_s27 = smov 120  }
 0x49b   : > { %s9662_s28 = scalar_lea.vmem %s10694_s6, %s8340_s21  ;;  %s580_s4 = scalar_lea.vmem %s10695_s7, %s8340_s21 }
 0x49c   : > { %v9668_v6 = vld [vmem:[%s9662_s28] sm:$0xff]  ;;  %v9671_v7 = vld [vmem:[%s9662_s28 + $0x8] sm:$0xff]  ;;  %s10701_s21 = smov 24   ;;  %s10702_s6 = sld [smem:[#allocation22_spill]] }
 0x49d   : > { %v587_v9 = vld [vmem:[%s580_s4] sm:$0xff]  ;;  %v588_v10 = vld [vmem:[%s580_s4 + $0x8] sm:$0xff]  ;;  %s10696_s4 = smov 112  }
 0x49e   : > { %v9674_v11 = vadd.f32 %v587_v9, %v9668_v6  ;;  %v9677_v13 = vadd.f32 %v588_v10, %v9671_v7 }
 0x508   : > { %v2082_v56 = vpop.permute.xlu1 %2081  ;;  %v2086_v57 = vpop.permute.xlu0 %2085 }
 0x509   : > { %v2092_v58 = vsel %vm1295_vm2, %v2076_v53, %v2082_v56 }
 0x50a   : > { %v2094_v51 = vsel %vm2093_vm4, %v2092_v58, %v2086_v57 }
 0x50c   : > { %v2090_v49 = vpop.permute.xlu1 %2089 }
 0x50d   : > { %v2096_v52 = vsel %vm2095_vm5, %v2094_v51, %v2090_v49 }
 0x50e   : > { %8616 = vmatmul.mubr.msk.f32.vlgmr.msra.gmra.mxu0 %vm629_vm1, %v2096_v52 }
 0x50f   : > { %8630 = vmatpush3.msra.mxu0 %v2208_v1  ;;  %8637 = vmatprep.mubr.msk.f32.mxu0 %vm629_vm1, %v9674_v11 }
 0x510   : > { %8631 = vmatprep.subr.mxu0 %v2207_v2 }
 0x511   : > { %8632 = vmatpush3.msra.mxu0 %v2207_v2 }
 0x512   : > { %8633 = vmatprep.subr.mxu0 %v2206_v5 }
 0x513   : > { %8634 = vmatpush3.msra.mxu0 %v2206_v5 }
 0x514   : > { %8635 = vmatprep.subr.mxu0 %v2205_v12 }
 0x515   : > { %8636 = vmatpush3.msra.mxu0 %v2205_v12 }
 0x516   : > { %8638 = vmatmul.mubr.msk.f32.vlgmr.msra.gmra.mxu0 %vm629_vm1, %v9677_v13  ;;  %8651 = vmatprep.subr.mxu0 %v9240_v0 }
 0x517   : > { %8655 = vmatprep.mubr.msk.f32.mxu0 %vm9241_vm0, %v9240_v0 }
 0x5ce   : > { %v2170_v60 = vpop.f32.mrf.mxu0 }
 0x5cf   : > { %v2171_v61 = vadd.f32 %v2170_v60, %v2100_v59 }
 0x5d0   : > { %v8617_v62 = vpop.f32.mrf.mxu0 }
 0x5d1   : > { %v2174_v63 = vsel %vm629_vm1, %v2171_v61, 0.0 }
 0x5d2   : > { %2175 = vadd.xlane.f32.xlu0 %v2174_v63 }
 0x5d6   : > { %v8639_v30 = vpop.f32.mrf.mxu0 }
 0x5d7   : > { %v2378_v31 = vadd.f32 %v8639_v30, %v2299_v29 }
 0x5d8   : > { %v2372_v33 = vpop.f32.mrf.mxu0 }
 0x5d9   : > { %v2373_v34 = vadd.f32 %v2372_v33, %v2299_v29 }
 0x5e8   : > { %2616 = vrot.lane.b32.xlu0 %v2378_v31, %s10697_s27 }
 0x5ec   : > { %2628 = vrot.lane.b32.xlu0 %v2378_v31, %s10698_s26 }
 0x5f0   : > { %2620 = vrot.lane.b32.xlu0 %v2373_v34, %s10696_s4 }
 0x65b   : > { %v2176_v19 = vpop.xlane.xlu0 %2175 }
 0x65c   : > { %v2178_v20 = vmul.f32 0.03125, %v2176_v19 }
 0x65e   : > { %v2179_v21 = vsub.f32 %v2171_v61, %v2178_v20 }
 0x65f   : > { %v2617_v53 = vpop.permute.xlu0 %2616 }
 0x660   : > { %v2180_v15 = vmul.f32 %v2179_v21, %v2179_v21 }
 0x662   : > { %v2181_v23 = vsel %vm629_vm1, %v2180_v15, 0.0 }
 0x663   : > { %2182 = vadd.xlane.f32.xlu1 %v2181_v23  ;;  %v2629_v57 = vpop.permute.xlu0 %2628 }
 0x664   : > { %v2717_v52 = vcombine.high %v2617_v53, %v2629_v57 }
 0x666   : > { %v2731_v60 = vrot.slane %v2717_v52, %v9499_v41 }
 0x667   : > { %v2621_v61 = vpop.permute.xlu0 %2620 }
 0x668   : > { %v2633_v9 = vcombine.high %v2373_v34, %v2621_v61 }
 0x66a   : > { %v2647_v24 = vrot.slane %v2633_v9, %v9499_v41 }
 0x674   : > { %2622 = vrot.lane.b32.xlu1 %v2378_v31, %s10696_s4 }
 0x678   : > { %2614 = vrot.lane.b32.xlu1 %v2373_v34, %s10697_s27 }
 0x67c   : > { %2626 = vrot.lane.b32.xlu1 %v2373_v34, %s10698_s26 }
 0x6ec   : > { %v2183_v36 = vpop.xlane.xlu1 %2182 }
 0x6ed   : > { %v2184_v18 = vmul.f32 0.03125, %v2183_v36 }
 0x6ef   : > { %v2185_v37 = vadd.f32 1e-05, %v2184_v18 }
 0x6f0   : > { %v2623_v50 = vpop.permute.xlu1 %2622 }
 0x6f1   : > { %9044 = vrsqrt.f32 %v2185_v37  ;;  %v2700_v54 = vcombine.low %v2378_v31, %v2623_v50  ;;  %v2701_v56 = vcombine.high %v2378_v31, %v2623_v50 }
 0x6f3   : > { %v2708_v49 = vrot.slane %v2700_v54, %v9499_v41  ;;  %v2715_v51 = vrot.slane %v2701_v56, %v9499_v41 }
 0x6f4   : > { %v2615_v58 = vpop.permute.xlu1 %2614 }
 0x6f5   : > { %v2748_v2 = vcombine.low %v2715_v51, %v2731_v60  ;;  %v2749_v5 = vcombine.high %v2715_v51, %v2731_v60 }
 0x6f7   : > { %v2763_v15 = vrot.slane %v2749_v5, %v9502_v48 }
 0x6f8   : > { %v2627_v62 = vpop.permute.xlu1 %2626 }
 0x6f9   : > { %v2648_v10 = vcombine.low %v2615_v58, %v2627_v62  ;;  %v2649_v12 = vcombine.high %v2615_v58, %v2627_v62 }
 0x6fb   : > { %v2656_v25 = vrot.slane %v2648_v10, %v9499_v41  ;;  %v2663_v26 = vrot.slane %v2649_v12, %v9499_v41 }
 0x6fd   : > { %v2681_v36 = vcombine.high %v2647_v24, %v2663_v26 }
 0x6fe   : > { %v9045_v40 = vpop.eup %9044 }
 0x6ff   : > { %v2187_v42 = vmul.f32 %v9045_v40, %v2179_v21  ;;  %v2756_v21 = vrot.slane %v2748_v2, %v9502_v48 }
 0x701   : > { %v2192_v44 = vmul.f32 %v2191_v39, %v2187_v42  ;;  %v2852_v30 = vcombine.low %v2756_v21, %v2763_v15  ;;  %v8229_v31 = vcombine.high %v2756_v21, %v2763_v15 }
 0x703   : > { %v2197_v45 = vadd.f32 %v2196_v43, %v2192_v44  ;;  %v2859_v39 = vrot.slane %v2852_v30, %v9499_v41  ;;  %v2867_v40 = vrot.slane %v8229_v31, %v9499_v41  ;;  %v9777_v30 = vld [vmem:[%s10651_s9] sm:$0xff] }
 0x705   : > { %v2198_v46 = vadd.f32 %v2197_v45, %v9433_v4  ;;  %v2716_v4 = vcombine.low %v2617_v53, %v2629_v57  ;;  %v2695_v45 = vrot.slane %v2681_v36, %v9502_v48  ;;  %v2884_v60 = vcombine.low %v2859_v39, %v2867_v40 }
 0x707   : > { %8627 = vmatmul.mubr.msk.f32.vlgmr.msra.gmra.mxu1 %vm629_vm1, %v2198_v46  ;;  %v2724_v59 = vrot.slane %v2716_v4, %v9499_v41  ;;  %v2892_v5 = vrot.slane %v2884_v60, %v9502_v48 }
 0x708   : > { %8641 = vmatpush3.msra.mxu1 %v2213_v35  ;;  %8648 = vmatprep.mubr.msk.f32.mxu1 %vm629_vm1, %v9668_v6  ;;  %v2632_v6 = vcombine.low %v2373_v34, %v2621_v61  ;;  %v2680_v35 = vcombine.low %v2647_v24, %v2663_v26  ;;  %v2211_v61 = vld [vmem:[#allocation5 + $0xc8] sm:$0xff] }
 0x709   : > { %8642 = vmatprep.subr.mxu1 %v2212_v47  ;;  %v2732_v63 = vcombine.low %v2708_v49, %v2724_v59  ;;  %v2733_v1 = vcombine.high %v2708_v49, %v2724_v59 }
 0x70a   : > { %8643 = vmatpush3.msra.mxu1 %v2212_v47  ;;  %v2640_v23 = vrot.slane %v2632_v6, %v9499_v41  ;;  %v2688_v44 = vrot.slane %v2680_v35, %v9502_v48  ;;  %v2885_v47 = vcombine.high %v2859_v39, %v2867_v40 }
 0x70b   : > { %v2740_v19 = vrot.slane %v2732_v63, %v9502_v48  ;;  %v2747_v20 = vrot.slane %v2733_v1, %v9502_v48  ;;  %8644 = vmatprep.subr.mxu1 %v2211_v61  ;;  %v2210_v1 = vld [vmem:[#allocation5 + $0xc0] sm:$0xff] }
 0x70c   : > { %v2664_v33 = vcombine.low %v2640_v23, %v2656_v25  ;;  %v2665_v34 = vcombine.high %v2640_v23, %v2656_v25  ;;  %v2784_v54 = vcombine.low %v2688_v44, %v2695_v45  ;;  %v8227_v56 = vcombine.high %v2688_v44, %v2695_v45  ;;  %8645 = vmatpush3.msra.mxu1 %v2211_v61 }
 0x70d   : > { %v2836_v27 = vcombine.low %v2740_v19, %v2747_v20  ;;  %v8228_v29 = vcombine.high %v2740_v19, %v2747_v20  ;;  %8646 = vmatprep.subr.mxu1 %v2210_v1  ;;  %v2899_v20 = vrot.slane %v2885_v47, %v9502_v48 }
 0x70e   : > { %v2672_v42 = vrot.slane %v2664_v33, %v9502_v48  ;;  %v2679_v43 = vrot.slane %v2665_v34, %v9502_v48  ;;  %v2791_v49 = vrot.slane %v2784_v54, %v9499_v41  ;;  %v2799_v51 = vrot.slane %v8227_v56, %v9499_v41  ;;  %8647 = vmatpush3.msra.mxu1 %v2210_v1 }
 0x70f   : > { %v2843_v18 = vrot.slane %v2836_v27, %v9499_v41  ;;  %v2851_v37 = vrot.slane %v8228_v29, %v9499_v41  ;;  %8658 = vmatprep.subr.mxu1 %v9240_v0  ;;  %8649 = vmatmul.mubr.msk.f32.vlgmr.msra.gmra.mxu1 %vm629_vm1, %v9671_v7  ;;  %v9772_v29 = vsub.s32 4, %v9463_v16 }
 0x710   : > { %v2768_v50 = vcombine.low %v2672_v42, %v2679_v43  ;;  %v8226_v53 = vcombine.high %v2672_v42, %v2679_v43  ;;  %v2817_v52 = vcombine.high %v2791_v49, %v2799_v51  ;;  %v2816_v63 = vcombine.low %v2791_v49, %v2799_v51  ;;  %8662 = vmatprep.mubr.msk.f32.mxu1 %vm9241_vm0, %v9240_v0 }
 0x711   : > { %v2869_v46 = vcombine.high %v2843_v18, %v2851_v37  ;;  %v2868_v59 = vcombine.low %v2843_v18, %v2851_v37  ;;  %v2222_v31 = vrot.slane %v9777_v30, %v9772_v29 }
 0x712   : > { %v2775_v57 = vrot.slane %v2768_v50, %v9499_v41  ;;  %v2783_v58 = vrot.slane %v8226_v53, %v9499_v41  ;;  %v2824_v12 = vrot.slane %v2816_v63, %v9502_v48  ;;  %v9757_v7 = vrot.slane %v2817_v52, %v9502_v48 }
 0x713   : > { %v2876_v2 = vrot.slane %v2868_v59, %v9502_v48  ;;  %v9748_v19 = vrot.slane %v2869_v46, %v9502_v48 }
 0x714   : > { %v2801_v4 = vcombine.high %v2775_v57, %v2783_v58  ;;  %v2800_v62 = vcombine.low %v2775_v57, %v2783_v58 }
 0x715   : > { %v2900_v6 = vcombine.low %v2876_v2, %v2892_v5  ;;  %v2901_v9 = vcombine.high %v2876_v2, %v2892_v5  ;;  %v2902_v24 = vcombine.low %v9748_v19, %v2899_v20  ;;  %v2903_v25 = vcombine.high %v9748_v19, %v2899_v20 }
 0x716   : > { %v2808_v10 = vrot.slane %v2800_v62, %v9502_v48  ;;  %v9754_v21 = vrot.slane %v2801_v4, %v9502_v48 }
 0x717   : > { %8652 = vmatpush3.xpose.msk.msra.mxu0 %vm1295_vm2, %v2900_v6  ;;  %8659 = vmatpush3.xpose.msk.msra.mxu1 %vm1295_vm2, %v2901_v9 }
 0x718   : > { %8653 = vmatprep.subr.mxu0 %v9240_v0  ;;  %8660 = vmatprep.subr.mxu1 %v9240_v0  ;;  %v2832_v15 = vcombine.low %v2808_v10, %v2824_v12  ;;  %v2833_v23 = vcombine.high %v2808_v10, %v2824_v12  ;;  %v2834_v26 = vcombine.low %v9754_v21, %v9757_v7 }
 0x719   : > { %v2835_v27 = vcombine.high %v9754_v21, %v9757_v7 }
 0x71b   : > { %8654 = vmatpush3.xpose.msk.msra.mxu0 %vm1295_vm2, %v2832_v15  ;;  %8661 = vmatpush3.xpose.msk.msra.mxu1 %vm1295_vm2, %v2833_v23 }
 0x71c   : > { %8665 = vmatprep.subr.mxu0 %v9240_v0  ;;  %8672 = vmatprep.subr.mxu1 %v9240_v0 }
 0x7c7   : > { %v2292_v33 = vpop.f32.mrf.mxu1 }
 0x7c8   : > { %v2293_v34 = vadd.f32 %v2292_v33, %v2222_v31 }
 0x7c9   : > { %v8628_v35 = vpop.f32.mrf.mxu1 }
 0x7ca   : > { %2470 = vrot.lane.b32.xlu1 %v2293_v34, %s10696_s4  ;;  %2467 = vrot.lane.b32.xlu0 %v2293_v34, %s10697_s27 }
 0x7ce   : > { %2473 = vrot.lane.b32.xlu0 %v2293_v34, %s10698_s26 }
 0x83c   : > { %v2471_v36 = vpop.permute.xlu1 %2470  ;;  %v2468_v18 = vpop.permute.xlu0 %2467 }
 0x83d   : > { %v2476_v37 = vcombine.low %v2293_v34, %v2471_v36  ;;  %v2477_v39 = vcombine.high %v2293_v34, %v2471_v36 }
 0x83f   : > { %v2484_v44 = vrot.slane %v2476_v37, %v9499_v41  ;;  %v2491_v45 = vrot.slane %v2477_v39, %v9499_v41 }
 0x840   : > { %v2474_v40 = vpop.permute.xlu0 %2473 }
 0x841   : > { %v2492_v42 = vcombine.low %v2468_v18, %v2474_v40  ;;  %v2493_v43 = vcombine.high %v2468_v18, %v2474_v40 }
 0x843   : > { %v2500_v46 = vrot.slane %v2492_v42, %v9499_v41  ;;  %v2507_v47 = vrot.slane %v2493_v43, %v9499_v41 }
 0x845   : > { %v2508_v50 = vcombine.low %v2484_v44, %v2500_v46  ;;  %v2509_v53 = vcombine.high %v2484_v44, %v2500_v46  ;;  %v2524_v54 = vcombine.low %v2491_v45, %v2507_v47  ;;  %v2525_v56 = vcombine.high %v2491_v45, %v2507_v47 }
 0x847   : > { %v2516_v57 = vrot.slane %v2508_v50, %v9502_v48  ;;  %v2523_v58 = vrot.slane %v2509_v53, %v9502_v48  ;;  %v2532_v49 = vrot.slane %v2524_v54, %v9502_v48  ;;  %v2539_v51 = vrot.slane %v2525_v56, %v9502_v48 }
 0x849   : > { %v2544_v4 = vcombine.low %v2516_v57, %v2523_v58  ;;  %v8224_v52 = vcombine.high %v2516_v57, %v2523_v58  ;;  %v2560_v59 = vcombine.low %v2532_v49, %v2539_v51  ;;  %v8225_v60 = vcombine.high %v2532_v49, %v2539_v51 }
 0x84a   : > { %v2383_v57 = vsub.s32 6, %v9463_v16 }
 0x84b   : > { %v2551_v61 = vrot.slane %v2544_v4, %v9499_v41  ;;  %v2559_v62 = vrot.slane %v8224_v52, %v9499_v41  ;;  %v2567_v63 = vrot.slane %v2560_v59, %v9499_v41  ;;  %v2575_v1 = vrot.slane %v8225_v60, %v9499_v41 }
 0x84c   : > { %v2384_v58 = vrot.slane %v9777_v30, %v2383_v57 }
 0x84d   : > { %v2576_v2 = vcombine.low %v2551_v61, %v2559_v62  ;;  %v2592_v5 = vcombine.low %v2567_v63, %v2575_v1  ;;  %v2577_v10 = vcombine.high %v2551_v61, %v2559_v62  ;;  %v2593_v12 = vcombine.high %v2567_v63, %v2575_v1 }
 0x84f   : > { %v2584_v6 = vrot.slane %v2576_v2, %v9502_v48  ;;  %v2600_v9 = vrot.slane %v2592_v5, %v9502_v48  ;;  %v2591_v21 = vrot.slane %v2577_v10, %v9502_v48  ;;  %v2607_v7 = vrot.slane %v2593_v12, %v9502_v48 }
 0x851   : > { %v2608_v19 = vcombine.low %v2584_v6, %v2600_v9  ;;  %v2609_v20 = vcombine.high %v2584_v6, %v2600_v9  ;;  %v2610_v15 = vcombine.low %v2591_v21, %v2607_v7  ;;  %v2611_v23 = vcombine.high %v2591_v21, %v2607_v7 }
 0x853   : > { %8656 = vmatmul.mubr.msk.f32.vlgmr.msra.gmra.mxu0 %vm1295_vm2, %v2608_v19  ;;  %8663 = vmatmul.mubr.msk.f32.vlgmr.msra.gmra.mxu1 %vm1295_vm2, %v2609_v20 }
 0x854   : > { %8666 = vmatpush3.xpose.msk.msra.mxu0 %vm1295_vm2, %v2902_v24  ;;  %8673 = vmatpush3.xpose.msk.msra.mxu1 %vm1295_vm2, %v2903_v25  ;;  %v8650_v24 = vpop.f32.mrf.mxu1  ;;  %v596_v25 = vstv %s590_s29 }
 0x855   : > { %8667 = vmatprep.subr.mxu0 %v9240_v0  ;;  %8674 = vmatprep.subr.mxu1 %v9240_v0  ;;  %vm597_vm6 = vcmp.ge.s32.totalorder %v9560_v3, %v596_v25  ;;  %v2463_v49 = vadd.f32 %v8650_v24, %v2384_v58 }
 0x856   : > { %8669 = vmatprep.mubr.msk.f32.mxu0 %vm9241_vm0, %v9240_v0  ;;  %8676 = vmatprep.mubr.msk.f32.mxu1 %vm9241_vm0, %v9240_v0  ;;  %v9823_v33 = vsel %vm597_vm6, -1e+09, %v9240_v0 }
 0x858   : > { %8668 = vmatpush3.xpose.msk.msra.mxu0 %vm1295_vm2, %v2834_v26  ;;  %8675 = vmatpush3.xpose.msk.msra.mxu1 %vm1295_vm2, %v2835_v27  ;;  %v2457_v26 = vpop.f32.mrf.mxu1 }
 0x859   : > { %8679 = vmatprep.subr.mxu0 %v9240_v0  ;;  %8686 = vmatprep.subr.mxu1 %v9240_v0  ;;  %v9840_v51 = vadd.f32 %v2457_v26, %v2384_v58 }
 0x85b   : > { %8670 = vmatmul.mubr.msk.f32.vlgmr.msra.gmra.mxu0 %vm1295_vm2, %v2610_v15  ;;  %8677 = vmatmul.mubr.msk.f32.vlgmr.msra.gmra.mxu1 %vm1295_vm2, %v2611_v23 }
 0x85c   : > { %8683 = vmatprep.mubr.msk.f32.mxu0 %vm9241_vm0, %v9240_v0  ;;  %8690 = vmatprep.mubr.msk.f32.mxu1 %vm9241_vm0, %v9240_v0 }
 0x913   : > { %v3271_v27 = vpop.f32.mrf.mxu0  ;;  %v3350_v31 = vpop.f32.mrf.mxu1 }
 0x914   : > { %v3512_v34 = vmul.f32 0.35355338, %v3271_v27  ;;  %v3513_v35 = vmul.f32 0.35355338, %v3350_v31 }
 0x915   : > { %v8657_v36 = vpop.f32.mrf.mxu0  ;;  %v8664_v18 = vpop.f32.mrf.mxu1 }
 0x916   : > { %v3516_v37 = vadd.f32 %v3512_v34, %v9823_v33  ;;  %v3517_v39 = vadd.f32 %v3513_v35, %v9823_v33 }
 0x918   : > { %v3520_v40 = vsel %vm2093_vm4, %v3516_v37, -inf  ;;  %v3523_v42 = vsel %vm2093_vm4, %v3517_v39, -inf }
 0x919   : > { %3521 = vmax.xlane.f32.xlu1 %v3520_v40  ;;  %3524 = vmax.xlane.f32.xlu0 %v3523_v42 }
 0x91b   : > { %v3429_v3 = vpop.f32.mrf.mxu0  ;;  %v3508_v43 = vpop.f32.mrf.mxu1 }
 0x91c   : > { %v3514_v44 = vmul.f32 0.35355338, %v3429_v3  ;;  %v3515_v45 = vmul.f32 0.35355338, %v3508_v43 }
 0x91d   : > { %v8671_v46 = vpop.f32.mrf.mxu0  ;;  %v8678_v47 = vpop.f32.mrf.mxu1 }
 0x91e   : > { %v3518_v50 = vadd.f32 %v3514_v44, %v9823_v33  ;;  %v3519_v53 = vadd.f32 %v3515_v45, %v9823_v33 }
 0x920   : > { %v3526_v54 = vsel %vm2093_vm4, %v3518_v50, -inf  ;;  %v3529_v56 = vsel %vm2093_vm4, %v3519_v53, -inf }
 0x921   : > { %3527 = vmax.xlane.f32.xlu0 %v3526_v54  ;;  %3530 = vmax.xlane.f32.xlu1 %v3529_v56 }
 0x932   : > { %2914 = vrot.lane.b32.xlu1 %v2463_v49, %s10696_s4 }
 0x936   : > { %2920 = vrot.lane.b32.xlu1 %v2463_v49, %s10698_s26 }
 0x937   : > { %2908 = vrot.lane.b32.xlu0 %v2463_v49, %s10697_s27 }
 0x93b   : > { %2906 = vrot.lane.b32.xlu0 %v9840_v51, %s10697_s27 }
 0x9a2   : > { %v3522_v4 = vpop.xlane.xlu1 %3521  ;;  %v3525_v52 = vpop.xlane.xlu0 %3524 }
 0x9a3   : > { %v3532_v59 = vsub.f32 %v3516_v37, %v3522_v4  ;;  %v3533_v60 = vsub.f32 %v3517_v39, %v3525_v52 }
 0x9a5   : > { %v3536_v61 = vmul.f32 1.442695, %v3532_v59  ;;  %v3538_v62 = vmul.f32 1.442695, %v3533_v60 }
 0x9a7   : > { %9046 = vpow2.f32 %v3536_v61 }
 0x9a8   : > { %9048 = vpow2.f32 %v3538_v62 }
 0x9aa   : > { %v3528_v63 = vpop.xlane.xlu0 %3527  ;;  %v3531_v1 = vpop.xlane.xlu1 %3530 }
 0x9ab   : > { %v3534_v2 = vsub.f32 %v3518_v50, %v3528_v63  ;;  %v3535_v5 = vsub.f32 %v3519_v53, %v3531_v1 }
 0x9ad   : > { %v3540_v6 = vmul.f32 1.442695, %v3534_v2  ;;  %v3542_v9 = vmul.f32 1.442695, %v3535_v5 }
 0x9ae   : > { %v2915_v10 = vpop.permute.xlu1 %2914  ;;  %v2909_v20 = vpop.permute.xlu0 %2908 }
 0x9af   : > { %9050 = vpow2.f32 %v3540_v6  ;;  %v2992_v12 = vcombine.low %v2463_v49, %v2915_v10  ;;  %v2993_v19 = vcombine.high %v2463_v49, %v2915_v10 }
 0x9b0   : > { %9052 = vpow2.f32 %v3542_v9 }
 0x9b1   : > { %v3000_v24 = vrot.slane %v2992_v12, %v9499_v41  ;;  %v3007_v26 = vrot.slane %v2993_v19, %v9499_v41 }
 0x9b2   : > { %v2921_v21 = vpop.permute.xlu1 %2920  ;;  %v2907_v19 = vpop.permute.xlu0 %2906 }
 0x9b3   : > { %v3008_v7 = vcombine.low %v2909_v20, %v2921_v21  ;;  %v3009_v15 = vcombine.high %v2909_v20, %v2921_v21 }
 0x9b4   : > { %v9844_v23 = vpop.eup %9046 }
 0x9b5   : > { %v9847_v25 = vpop.eup %9048  ;;  %v3016_v27 = vrot.slane %v3008_v7, %v9499_v41  ;;  %v3023_v31 = vrot.slane %v3009_v15, %v9499_v41  ;;  %v3544_v34 = vsel %vm2093_vm4, %v9844_v23, 0.0 }
 0x9b6   : > { %v3547_v35 = vsel %vm2093_vm4, %v9847_v25, 0.0  ;;  %3545 = vadd.xlane.f32.xlu0 %v3544_v34 }
 0x9b7   : > { %v3024_v36 = vcombine.low %v3000_v24, %v3016_v27  ;;  %v3025_v18 = vcombine.high %v3000_v24, %v3016_v27  ;;  %v3040_v37 = vcombine.low %v3007_v26, %v3023_v31  ;;  %v3041_v39 = vcombine.high %v3007_v26, %v3023_v31  ;;  %3548 = vadd.xlane.f32.xlu1 %v3547_v35 }
 0x9b9   : > { %v3032_v40 = vrot.slane %v3024_v36, %v9502_v48  ;;  %v3039_v42 = vrot.slane %v3025_v18, %v9502_v48  ;;  %v3048_v3 = vrot.slane %v3040_v37, %v9502_v48  ;;  %v3055_v43 = vrot.slane %v3041_v39, %v9502_v48 }
 0x9bb   : > { %v3128_v44 = vcombine.low %v3032_v40, %v3039_v42  ;;  %v8232_v45 = vcombine.high %v3032_v40, %v3039_v42  ;;  %v3144_v46 = vcombine.low %v3048_v3, %v3055_v43  ;;  %v8233_v47 = vcombine.high %v3048_v3, %v3055_v43 }
 0x9bc   : > { %v9860_v50 = vpop.eup %9050 }
 0x9bd   : > { %v9862_v53 = vpop.eup %9052  ;;  %v3135_v54 = vrot.slane %v3128_v44, %v9499_v41  ;;  %v3143_v56 = vrot.slane %v8232_v45, %v9499_v41  ;;  %v3151_v58 = vrot.slane %v3144_v46, %v9499_v41  ;;  %v3159_v49 = vrot.slane %v8233_v47, %v9499_v41 }
 0x9be   : > { %v3553_v4 = vsel %vm2093_vm4, %v9862_v53, 0.0  ;;  %v3550_v52 = vsel %vm2093_vm4, %v9860_v50, 0.0 }
 0x9bf   : > { %3554 = vadd.xlane.f32.xlu1 %v3553_v4  ;;  %3551 = vadd.xlane.f32.xlu0 %v3550_v52  ;;  %v3160_v59 = vcombine.low %v3135_v54, %v3143_v56  ;;  %v3176_v60 = vcombine.low %v3151_v58, %v3159_v49  ;;  %v3161_v61 = vcombine.high %v3135_v54, %v3143_v56 }
 0x9c0   : > { %v3177_v62 = vcombine.high %v3151_v58, %v3159_v49 }
 0x9c1   : > { %v3168_v63 = vrot.slane %v3160_v59, %v9502_v48  ;;  %v3184_v1 = vrot.slane %v3176_v60, %v9502_v48  ;;  %v9875_v2 = vrot.slane %v3161_v61, %v9502_v48 }
 0x9c2   : > { %v9878_v5 = vrot.slane %v3177_v62, %v9502_v48 }
 0x9c3   : > { %v3192_v6 = vcombine.low %v3168_v63, %v3184_v1  ;;  %v3193_v9 = vcombine.high %v3168_v63, %v3184_v1 }
 0x9c4   : > { %v3194_v10 = vcombine.low %v9875_v2, %v9878_v5  ;;  %v3195_v12 = vcombine.high %v9875_v2, %v9878_v5 }
 0x9c5   : > { %8680 = vmatpush3.msra.mxu0 %v3192_v6  ;;  %8687 = vmatpush3.msra.mxu1 %v3193_v9 }
 0x9c6   : > { %8681 = vmatprep.subr.mxu0 %v9240_v0  ;;  %8688 = vmatprep.subr.mxu1 %v9240_v0 }
 0x9d0   : > { %2912 = vrot.lane.b32.xlu1 %v9840_v51, %s10696_s4 }
 0x9d5   : > { %2918 = vrot.lane.b32.xlu0 %v9840_v51, %s10698_s26 }
 0xa3f   : > { %v3546_v21 = vpop.xlane.xlu0 %3545 }
 0xa40   : > { %v3549_v20 = vpop.xlane.xlu1 %3548  ;;  %9054 = vrcp.f32 %v3546_v21 }
 0xa41   : > { %9056 = vrcp.f32 %v3549_v20 }
 0xa48   : > { %v3555_v7 = vpop.xlane.xlu1 %3554  ;;  %v3552_v15 = vpop.xlane.xlu0 %3551 }
 0xa49   : > { %9058 = vrcp.f32 %v3555_v7 }
 0xa4a   : > { %9060 = vrcp.f32 %v3552_v15 }
 0xa4c   : > { %v2913_v24 = vpop.permute.xlu1 %2912  ;;  %v2919_v26 = vpop.permute.xlu0 %2918 }
 0xa4d   : > { %v2924_v27 = vcombine.low %v9840_v51, %v2913_v24  ;;  %v2925_v31 = vcombine.high %v9840_v51, %v2913_v24  ;;  %v2940_v34 = vcombine.low %v2907_v19, %v2919_v26  ;;  %v2941_v35 = vcombine.high %v2907_v19, %v2919_v26  ;;  %v9055_v60 = vpop.eup %9054 }
 0xa4e   : > { %v9057_v6 = vpop.eup %9056  ;;  %v3560_v7 = vmul.f32 %v9055_v60, %v9844_v23 }
 0xa4f   : > { %v2932_v36 = vrot.slane %v2924_v27, %v9499_v41  ;;  %v2939_v18 = vrot.slane %v2925_v31, %v9499_v41  ;;  %v2948_v37 = vrot.slane %v2940_v34, %v9499_v41  ;;  %v2955_v39 = vrot.slane %v2941_v35, %v9499_v41 }
 0xa50   : > { %v3561_v15 = vmul.f32 %v9057_v6, %v9847_v25  ;;  %v2215_v6 = vld [vmem:[#allocation5 + $0xe0] sm:$0xff] }
 0xa51   : > { %v2956_v40 = vcombine.low %v2932_v36, %v2948_v37  ;;  %v2957_v42 = vcombine.high %v2932_v36, %v2948_v37  ;;  %v2972_v3 = vcombine.low %v2939_v18, %v2955_v39  ;;  %v2973_v43 = vcombine.high %v2939_v18, %v2955_v39 }
 0xa53   : > { %v2964_v44 = vrot.slane %v2956_v40, %v9502_v48  ;;  %v2971_v51 = vrot.slane %v2957_v42, %v9502_v48  ;;  %v2980_v45 = vrot.slane %v2972_v3, %v9502_v48  ;;  %v2987_v46 = vrot.slane %v2973_v43, %v9502_v48 }
 0xa55   : > { %v3060_v47 = vcombine.low %v2964_v44, %v2971_v51  ;;  %v8230_v54 = vcombine.high %v2964_v44, %v2971_v51  ;;  %v3076_v56 = vcombine.low %v2980_v45, %v2987_v46  ;;  %v8231_v58 = vcombine.high %v2980_v45, %v2987_v46 }
 0xa56   : > { %v9059_v27 = vpop.eup %9058 }
 0xa57   : > { %v3067_v49 = vrot.slane %v3060_v47, %v9499_v41  ;;  %v3075_v4 = vrot.slane %v8230_v54, %v9499_v41  ;;  %v3083_v52 = vrot.slane %v3076_v56, %v9499_v41  ;;  %v3091_v59 = vrot.slane %v8231_v58, %v9499_v41  ;;  %v9061_v31 = vpop.eup %9060  ;;  %v2217_v58 = vld [vmem:[#allocation5 + $0xf0] sm:$0xff] }
 0xa58   : > { %v3562_v34 = vmul.f32 %v9061_v31, %v9860_v50  ;;  %v3563_v35 = vmul.f32 %v9059_v27, %v9862_v53  ;;  %v2218_v50 = vld [vmem:[#allocation5 + $0xf8] sm:$0xff] }
 0xa59   : > { %v3092_v61 = vcombine.low %v3067_v49, %v3075_v4  ;;  %v3108_v62 = vcombine.low %v3083_v52, %v3091_v59  ;;  %v3093_v63 = vcombine.high %v3067_v49, %v3075_v4  ;;  %v3109_v1 = vcombine.high %v3083_v52, %v3091_v59  ;;  %v2216_v49 = vld [vmem:[#allocation5 + $0xe8] sm:$0xff] }
 0xa5b   : > { %v3100_v9 = vrot.slane %v3092_v61, %v9502_v48  ;;  %v3116_v19 = vrot.slane %v3108_v62, %v9502_v48  ;;  %v3107_v24 = vrot.slane %v3093_v63, %v9502_v48  ;;  %v3123_v26 = vrot.slane %v3109_v1, %v9502_v48 }
 0xa5d   : > { %v3124_v20 = vcombine.low %v3100_v9, %v3116_v19  ;;  %v3125_v21 = vcombine.high %v3100_v9, %v3116_v19  ;;  %v3126_v23 = vcombine.low %v3107_v24, %v3123_v26  ;;  %v3127_v25 = vcombine.high %v3107_v24, %v3123_v26 }
 0xa5f   : > { %8682 = vmatpush3.msra.mxu0 %v3124_v20  ;;  %8689 = vmatpush3.msra.mxu1 %v3125_v21 }
 0xa60   : > { %8684 = vmatmul.mubr.msk.f32.vlgmr.msra.gmra.mxu0 %vm2093_vm4, %v3560_v7  ;;  %8691 = vmatmul.mubr.msk.f32.vlgmr.msra.gmra.mxu1 %vm2093_vm4, %v3561_v15 }
 0xa61   : > { %8693 = vmatprep.subr.mxu0 %v9240_v0  ;;  %8700 = vmatprep.subr.mxu1 %v9240_v0 }
 0xa62   : > { %8694 = vmatpush3.msra.mxu0 %v3194_v10  ;;  %8701 = vmatpush3.msra.mxu1 %v3195_v12 }
 0xa63   : > { %8695 = vmatprep.subr.mxu0 %v9240_v0  ;;  %8702 = vmatprep.subr.mxu1 %v9240_v0 }
 0xa64   : > { %8696 = vmatpush3.msra.mxu0 %v3126_v23  ;;  %8697 = vmatprep.mubr.msk.f32.mxu0 %vm9241_vm0, %v9240_v0 }
 0xa65   : > { %8703 = vmatpush3.msra.mxu1 %v3127_v25  ;;  %8704 = vmatprep.mubr.msk.f32.mxu1 %vm9241_vm0, %v9240_v0 }
 0xa66   : > { %8698 = vmatmul.mubr.msk.f32.vlgmr.msra.gmra.mxu0 %vm2093_vm4, %v3562_v34  ;;  %8705 = vmatmul.mubr.msk.f32.vlgmr.msra.gmra.mxu1 %vm2093_vm4, %v3563_v35 }
 0xa67   : > { %8707 = vmatprep.subr.mxu0 %v9240_v0  ;;  %8715 = vmatprep.mubr.msk.f32.mxu0 %vm9241_vm0, %v9240_v0 }
 0xa68   : > { %8718 = vmatprep.subr.mxu1 %v9240_v0  ;;  %8726 = vmatprep.mubr.msk.f32.mxu1 %vm9241_vm0, %v9240_v0 }
 0xa69   : > { %8708 = vmatpush3.msra.mxu0 %v2218_v50 }
 0xa6a   : > { %8709 = vmatprep.subr.mxu0 %v9240_v0 }
 0xa6b   : > { %8710 = vmatpush3.msra.mxu0 %v2217_v58  ;;  %v4111_v58 = vld [vmem:[%s10652_s10 + $0x18] sm:$0xff] }
 0xa6c   : > { %8711 = vmatprep.subr.mxu0 %v9240_v0  ;;  %8719 = vmatpush3.msra.mxu1 %v4111_v58 }
 0xa6d   : > { %8712 = vmatpush3.msra.mxu0 %v2216_v49  ;;  %8720 = vmatprep.subr.mxu1 %v9240_v0  ;;  %v4109_v49 = vld [vmem:[%s10652_s10 + $0x8] sm:$0xff] }
 0xa6e   : > { %8713 = vmatprep.subr.mxu0 %v9240_v0 }
 0xa6f   : > { %8714 = vmatpush3.msra.mxu0 %v2215_v6 }
 0xa70   : > { %8729 = vmatprep.subr.mxu0 %v9240_v0 }
 0xb20   : > { %v3633_v53 = vpop.f32.mrf.mxu0  ;;  %v3706_v2 = vpop.f32.mrf.mxu1 }
 0xb22   : > { %v8685_v5 = vpop.f32.mrf.mxu0  ;;  %v8692_v10 = vpop.f32.mrf.mxu1 }
 0xb26   : > { %v3779_v12 = vpop.f32.mrf.mxu0  ;;  %v3852_v36 = vpop.f32.mrf.mxu1 }
 0xb27   : > { %v3856_v18 = vcombine.low %v3633_v53, %v3779_v12  ;;  %v3857_v37 = vcombine.high %v3633_v53, %v3779_v12  ;;  %v3872_v39 = vcombine.low %v3706_v2, %v3852_v36  ;;  %v3873_v40 = vcombine.high %v3706_v2, %v3852_v36 }
 0xb28   : > { %v8699_v42 = vpop.f32.mrf.mxu0  ;;  %v8706_v3 = vpop.f32.mrf.mxu1 }
 0xb29   : > { %v3864_v43 = vrot.slane %v3856_v18, %v9499_v41  ;;  %v3871_v44 = vrot.slane %v3857_v37, %v9499_v41  ;;  %v3880_v51 = vrot.slane %v3872_v39, %v9499_v41  ;;  %v3887_v45 = vrot.slane %v3873_v40, %v9499_v41 }
 0xb2a   : > { %v4009_v37 = vsub.s32 7, %v9463_v16 }
 0xb2b   : > { %v3888_v46 = vcombine.low %v3864_v43, %v3880_v51  ;;  %v3889_v47 = vcombine.high %v3864_v43, %v3880_v51  ;;  %v3904_v54 = vcombine.low %v3871_v44, %v3887_v45  ;;  %v3905_v56 = vcombine.high %v3871_v44, %v3887_v45  ;;  %v9109_v43 = vld [vmem:[%s9424_s30] sm:$0xff]  ;;  %s8337_s30 = sshll.u32 %s9365_s18, 7  ;;  %s9250_s18 = smov [#allocation8]  }
 0xb2c   : > { %v4010_v39 = vrot.slane %v9777_v30, %v4009_v37  ;;  %v4110_v30 = vld [vmem:[%s10652_s10 + $0x10] sm:$0xff]  ;;  %s9171_s29 = sshll.u32 %s9250_s18, 4  ;;  %s9172_s29 = int_to_ptr.vmem [resolvable:$false] %s9171_s29 }
 0xb2d   : > { %v3896_v4 = vrot.slane %v3888_v46, %v9502_v48  ;;  %v3903_v52 = vrot.slane %v3889_v47, %v9502_v48  ;;  %v3912_v59 = vrot.slane %v3904_v54, %v9502_v48  ;;  %v3919_v60 = vrot.slane %v3905_v56, %v9502_v48  ;;  %8721 = vmatpush3.msra.mxu1 %v4110_v30 }
 0xb2e   : > { %8722 = vmatprep.subr.mxu1 %v9240_v0 }
 0xb2f   : > { %v3924_v61 = vcombine.low %v3896_v4, %v3903_v52  ;;  %v8250_v62 = vcombine.high %v3896_v4, %v3903_v52  ;;  %v3940_v63 = vcombine.low %v3912_v59, %v3919_v60  ;;  %v8251_v1 = vcombine.high %v3912_v59, %v3919_v60  ;;  %v4108_v4 = vld [vmem:[%s10652_s10] sm:$0xff]  ;;  %8723 = vmatpush3.msra.mxu1 %v4109_v49  ;;  %v4200_v52 = vld [vmem:[%s10654_s12 + $0x38] sm:$0xff]  ;;  %v4199_v59 = vld [vmem:[%s10654_s12 + $0x30] sm:$0xff] }
 0xb30   : > { %8724 = vmatprep.subr.mxu1 %v9240_v0  ;;  %v4198_v60 = vld [vmem:[%s10654_s12 + $0x28] sm:$0xff] }
 0xb31   : > { %v3931_v9 = vrot.slane %v3924_v61, %v9499_v41  ;;  %v3939_v19 = vrot.slane %v8250_v62, %v9499_v41  ;;  %v3947_v20 = vrot.slane %v3940_v63, %v9499_v41  ;;  %v3955_v21 = vrot.slane %v8251_v1, %v9499_v41  ;;  %8725 = vmatpush3.msra.mxu1 %v4108_v4  ;;  %v4197_v61 = vld [vmem:[%s10654_s12 + $0x20] sm:$0xff]  ;;  %v4196_v62 = vld [vmem:[%s10654_s12 + $0x18] sm:$0xff] }
 0xb32   : > { %8748 = vmatprep.subr.mxu1 %v9240_v0 }
 0xb33   : > { %v3957_v7 = vcombine.high %v3931_v9, %v3939_v19  ;;  %v3973_v15 = vcombine.high %v3947_v20, %v3955_v21  ;;  %v3956_v24 = vcombine.low %v3931_v9, %v3939_v19  ;;  %v3972_v26 = vcombine.low %v3947_v20, %v3955_v21 }
 0xb34   : > { %v4101_v9 = vrot.slane %v9704_v38, %v9575_v32  ;;  %v4106_v21 = vrot.slane %v9704_v38, %v9653_v55  ;;  %v4193_v38 = vld [vmem:[%s10654_s12] sm:$0xff] }
 0xb35   : > { %v3971_v27 = vrot.slane %v3957_v7, %v9502_v48  ;;  %v3987_v31 = vrot.slane %v3973_v15, %v9502_v48  ;;  %v3964_v23 = vrot.slane %v3956_v24, %v9502_v48  ;;  %v3980_v25 = vrot.slane %v3972_v26, %v9502_v48  ;;  %v4195_v24 = vld [vmem:[%s10654_s12 + $0x10] sm:$0xff]  ;;  %v4194_v26 = vld [vmem:[%s10654_s12 + $0x8] sm:$0xff] }
 0xb37   : > { %v3990_v34 = vcombine.low %v3971_v27, %v3987_v31  ;;  %v3989_v35 = vcombine.high %v3964_v23, %v3980_v25  ;;  %v3988_v50 = vcombine.low %v3964_v23, %v3980_v25  ;;  %v3991_v53 = vcombine.high %v3971_v27, %v3987_v31  ;;  %v8253_v27 = vld [vmem:[%s10702_s6] ss:$0 sm:$0xff] }
 0xb39   : > { %3997 = vrot.lane.b32.xlu0 %v3990_v34, %s10699_s2  ;;  %3993 = vrot.lane.b32.xlu1 %v3989_v35, %s10700_s3  ;;  %v8255_v35 = vld [vmem:[%s10655_s13] ss:$0 sm:$0xff] }
 0xb3d   : > { %4001 = vrot.lane.b32.xlu1 %v3991_v53, %s10701_s21 }
 0xbab   : > { %v3994_v2 = vpop.permute.xlu1 %3993  ;;  %v3998_v5 = vpop.permute.xlu0 %3997 }
 0xbac   : > { %v4004_v10 = vsel %vm1295_vm2, %v3988_v50, %v3994_v2 }
 0xbad   : > { %v4005_v36 = vsel %vm2093_vm4, %v4004_v10, %v3998_v5 }
 0xbaf   : > { %v4002_v12 = vpop.permute.xlu1 %4001 }
 0xbb0   : > { %v4006_v18 = vsel %vm2095_vm5, %v4005_v36, %v4002_v12 }
 0xbb1   : > { %8716 = vmatmul.mubr.msk.f32.vlgmr.msra.gmra.mxu0 %vm629_vm1, %v4006_v18 }
 0xbb2   : > { %8745 = vmatprep.mubr.msk.f32.mxu0 %vm9241_vm0, %v9240_v0  ;;  %8730 = vmatpush3.msra.mxu0 %v4200_v52  ;;  %v10050_v52 = vld [vmem:[%s9429_s22] sm:$0xff]  ;;  %s10594_s22 = scalar_lea.hbm %s10658_s16, %s8337_s30 }
 0xbb3   : > { %8731 = vmatprep.subr.mxu0 %v9240_v0 }
 0xbb4   : > { %8732 = vmatpush3.msra.mxu0 %v4199_v59 }
 0xbb5   : > { %8733 = vmatprep.subr.mxu0 %v9240_v0 }
 0xbb6   : > { %8734 = vmatpush3.msra.mxu0 %v4198_v60  ;;  %v4344_v60 = vld [vmem:[#allocation5 + $0x138] sm:$0xff] }
 0xbb7   : > { %8735 = vmatprep.subr.mxu0 %v9240_v0 }
 0xbb8   : > { %8736 = vmatpush3.msra.mxu0 %v4197_v61  ;;  %v4343_v61 = vld [vmem:[#allocation5 + $0x130] sm:$0xff] }
 0xbb9   : > { %8737 = vmatprep.subr.mxu0 %v9240_v0 }
 0xbba   : > { %8738 = vmatpush3.msra.mxu0 %v4196_v62  ;;  %v4342_v62 = vld [vmem:[#allocation5 + $0x128] sm:$0xff] }
 0xbbb   : > { %8739 = vmatprep.subr.mxu0 %v9240_v0 }
 0xbbc   : > { %8740 = vmatpush3.msra.mxu0 %v4195_v24  ;;  %v4349_v24 = vld [vmem:[#allocation5 + $0x158] sm:$0xff] }
 0xbbd   : > { %8741 = vmatprep.subr.mxu0 %v9240_v0 }
 0xbbe   : > { %8742 = vmatpush3.msra.mxu0 %v4194_v26  ;;  %v4348_v26 = vld [vmem:[#allocation5 + $0x150] sm:$0xff] }
 0xbbf   : > { %8743 = vmatprep.subr.mxu0 %v9240_v0 }
 0xbc0   : > { %8744 = vmatpush3.msra.mxu0 %v4193_v38  ;;  %v4347_v38 = vld [vmem:[#allocation5 + $0x148] sm:$0xff] }
 0xbc1   : > { %8770 = vmatprep.subr.mxu0 %v9240_v0 }
 0xc71   : > { %v4080_v40 = vpop.f32.mrf.mxu0 }
 0xc72   : > { %v4081_v42 = vadd.f32 %v4080_v40, %v4010_v39 }
 0xc73   : > { %v8717_v3 = vpop.f32.mrf.mxu0 }
 0xc74   : > { %v4084_v44 = vadd.f32 %v9109_v43, %v4081_v42  ;;  %v4339_v42 = vld [vmem:[#allocation5 + $0x118] sm:$0xff]  ;;  %v4338_v3 = vld [vmem:[#allocation5 + $0x110] sm:$0xff]  ;;  %v4337_v43 = vld [vmem:[#allocation5 + $0x108] sm:$0xff] }
 0xc76   : > { %v4085_v51 = vsel %vm629_vm1, %v4084_v44, 0.0 }
 0xc77   : > { %4086 = vadd.xlane.f32.xlu0 %v4085_v51 }
 0xd00   : > { %v4087_v45 = vpop.xlane.xlu0 %4086 }
 0xd01   : > { %v4088_v46 = vmul.f32 0.03125, %v4087_v45 }
 0xd03   : > { %v4089_v47 = vsub.f32 %v4084_v44, %v4088_v46  ;;  %v4336_v44 = vld [vmem:[#allocation5 + $0x100] sm:$0xff] }
 0xd05   : > { %v4090_v54 = vmul.f32 %v4089_v47, %v4089_v47 }
 0xd07   : > { %v4091_v56 = vsel %vm629_vm1, %v4090_v54, 0.0 }
 0xd08   : > { %4092 = vadd.xlane.f32.xlu1 %v4091_v56 }
 0xd91   : > { %v4093_v63 = vpop.xlane.xlu1 %4092 }
 0xd92   : > { %v4094_v1 = vmul.f32 0.03125, %v4093_v63  ;;  %v4341_v63 = vld [vmem:[#allocation5 + $0x120] sm:$0xff] }
 0xd94   : > { %v4095_v6 = vadd.f32 1e-05, %v4094_v1  ;;  %v10068_v1 = vld [vmem:[%s10651_s9 + $0x8] sm:$0xff] }
 0xd96   : > { %9062 = vrsqrt.f32 %v4095_v6  ;;  %v4358_v6 = vrot.slane %v10068_v1, %v9466_v17 }
 0xda3   : > { %v9063_v19 = vpop.eup %9062 }
 0xda4   : > { %v4097_v20 = vmul.f32 %v9063_v19, %v4089_v47  ;;  %v9110_v47 = vld [vmem:[%s10656_s14] sm:$0x3f] }
 0xda5   : > { %v4299_v54 = vrot.slane %v9110_v47, %v9772_v29  ;;  %v4304_v58 = vrot.slane %v9110_v47, %v9691_v28 }
 0xda6   : > { %v4102_v7 = vmul.f32 %v4101_v9, %v4097_v20 }
 0xda8   : > { %v4107_v15 = vadd.f32 %v4106_v21, %v4102_v7 }
 0xdaa   : > { %8727 = vmatmul.mubr.msk.f32.vlgmr.msra.gmra.mxu1 %vm629_vm1, %v4107_v15 }
 0xdab   : > { %8756 = vmatprep.mubr.msk.f32.mxu1 %vm9241_vm0, %v9240_v0  ;;  %8749 = vmatpush3.msra.mxu1 %v4339_v42 }
 0xdac   : > { %8750 = vmatprep.subr.mxu1 %v9240_v0 }
 0xdad   : > { %8751 = vmatpush3.msra.mxu1 %v4338_v3 }
 0xdae   : > { %8752 = vmatprep.subr.mxu1 %v9240_v0 }
 0xdaf   : > { %8753 = vmatpush3.msra.mxu1 %v4337_v43 }
 0xdb0   : > { %8754 = vmatprep.subr.mxu1 %v9240_v0 }
 0xdb1   : > { %8755 = vmatpush3.msra.mxu1 %v4336_v44 }
 0xdb2   : > { %8759 = vmatprep.subr.mxu1 %v9240_v0 }
 0xe6a   : > { %v4188_v31 = vpop.f32.mrf.mxu1 }
 0xe6b   : > { %v4189_v23 = vadd.f32 %v8253_v27, %v4188_v31  ;;  %v4346_v27 = vld [vmem:[#allocation5 + $0x140] sm:$0xff] }
 0xe6c   : > { %v8728_v25 = vpop.f32.mrf.mxu1  ;;  %v9112_v31 = vld [vmem:[%s9442_s19] sm:$0xff]  ;;  %s552_s19 = sand.u32 1, %s9225_s0  }
 0xe6d   : > { %v4192_v34 = vmax.f32 %v4189_v23, 0.0  ;;  %s8186_s5 = sshll.u32 %s552_s19, 4  ;;  %s10602_s23 = scalar_lea.sflag [#allocation7], %s552_s19 }
 0xe6f   : > { %8746 = vmatmul.mubr.msk.f32.vlgmr.msra.gmra.mxu0 %vm4208_vm7, %v4192_v34 }
 0xe70   : > { %8778 = vmatprep.mubr.msk.f32.mxu0 %vm9241_vm0, %v9240_v0  ;;  %8771 = vmatpush3.msra.mxu0 %v4349_v24 }
 0xe71   : > { %8772 = vmatprep.subr.mxu0 %v9240_v0 }
 0xe72   : > { %8773 = vmatpush3.msra.mxu0 %v4348_v26 }
 0xe73   : > { %8774 = vmatprep.subr.mxu0 %v9240_v0 }
 0xe74   : > { %8775 = vmatpush3.msra.mxu0 %v4347_v38 }
 0xe75   : > { %8776 = vmatprep.subr.mxu0 %v9240_v0 }
 0xe76   : > { %8777 = vmatpush3.msra.mxu0 %v4346_v27 }
 0xe77   : > { %8791 = vmatprep.subr.mxu0 %v9240_v0  ;;  %8779 = vmatmul.mubr.msk.f32.vlgmr.msra.gmra.mxu0 %vm629_vm1, %v9112_v31 }
 0xe78   : > { %8793 = vmatprep.mubr.msk.f32.mxu0 %vm9241_vm0, %v9240_v0 }
 0xf2f   : > { %v4278_v50 = vpop.f32.mrf.mxu0 }
 0xf30   : > { %v4279_v53 = vadd.f32 %v8255_v35, %v4278_v50 }
 0xf31   : > { %v8747_v2 = vpop.f32.mrf.mxu0 }
 0xf32   : > { %v4282_v5 = vadd.f32 %v4279_v53, %v4107_v15 }
 0xf34   : > { %v4283_v10 = vsel %vm629_vm1, %v4282_v5, 0.0 }
 0xf35   : > { %4284 = vadd.xlane.f32.xlu0 %v4283_v10 }
 0xfbe   : > { %v4285_v12 = vpop.xlane.xlu0 %4284 }
 0xfbf   : > { %v4286_v36 = vmul.f32 0.03125, %v4285_v12 }
 0xfc1   : > { %v4287_v18 = vsub.f32 %v4282_v5, %v4286_v36 }
 0xfc3   : > { %v4288_v39 = vmul.f32 %v4287_v18, %v4287_v18 }
 0xfc5   : > { %v4289_v40 = vsel %vm629_vm1, %v4288_v39, 0.0 }
 0xfc6   : > { %4290 = vadd.xlane.f32.xlu0 %v4289_v40 }
0x104f   : > { %v4291_v51 = vpop.xlane.xlu0 %4290 }
0x1050   : > { %v4292_v45 = vmul.f32 0.03125, %v4291_v51 }
0x1052   : > { %v4293_v46 = vadd.f32 1e-05, %v4292_v45 }
0x1054   : > { %9064 = vrsqrt.f32 %v4293_v46 }
0x1061   : > { %v9065_v56 = vpop.eup %9064 }
0x1062   : > { %v4295_v30 = vmul.f32 %v9065_v56, %v4287_v18 }
0x1064   : > { %v4300_v49 = vmul.f32 %v4299_v54, %v4295_v30 }
0x1066   : > { %v10047_v4 = vadd.f32 %v4304_v58, %v4300_v49 }
0x1068   : > { %v4334_v59 = vadd.f32 %v10050_v52, %v10047_v4  ;;  %v4306_v16 = vsel %vm629_vm1, %v10047_v4, 0.0 }
0x106a   : > { %8757 = vmatmul.mubr.msk.f32.vlgmr.msra.gmra.mxu1 %vm629_vm1, %v4334_v59 }
0x106b   : > { %8760 = vmatpush3.msra.mxu1 %v4344_v60  ;;  %8767 = vmatprep.mubr.msk.f32.mxu1 %vm9241_vm0, %v9240_v0 }
0x106c   : > { %8761 = vmatprep.subr.mxu1 %v9240_v0 }
0x106d   : > { %8762 = vmatpush3.msra.mxu1 %v4343_v61 }
0x106e   : > { %8763 = vmatprep.subr.mxu1 %v9240_v0 }
0x106f   : > { %8764 = vmatpush3.msra.mxu1 %v4342_v62 }
0x1070   : > { %8765 = vmatprep.subr.mxu1 %v9240_v0 }
0x1071   : > { %8766 = vmatpush3.msra.mxu1 %v4341_v63 }
0x1072   : > { %8768 = vmatmul.mubr.msk.f32.vlgmr.msra.gmra.mxu1 %vm629_vm1, %v9454_v14  ;;  %8781 = vmatprep.subr.mxu1 %v9240_v0  ;;  %v4435_v14 = vrot.slane %v10068_v1, %v9478_v22 }
0x1073   : > { %8783 = vmatprep.mubr.msk.f32.mxu1 %vm9241_vm0, %v9240_v0 }
0x112a   : > { %v4428_v9 = vpop.f32.mrf.mxu1 }
0x112b   : > { %v4429_v19 = vadd.f32 %v4428_v9, %v4358_v6 }
0x112c   : > { %v8758_v20 = vpop.f32.mrf.mxu1 }
0x112d   : > { %4581 = vrot.lane.b32.xlu1 %v4429_v19, %s10697_s27 }
0x1132   : > { %v4502_v21 = vpop.f32.mrf.mxu1 }
0x1133   : > { %v4503_v7 = vadd.f32 %v4502_v21, %v4435_v14 }
0x1134   : > { %v8769_v15 = vpop.f32.mrf.mxu1 }
0x1135   : > { %4730 = vrot.lane.b32.xlu0 %v4503_v7, %s10696_s4  ;;  %4727 = vrot.lane.b32.xlu1 %v4503_v7, %s10697_s27 }
0x1139   : > { %4584 = vrot.lane.b32.xlu0 %v4429_v19, %s10696_s4  ;;  %4733 = vrot.lane.b32.xlu1 %v4503_v7, %s10698_s26 }
0x113d   : > { %4587 = vrot.lane.b32.xlu1 %v4429_v19, %s10698_s26 }
0x119f   : > { %v4582_v23 = vpop.permute.xlu1 %4581 }
0x11a7   : > { %v4731_v25 = vpop.permute.xlu0 %4730  ;;  %v4728_v34 = vpop.permute.xlu1 %4727 }
0x11a8   : > { %v4736_v35 = vcombine.low %v4503_v7, %v4731_v25  ;;  %v4737_v50 = vcombine.high %v4503_v7, %v4731_v25 }
0x11aa   : > { %v4744_v12 = vrot.slane %v4736_v35, %v9499_v41  ;;  %v4751_v36 = vrot.slane %v4737_v50, %v9499_v41 }
0x11ab   : > { %v4734_v53 = vpop.permute.xlu1 %4733  ;;  %v4585_v2 = vpop.permute.xlu0 %4584 }
0x11ac   : > { %v4752_v5 = vcombine.low %v4728_v34, %v4734_v53  ;;  %v4753_v10 = vcombine.high %v4728_v34, %v4734_v53  ;;  %v4590_v40 = vcombine.low %v4429_v19, %v4585_v2  ;;  %v4591_v42 = vcombine.high %v4429_v19, %v4585_v2 }
0x11ae   : > { %v4760_v18 = vrot.slane %v4752_v5, %v9499_v41  ;;  %v4767_v39 = vrot.slane %v4753_v10, %v9499_v41  ;;  %v4598_v49 = vrot.slane %v4590_v40, %v9499_v41  ;;  %v4605_v59 = vrot.slane %v4591_v42, %v9499_v41 }
0x11af   : > { %v4588_v3 = vpop.permute.xlu1 %4587 }
0x11b0   : > { %v4768_v43 = vcombine.low %v4744_v12, %v4760_v18  ;;  %v4769_v44 = vcombine.high %v4744_v12, %v4760_v18  ;;  %v4784_v51 = vcombine.low %v4751_v36, %v4767_v39  ;;  %v4785_v45 = vcombine.high %v4751_v36, %v4767_v39 }
0x11b1   : > { %v4606_v46 = vcombine.low %v4582_v23, %v4588_v3  ;;  %v4607_v47 = vcombine.high %v4582_v23, %v4588_v3 }
0x11b2   : > { %v4776_v54 = vrot.slane %v4768_v43, %v9502_v48  ;;  %v4783_v56 = vrot.slane %v4769_v44, %v9502_v48  ;;  %v4792_v58 = vrot.slane %v4784_v51, %v9502_v48  ;;  %v4799_v30 = vrot.slane %v4785_v45, %v9502_v48 }
0x11b3   : > { %v4614_v60 = vrot.slane %v4606_v46, %v9499_v41  ;;  %v4621_v61 = vrot.slane %v4607_v47, %v9499_v41 }
0x11b4   : > { %v4804_v62 = vcombine.low %v4776_v54, %v4783_v56  ;;  %v8264_v63 = vcombine.high %v4776_v54, %v4783_v56  ;;  %v4820_v6 = vcombine.low %v4792_v58, %v4799_v30  ;;  %v8265_v9 = vcombine.high %v4792_v58, %v4799_v30 }
0x11b5   : > { %v4622_v19 = vcombine.low %v4598_v49, %v4614_v60  ;;  %v4623_v20 = vcombine.high %v4598_v49, %v4614_v60  ;;  %v4638_v14 = vcombine.low %v4605_v59, %v4621_v61  ;;  %v4639_v21 = vcombine.high %v4605_v59, %v4621_v61 }
0x11b6   : > { %v4811_v7 = vrot.slane %v4804_v62, %v9499_v41  ;;  %v4819_v15 = vrot.slane %v8264_v63, %v9499_v41  ;;  %v4827_v24 = vrot.slane %v4820_v6, %v9499_v41  ;;  %v4835_v26 = vrot.slane %v8265_v9, %v9499_v41  ;;  %v4576_v9 = vpop.f32.mrf.mxu0 }
0x11b7   : > { %v4630_v38 = vrot.slane %v4622_v19, %v9502_v48  ;;  %v4637_v27 = vrot.slane %v4623_v20, %v9502_v48  ;;  %v4646_v31 = vrot.slane %v4638_v14, %v9502_v48  ;;  %v4653_v23 = vrot.slane %v4639_v21, %v9502_v48 }
0x11b8   : > { %v4836_v25 = vcombine.low %v4811_v7, %v4819_v15  ;;  %v4837_v34 = vcombine.high %v4811_v7, %v4819_v15  ;;  %v4852_v35 = vcombine.low %v4827_v24, %v4835_v26  ;;  %v4853_v50 = vcombine.high %v4827_v24, %v4835_v26  ;;  %v8780_v19 = vpop.f32.mrf.mxu0 }
0x11b9   : > { %v4658_v53 = vcombine.low %v4630_v38, %v4637_v27  ;;  %v8262_v2 = vcombine.high %v4630_v38, %v4637_v27  ;;  %v4674_v5 = vcombine.low %v4646_v31, %v4653_v23  ;;  %v8263_v10 = vcombine.high %v4646_v31, %v4653_v23 }
0x11ba   : > { %v4844_v12 = vrot.slane %v4836_v25, %v9502_v48  ;;  %v4860_v36 = vrot.slane %v4852_v35, %v9502_v48  ;;  %v4851_v18 = vrot.slane %v4837_v34, %v9502_v48  ;;  %v4867_v39 = vrot.slane %v4853_v50, %v9502_v48 }
0x11bb   : > { %v4665_v40 = vrot.slane %v4658_v53, %v9499_v41  ;;  %v4673_v42 = vrot.slane %v8262_v2, %v9499_v41  ;;  %v4681_v3 = vrot.slane %v4674_v5, %v9499_v41  ;;  %v4689_v43 = vrot.slane %v8263_v10, %v9499_v41 }
0x11bc   : > { %v4868_v44 = vcombine.low %v4844_v12, %v4860_v36  ;;  %v4870_v51 = vcombine.low %v4851_v18, %v4867_v39  ;;  %v4869_v61 = vcombine.high %v4844_v12, %v4860_v36  ;;  %v4871_v63 = vcombine.high %v4851_v18, %v4867_v39 }
0x11bd   : > { %v4690_v45 = vcombine.low %v4665_v40, %v4673_v42  ;;  %v4691_v46 = vcombine.high %v4665_v40, %v4673_v42  ;;  %v4706_v47 = vcombine.low %v4681_v3, %v4689_v43  ;;  %v4707_v54 = vcombine.high %v4681_v3, %v4689_v43 }
0x11be   : > { %8782 = vmatpush3.xpose.msk.msra.mxu1 %vm1295_vm2, %v4868_v44  ;;  %8792 = vmatpush3.xpose.msk.msra.mxu0 %vm1295_vm2, %v4870_v51  ;;  %v4509_v36 = vrot.slane %v10068_v1, %v9575_v32 }
0x11bf   : > { %8786 = vmatprep.subr.mxu1 %v9240_v0  ;;  %v4698_v56 = vrot.slane %v4690_v45, %v9502_v48  ;;  %v4714_v58 = vrot.slane %v4706_v47, %v9502_v48  ;;  %v4705_v30 = vrot.slane %v4691_v46, %v9502_v48  ;;  %v4721_v49 = vrot.slane %v4707_v54, %v9502_v48 }
0x11c0   : > { %8801 = vmatprep.subr.mxu0 %v9240_v0  ;;  %v4577_v18 = vadd.f32 %v4576_v9, %v4509_v36 }
0x11c1   : > { %v4722_v59 = vcombine.low %v4698_v56, %v4714_v58  ;;  %v4724_v60 = vcombine.low %v4705_v30, %v4721_v49  ;;  %v4723_v62 = vcombine.high %v4698_v56, %v4714_v58  ;;  %v4725_v6 = vcombine.high %v4705_v30, %v4721_v49 }
0x11c3   : > { %8784 = vmatmul.mubr.msk.f32.vlgmr.msra.gmra.mxu1 %vm1295_vm2, %v4722_v59  ;;  %8794 = vmatmul.mubr.msk.f32.vlgmr.msra.gmra.mxu0 %vm1295_vm2, %v4724_v60 }
0x11c4   : > { %8787 = vmatpush3.xpose.msk.msra.mxu1 %vm1295_vm2, %v4869_v61  ;;  %8788 = vmatprep.mubr.msk.f32.mxu1 %vm9241_vm0, %v9240_v0 }
0x11c5   : > { %8796 = vmatprep.subr.mxu1 %v9240_v0  ;;  %8803 = vmatprep.mubr.msk.f32.mxu0 %vm9241_vm0, %v9240_v0 }
0x11c7   : > { %8789 = vmatmul.mubr.msk.f32.vlgmr.msra.gmra.mxu1 %vm1295_vm2, %v4723_v62 }
0x11c8   : > { %8797 = vmatpush3.xpose.msk.msra.mxu1 %vm1295_vm2, %v4871_v63  ;;  %8798 = vmatprep.mubr.msk.f32.mxu1 %vm9241_vm0, %v9240_v0 }
0x11c9   : > { %8806 = vmatprep.subr.mxu1 %v9240_v0 }
0x11cb   : > { %8799 = vmatmul.mubr.msk.f32.vlgmr.msra.gmra.mxu1 %vm1295_vm2, %v4725_v6 }
0x11cc   : > { %8808 = vmatprep.mubr.msk.f32.mxu1 %vm9241_vm0, %v9240_v0 }
0x1283   : > { %v5090_v20 = vpop.f32.mrf.mxu1  ;;  %v5242_v14 = vpop.f32.mrf.mxu0 }
0x1284   : > { %v5322_v21 = vmul.f32 0.35355338, %v5090_v20  ;;  %v5324_v7 = vmul.f32 0.35355338, %v5242_v14 }
0x1285   : > { %v8785_v15 = vpop.f32.mrf.mxu1  ;;  %v8795_v24 = vpop.f32.mrf.mxu0 }
0x1286   : > { %v5326_v26 = vadd.f32 %v5322_v21, %v9564_v8  ;;  %v5328_v23 = vadd.f32 %v5324_v7, %v9564_v8 }
0x1287   : > { %v5166_v38 = vpop.f32.mrf.mxu1 }
0x1288   : > { %v5323_v27 = vmul.f32 0.35355338, %v5166_v38  ;;  %v5330_v31 = vsel %vm1295_vm2, %v5326_v26, -inf  ;;  %v5336_v2 = vsel %vm1295_vm2, %v5328_v23, -inf }
0x1289   : > { %5331 = vmax.xlane.f32.xlu0 %v5330_v31  ;;  %v8790_v25 = vpop.f32.mrf.mxu1 }
0x128a   : > { %v5327_v34 = vadd.f32 %v5323_v27, %v9564_v8 }
0x128b   : > { %v5318_v35 = vpop.f32.mrf.mxu1 }
0x128c   : > { %v5325_v50 = vmul.f32 0.35355338, %v5318_v35  ;;  %v5333_v53 = vsel %vm1295_vm2, %v5327_v34, -inf }
0x128d   : > { %5334 = vmax.xlane.f32.xlu1 %v5333_v53  ;;  %v8800_v5 = vpop.f32.mrf.mxu1  ;;  %5337 = vmax.xlane.f32.xlu0 %v5336_v2 }
0x128e   : > { %v5329_v10 = vadd.f32 %v5325_v50, %v9564_v8 }
0x1290   : > { %v5339_v12 = vsel %vm1295_vm2, %v5329_v10, -inf }
0x1291   : > { %5340 = vmax.xlane.f32.xlu0 %v5339_v12 }
0x129e   : > { %4873 = vrot.lane.b32.xlu1 %v4577_v18, %s10697_s27 }
0x1312   : > { %v5332_v39 = vpop.xlane.xlu0 %5331 }
0x1313   : > { %v5342_v40 = vsub.f32 %v5326_v26, %v5332_v39 }
0x1315   : > { %v5346_v42 = vmul.f32 1.442695, %v5342_v40 }
0x1316   : > { %v5335_v3 = vpop.xlane.xlu1 %5334  ;;  %v5338_v43 = vpop.xlane.xlu0 %5337 }
0x1317   : > { %9066 = vpow2.f32 %v5346_v42  ;;  %v5343_v44 = vsub.f32 %v5327_v34, %v5335_v3  ;;  %v5344_v51 = vsub.f32 %v5328_v23, %v5338_v43 }
0x1319   : > { %v5348_v45 = vmul.f32 1.442695, %v5343_v44  ;;  %v5350_v46 = vmul.f32 1.442695, %v5344_v51 }
0x131a   : > { %v5341_v8 = vpop.xlane.xlu0 %5340  ;;  %v4874_v63 = vpop.permute.xlu1 %4873 }
0x131b   : > { %9068 = vpow2.f32 %v5348_v45  ;;  %v5345_v47 = vsub.f32 %v5329_v10, %v5341_v8 }
0x131c   : > { %9070 = vpow2.f32 %v5350_v46 }
0x131d   : > { %v5352_v54 = vmul.f32 1.442695, %v5345_v47 }
0x131f   : > { %9072 = vpow2.f32 %v5352_v54 }
0x1324   : > { %v9067_v56 = vpop.eup %9066 }
0x1325   : > { %v5354_v58 = vsel %vm1295_vm2, %v9067_v56, 0.0 }
0x1326   : > { %5355 = vadd.xlane.f32.xlu1 %v5354_v58 }
0x1328   : > { %v9069_v30 = vpop.eup %9068 }
0x1329   : > { %v10152_v49 = vpop.eup %9070  ;;  %v5357_v59 = vsel %vm1295_vm2, %v9069_v30, 0.0 }
0x132a   : > { %5358 = vadd.xlane.f32.xlu0 %v5357_v59  ;;  %v5360_v60 = vsel %vm1295_vm2, %v10152_v49, 0.0 }
0x132b   : > { %5361 = vadd.xlane.f32.xlu1 %v5360_v60 }
0x132c   : > { %v10157_v61 = vpop.eup %9072 }
0x132d   : > { %v5363_v62 = vsel %vm1295_vm2, %v10157_v61, 0.0 }
0x132e   : > { %5364 = vadd.xlane.f32.xlu0 %v5363_v62 }
0x133c   : > { %4879 = vrot.lane.b32.xlu1 %v4577_v18, %s10698_s26 }
0x1344   : > { %4876 = vrot.lane.b32.xlu0 %v4577_v18, %s10696_s4 }
0x13af   : > { %v5356_v6 = vpop.xlane.xlu1 %5355 }
0x13b0   : > { %9074 = vrcp.f32 %v5356_v6 }
0x13b3   : > { %v5359_v9 = vpop.xlane.xlu0 %5358 }
0x13b4   : > { %v5362_v19 = vpop.xlane.xlu1 %5361  ;;  %9076 = vrcp.f32 %v5359_v9 }
0x13b5   : > { %9078 = vrcp.f32 %v5362_v19 }
0x13b7   : > { %v5365_v20 = vpop.xlane.xlu0 %5364 }
0x13b8   : > { %v4880_v14 = vpop.permute.xlu1 %4879  ;;  %9080 = vrcp.f32 %v5365_v20 }
0x13b9   : > { %v4898_v21 = vcombine.low %v4874_v63, %v4880_v14  ;;  %v4899_v7 = vcombine.high %v4874_v63, %v4880_v14 }
0x13bb   : > { %v4877_v15 = vpop.permute.xlu0 %4876  ;;  %v4906_v38 = vrot.slane %v4898_v21, %v9499_v41  ;;  %v4913_v27 = vrot.slane %v4899_v7, %v9499_v41 }
0x13bc   : > { %v4882_v24 = vcombine.low %v4577_v18, %v4877_v15  ;;  %v4883_v26 = vcombine.high %v4577_v18, %v4877_v15 }
0x13bd   : > { %v9075_v8 = vpop.eup %9074 }
0x13be   : > { %v4890_v31 = vrot.slane %v4882_v24, %v9499_v41  ;;  %v4897_v23 = vrot.slane %v4883_v26, %v9499_v41  ;;  %v5370_v9 = vmul.f32 %v9075_v8, %v9067_v56 }
0x13c0   : > { %v4914_v25 = vcombine.low %v4890_v31, %v4906_v38  ;;  %v4915_v34 = vcombine.high %v4890_v31, %v4906_v38  ;;  %v4930_v35 = vcombine.low %v4897_v23, %v4913_v27  ;;  %v4931_v50 = vcombine.high %v4897_v23, %v4913_v27 }
0x13c1   : > { %v9077_v47 = vpop.eup %9076 }
0x13c2   : > { %v4922_v53 = vrot.slane %v4914_v25, %v9502_v48  ;;  %v4929_v2 = vrot.slane %v4915_v34, %v9502_v48  ;;  %v4938_v5 = vrot.slane %v4930_v35, %v9502_v48  ;;  %v4945_v10 = vrot.slane %v4931_v50, %v9502_v48  ;;  %v9079_v62 = vpop.eup %9078 }
0x13c3   : > { %v5371_v19 = vmul.f32 %v9077_v47, %v9069_v30  ;;  %v5372_v7 = vmul.f32 %v9079_v62, %v10152_v49  ;;  %v4354_v30 = vld [vmem:[#allocation5 + $0x178] sm:$0xff]  ;;  %v4351_v47 = vld [vmem:[#allocation5 + $0x160] sm:$0xff] }
0x13c4   : > { %v4950_v12 = vcombine.low %v4922_v53, %v4929_v2  ;;  %v8266_v36 = vcombine.high %v4922_v53, %v4929_v2  ;;  %v4966_v18 = vcombine.low %v4938_v5, %v4945_v10  ;;  %v8267_v39 = vcombine.high %v4938_v5, %v4945_v10 }
0x13c5   : > { %v9081_v20 = vpop.eup %9080 }
0x13c6   : > { %v4957_v40 = vrot.slane %v4950_v12, %v9499_v41  ;;  %v4965_v42 = vrot.slane %v8266_v36, %v9499_v41  ;;  %v4973_v3 = vrot.slane %v4966_v18, %v9499_v41  ;;  %v4981_v43 = vrot.slane %v8267_v39, %v9499_v41  ;;  %v4353_v39 = vld [vmem:[#allocation5 + $0x170] sm:$0xff] }
0x13c7   : > { %v5373_v56 = vmul.f32 %v9081_v20, %v10157_v61 }
0x13c8   : > { %v4982_v44 = vcombine.low %v4957_v40, %v4965_v42  ;;  %v4998_v51 = vcombine.low %v4973_v3, %v4981_v43  ;;  %v4983_v45 = vcombine.high %v4957_v40, %v4965_v42  ;;  %v4999_v46 = vcombine.high %v4973_v3, %v4981_v43  ;;  %v4352_v40 = vld [vmem:[#allocation5 + $0x168] sm:$0xff] }
0x13ca   : > { %v4990_v54 = vrot.slane %v4982_v44, %v9502_v48  ;;  %v5006_v58 = vrot.slane %v4998_v51, %v9502_v48  ;;  %v4997_v59 = vrot.slane %v4983_v45, %v9502_v48  ;;  %v5013_v60 = vrot.slane %v4999_v46, %v9502_v48 }
0x13cc   : > { %v5014_v63 = vcombine.low %v4990_v54, %v5006_v58  ;;  %v5015_v6 = vcombine.high %v4990_v54, %v5006_v58  ;;  %v5016_v14 = vcombine.low %v4997_v59, %v5013_v60  ;;  %v5017_v21 = vcombine.high %v4997_v59, %v5013_v60 }
0x13ce   : > { %8802 = vmatpush3.msra.mxu0 %v5014_v63  ;;  %8807 = vmatpush3.msra.mxu1 %v5015_v6 }
0x13cf   : > { %8804 = vmatmul.mubr.msk.f32.vlgmr.msra.gmra.mxu0 %vm1295_vm2, %v5370_v9  ;;  %8809 = vmatmul.mubr.msk.f32.vlgmr.msra.gmra.mxu1 %vm1295_vm2, %v5371_v19 }
0x13d0   : > { %8811 = vmatprep.subr.mxu0 %v9240_v0  ;;  %8816 = vmatprep.subr.mxu1 %v9240_v0 }
0x13d1   : > { %8812 = vmatpush3.msra.mxu0 %v5016_v14  ;;  %8817 = vmatpush3.msra.mxu1 %v5017_v21 }
0x13d2   : > { %8813 = vmatprep.mubr.msk.f32.mxu0 %vm9241_vm0, %v9240_v0  ;;  %8818 = vmatprep.mubr.msk.f32.mxu1 %vm9241_vm0, %v9240_v0 }
0x13d3   : > { %8814 = vmatmul.mubr.msk.f32.vlgmr.msra.gmra.mxu0 %vm1295_vm2, %v5372_v7  ;;  %8819 = vmatmul.mubr.msk.f32.vlgmr.msra.gmra.mxu1 %vm1295_vm2, %v5373_v56 }
0x13d4   : > { %8821 = vmatprep.subr.mxu0 %v9240_v0  ;;  %8829 = vmatprep.mubr.msk.f32.mxu0 %vm9241_vm0, %v9240_v0 }
0x13d5   : > { %8832 = vmatprep.subr.mxu1 %v9240_v0  ;;  %8840 = vmatprep.mubr.msk.f32.mxu1 %vm9241_vm0, %v9240_v0 }
0x13d6   : > { %8822 = vmatpush3.msra.mxu0 %v4354_v30 }
0x13d7   : > { %8823 = vmatprep.subr.mxu0 %v9240_v0 }
0x13d8   : > { %8824 = vmatpush3.msra.mxu0 %v4353_v39  ;;  %v5922_v39 = vld [vmem:[#allocation5 + $0x198] sm:$0xff] }
0x13d9   : > { %8825 = vmatprep.subr.mxu0 %v9240_v0  ;;  %8833 = vmatpush3.msra.mxu1 %v5922_v39 }
0x13da   : > { %8826 = vmatpush3.msra.mxu0 %v4352_v40  ;;  %v5921_v40 = vld [vmem:[#allocation5 + $0x190] sm:$0xff]  ;;  %8834 = vmatprep.subr.mxu1 %v9240_v0 }
0x13db   : > { %8827 = vmatprep.subr.mxu0 %v9240_v0  ;;  %8835 = vmatpush3.msra.mxu1 %v5921_v40 }
0x13dc   : > { %8828 = vmatpush3.msra.mxu0 %v4351_v47  ;;  %8836 = vmatprep.subr.mxu1 %v9240_v0 }
0x148f   : > { %v5443_v49 = vpop.f32.mrf.mxu0  ;;  %v5516_v61 = vpop.f32.mrf.mxu1 }
0x1491   : > { %v8805_v15 = vpop.f32.mrf.mxu0  ;;  %v8810_v24 = vpop.f32.mrf.mxu1 }
0x1493   : > { %v5589_v26 = vpop.f32.mrf.mxu0  ;;  %v5662_v38 = vpop.f32.mrf.mxu1 }
0x1494   : > { %v5666_v27 = vcombine.low %v5443_v49, %v5589_v26  ;;  %v5667_v31 = vcombine.high %v5443_v49, %v5589_v26  ;;  %v5682_v23 = vcombine.low %v5516_v61, %v5662_v38  ;;  %v5683_v25 = vcombine.high %v5516_v61, %v5662_v38 }
0x1495   : > { %v8815_v34 = vpop.f32.mrf.mxu0  ;;  %v8820_v35 = vpop.f32.mrf.mxu1 }
0x1496   : > { %v5674_v50 = vrot.slane %v5666_v27, %v9499_v41  ;;  %v5681_v53 = vrot.slane %v5667_v31, %v9499_v41  ;;  %v5690_v2 = vrot.slane %v5682_v23, %v9499_v41  ;;  %v5697_v5 = vrot.slane %v5683_v25, %v9499_v41 }
0x1497   : > { %v5820_v31 = vrot.slane %v10068_v1, %v9653_v55 }
0x1498   : > { %v5698_v10 = vcombine.low %v5674_v50, %v5690_v2  ;;  %v5699_v12 = vcombine.high %v5674_v50, %v5690_v2  ;;  %v5714_v36 = vcombine.low %v5681_v53, %v5697_v5  ;;  %v5715_v18 = vcombine.high %v5681_v53, %v5697_v5  ;;  %v5927_v50 = vld [vmem:[#allocation5 + $0x1b8] sm:$0xff]  ;;  %v5926_v53 = vld [vmem:[#allocation5 + $0x1b0] sm:$0xff]  ;;  %v5925_v2 = vld [vmem:[#allocation5 + $0x1a8] sm:$0xff] }
0x1499   : > { %8843 = vmatprep.subr.mxu0 %v5927_v50  ;;  %v5924_v5 = vld [vmem:[#allocation5 + $0x1a0] sm:$0xff] }
0x149a   : > { %v5706_v42 = vrot.slane %v5698_v10, %v9502_v48  ;;  %v5713_v3 = vrot.slane %v5699_v12, %v9502_v48  ;;  %v5722_v43 = vrot.slane %v5714_v36, %v9502_v48  ;;  %v5729_v44 = vrot.slane %v5715_v18, %v9502_v48 }
0x149c   : > { %v5734_v51 = vcombine.low %v5706_v42, %v5713_v3  ;;  %v8280_v45 = vcombine.high %v5706_v42, %v5713_v3  ;;  %v5750_v46 = vcombine.low %v5722_v43, %v5729_v44  ;;  %v8281_v8 = vcombine.high %v5722_v43, %v5729_v44  ;;  %v5920_v42 = vld [vmem:[#allocation5 + $0x188] sm:$0xff] }
0x149d   : > { %8837 = vmatpush3.msra.mxu1 %v5920_v42  ;;  %v6018_v3 = vrot.slane %v10068_v1, %v9691_v28 }
0x149e   : > { %v5741_v54 = vrot.slane %v5734_v51, %v9499_v41  ;;  %v5749_v58 = vrot.slane %v8280_v45, %v9499_v41  ;;  %v5757_v59 = vrot.slane %v5750_v46, %v9499_v41  ;;  %v5765_v60 = vrot.slane %v8281_v8, %v9499_v41  ;;  %8838 = vmatprep.subr.mxu1 %v9240_v0  ;;  %v5932_v46 = vld [vmem:[#allocation5 + $0x1d8] sm:$0xff] }
0x14a0   : > { %v5767_v62 = vcombine.high %v5741_v54, %v5749_v58  ;;  %v5783_v63 = vcombine.high %v5757_v59, %v5765_v60  ;;  %v5766_v6 = vcombine.low %v5741_v54, %v5749_v58  ;;  %v5782_v9 = vcombine.low %v5757_v59, %v5765_v60  ;;  %v10248_v58 = vld [vmem:[%s10656_s14 + $0x8] sm:$0x3f] }
0x14a1   : > { %v5910_v59 = vrot.slane %v10248_v58, %v9466_v17 }
0x14a2   : > { %v5781_v19 = vrot.slane %v5767_v62, %v9502_v48  ;;  %v5797_v20 = vrot.slane %v5783_v63, %v9502_v48  ;;  %v5774_v14 = vrot.slane %v5766_v6, %v9502_v48  ;;  %v5790_v21 = vrot.slane %v5782_v9, %v9502_v48 }
0x14a3   : > { %v5915_v63 = vrot.slane %v10248_v58, %v9478_v22 }
0x14a4   : > { %v5800_v7 = vcombine.low %v5781_v19, %v5797_v20  ;;  %v5799_v56 = vcombine.high %v5774_v14, %v5790_v21  ;;  %v5798_v30 = vcombine.low %v5774_v14, %v5790_v21  ;;  %v5801_v49 = vcombine.high %v5781_v19, %v5797_v20  ;;  %v9113_v20 = vld [vmem:[%s9662_s28] sm:$0xff] }
0x14a6   : > { %5807 = vrot.lane.b32.xlu0 %v5800_v7, %s10699_s2  ;;  %5803 = vrot.lane.b32.xlu1 %v5799_v56, %s10700_s3 }
0x14aa   : > { %5811 = vrot.lane.b32.xlu1 %v5801_v49, %s10701_s21 }
0x1518   : > { %v5804_v61 = vpop.permute.xlu1 %5803  ;;  %v5808_v15 = vpop.permute.xlu0 %5807 }
0x1519   : > { %v5814_v24 = vsel %vm1295_vm2, %v5798_v30, %v5804_v61 }
0x151a   : > { %v5815_v38 = vsel %vm2093_vm4, %v5814_v24, %v5808_v15 }
0x151c   : > { %v5812_v26 = vpop.permute.xlu1 %5811 }
0x151d   : > { %v5816_v27 = vsel %vm2095_vm5, %v5815_v38, %v5812_v26 }
0x151e   : > { %8830 = vmatmul.mubr.msk.f32.vlgmr.msra.gmra.mxu0 %vm629_vm1, %v5816_v27 }
0x151f   : > { %8851 = vmatprep.mubr.msk.f32.mxu0 %vm629_vm1, %v9674_v11  ;;  %8844 = vmatpush3.msra.mxu0 %v5927_v50 }
0x1520   : > { %8845 = vmatprep.subr.mxu0 %v5926_v53 }
0x1521   : > { %8846 = vmatpush3.msra.mxu0 %v5926_v53 }
0x1522   : > { %8847 = vmatprep.subr.mxu0 %v5925_v2 }
0x1523   : > { %8848 = vmatpush3.msra.mxu0 %v5925_v2 }
0x1524   : > { %8849 = vmatprep.subr.mxu0 %v5924_v5 }
0x1525   : > { %8850 = vmatpush3.msra.mxu0 %v5924_v5 }
0x1526   : > { %8852 = vmatmul.mubr.msk.f32.vlgmr.msra.gmra.mxu0 %vm629_vm1, %v9677_v13  ;;  %8865 = vmatprep.subr.mxu0 %v9240_v0  ;;  %v5919_v13 = vld [vmem:[#allocation5 + $0x180] sm:$0xff] }
0x1527   : > { %8869 = vmatprep.mubr.msk.f32.mxu0 %vm9241_vm0, %v9240_v0  ;;  %8839 = vmatpush3.msra.mxu1 %v5919_v13 }
0x1528   : > { %8854 = vmatprep.subr.mxu1 %v5932_v46 }
0x15de   : > { %v5890_v23 = vpop.f32.mrf.mxu0 }
0x15df   : > { %v5891_v25 = vadd.f32 %v5890_v23, %v5820_v31 }
0x15e0   : > { %v8831_v34 = vpop.f32.mrf.mxu0 }
0x15e1   : > { %v5894_v35 = vsel %vm629_vm1, %v5891_v25, 0.0 }
0x15e2   : > { %5895 = vadd.xlane.f32.xlu0 %v5894_v35 }
0x15e6   : > { %v8853_v43 = vpop.f32.mrf.mxu0 }
0x15e7   : > { %v6091_v44 = vadd.f32 %v8853_v43, %v6018_v3 }
0x15e8   : > { %v6085_v51 = vpop.f32.mrf.mxu0 }
0x15e9   : > { %v6086_v45 = vadd.f32 %v6085_v51, %v6018_v3 }
0x15f8   : > { %6323 = vrot.lane.b32.xlu0 %v6091_v44, %s10697_s27 }
0x15fc   : > { %6335 = vrot.lane.b32.xlu0 %v6091_v44, %s10698_s26 }
0x1600   : > { %6327 = vrot.lane.b32.xlu0 %v6086_v45, %s10696_s4 }
0x166b   : > { %v5896_v11 = vpop.xlane.xlu0 %5895 }
0x166c   : > { %v5897_v10 = vmul.f32 0.03125, %v5896_v11 }
0x166e   : > { %v5898_v12 = vsub.f32 %v5891_v25, %v5897_v10 }
0x166f   : > { %v6324_v21 = vpop.permute.xlu0 %6323 }
0x1670   : > { %v5899_v36 = vmul.f32 %v5898_v12, %v5898_v12 }
0x1672   : > { %v5900_v18 = vsel %vm629_vm1, %v5899_v36, 0.0 }
0x1673   : > { %5901 = vadd.xlane.f32.xlu1 %v5900_v18  ;;  %v6336_v30 = vpop.permute.xlu0 %6335 }
0x1674   : > { %v6423_v24 = vcombine.low %v6324_v21, %v6336_v30  ;;  %v6424_v26 = vcombine.high %v6324_v21, %v6336_v30 }
0x1676   : > { %v6438_v38 = vrot.slane %v6424_v26, %v9499_v41 }
0x1677   : > { %v6328_v27 = vpop.permute.xlu0 %6327 }
0x1678   : > { %v6339_v50 = vcombine.low %v6086_v45, %v6328_v27  ;;  %v6340_v53 = vcombine.high %v6086_v45, %v6328_v27  ;;  %v5931_v27 = vld [vmem:[#allocation5 + $0x1d0] sm:$0xff] }
0x167a   : > { %v6347_v18 = vrot.slane %v6339_v50, %v9499_v41  ;;  %v6354_v39 = vrot.slane %v6340_v53, %v9499_v41 }
0x1684   : > { %6329 = vrot.lane.b32.xlu1 %v6091_v44, %s10696_s4 }
0x1688   : > { %6321 = vrot.lane.b32.xlu1 %v6086_v45, %s10697_s27 }
0x168c   : > { %6333 = vrot.lane.b32.xlu1 %v6086_v45, %s10698_s26 }
0x16fc   : > { %v5902_v8 = vpop.xlane.xlu1 %5901 }
0x16fd   : > { %v5903_v47 = vmul.f32 0.03125, %v5902_v8 }
0x16ff   : > { %v5904_v54 = vadd.f32 1e-05, %v5903_v47 }
0x1700   : > { %v6330_v14 = vpop.permute.xlu1 %6329 }
0x1701   : > { %9082 = vrsqrt.f32 %v5904_v54  ;;  %v6407_v7 = vcombine.low %v6091_v44, %v6330_v14  ;;  %v6408_v56 = vcombine.high %v6091_v44, %v6330_v14 }
0x1703   : > { %v6415_v61 = vrot.slane %v6407_v7, %v9499_v41  ;;  %v6422_v15 = vrot.slane %v6408_v56, %v9499_v41 }
0x1704   : > { %v6322_v49 = vpop.permute.xlu1 %6321 }
0x1705   : > { %v6455_v34 = vcombine.low %v6422_v15, %v6438_v38  ;;  %v6456_v35 = vcombine.high %v6422_v15, %v6438_v38 }
0x1707   : > { %v6470_v36 = vrot.slane %v6456_v35, %v9502_v48 }
0x1708   : > { %v6334_v31 = vpop.permute.xlu1 %6333 }
0x1709   : > { %v6355_v2 = vcombine.low %v6322_v49, %v6334_v31  ;;  %v6356_v5 = vcombine.high %v6322_v49, %v6334_v31  ;;  %v5930_v31 = vld [vmem:[#allocation5 + $0x1c8] sm:$0xff] }
0x170b   : > { %v6363_v40 = vrot.slane %v6355_v2, %v9499_v41  ;;  %v6370_v42 = vrot.slane %v6356_v5, %v9499_v41  ;;  %v9114_v5 = vld [vmem:[%s9662_s28 + $0x8] sm:$0xff]  ;;  %s10569_s28 = scalar_lea.vmem [#allocation8], %s8186_s5 }
0x170c   : > { %s8046_s7 = sshll.u32 %s10569_s28, 4  ;;  %s10596_s7 = int_to_ptr.vmem [resolvable:$true] %s8046_s7 }
0x170d   : > { %v6371_v51 = vcombine.low %v6347_v18, %v6363_v40  ;;  %v6372_v45 = vcombine.high %v6347_v18, %v6363_v40  ;;  %v6388_v8 = vcombine.high %v6354_v39, %v6370_v42  ;;  %s9167_s5 = scalar_lea.vmem %s10596_s7, 256  ;;  %p9174_p7 = scmp.lt.s32.totalorder %s10596_s7, %s9172_s29 }
0x170e   : > { %v9083_v60 = vpop.eup %9082  ;;  %p9168_p2 = scmp.ne.s32.totalorder %s10596_s7, %s9167_s5 }
0x170f   : > { %v5906_v62 = vmul.f32 %v9083_v60, %v5898_v12  ;;  %v6463_v12 = vrot.slane %v6455_v34, %v9502_v48  ;;  %v5929_v34 = vld [vmem:[#allocation5 + $0x1c0] sm:$0xff] }
0x1710   : > { %p9169_p5 = pnand %p9168_p2, %p9382_p1 }
0x1711   : > { %v5911_v6 = vmul.f32 %v5910_v59, %v5906_v62  ;;  %v6559_v43 = vcombine.low %v6463_v12, %v6470_v36  ;;  %v8293_v44 = vcombine.high %v6463_v12, %v6470_v36  ;;  %v6379_v62 = vrot.slane %v6371_v51, %v9502_v48 }
0x1712   : > { %v5941_v51 = vrot.slane %v10068_v1, %v9772_v29  ;;  %p9170_p6 = pneg %p9169_p5 }
0x1713   : > { %v5916_v9 = vadd.f32 %v5915_v63, %v5911_v6  ;;  %v6566_v59 = vrot.slane %v6559_v43, %v9499_v41  ;;  %v6574_v60 = vrot.slane %v8293_v44, %v9499_v41  ;;  %v6386_v63 = vrot.slane %v6372_v45, %v9502_v48 }
0x1715   : > { %v5917_v19 = vadd.f32 %v10050_v52, %v5916_v9  ;;  %v6431_v52 = vrot.slane %v6423_v24, %v9499_v41  ;;  %v6402_v9 = vrot.slane %v6388_v8, %v9502_v48  ;;  %v6475_v14 = vcombine.low %v6379_v62, %v6386_v63 }
0x1716   : > { %v8290_v21 = vcombine.high %v6379_v62, %v6386_v63  ;;  %v6591_v38 = vcombine.low %v6566_v59, %v6574_v60 }
0x1717   : > { %8841 = vmatmul.mubr.msk.f32.vlgmr.msra.gmra.mxu1 %vm629_vm1, %v5917_v19  ;;  %v6439_v23 = vcombine.low %v6415_v61, %v6431_v52  ;;  %v6440_v25 = vcombine.high %v6415_v61, %v6431_v52  ;;  %v6482_v30 = vrot.slane %v6475_v14, %v9499_v41 }
0x1718   : > { %8855 = vmatpush3.msra.mxu1 %v5932_v46  ;;  %8862 = vmatprep.mubr.msk.f32.mxu1 %vm629_vm1, %v9113_v20  ;;  %v6387_v46 = vcombine.low %v6354_v39, %v6370_v42  ;;  %v6592_v20 = vcombine.high %v6566_v59, %v6574_v60  ;;  %v6490_v49 = vrot.slane %v8290_v21, %v9499_v41 }
0x1719   : > { %v6447_v11 = vrot.slane %v6439_v23, %v9502_v48  ;;  %v6454_v10 = vrot.slane %v6440_v25, %v9502_v48  ;;  %8856 = vmatprep.subr.mxu1 %v5931_v27  ;;  %v6599_v50 = vrot.slane %v6591_v38, %v9502_v48 }
0x171a   : > { %v6395_v6 = vrot.slane %v6387_v46, %v9502_v48  ;;  %v6508_v24 = vcombine.high %v6482_v30, %v6490_v49  ;;  %8857 = vmatpush3.msra.mxu1 %v5931_v27  ;;  %v6507_v23 = vcombine.low %v6482_v30, %v6490_v49  ;;  %v6606_v36 = vrot.slane %v6592_v20, %v9502_v48 }
0x171b   : > { %v6543_v13 = vcombine.low %v6447_v11, %v6454_v10  ;;  %v8292_v3 = vcombine.high %v6447_v11, %v6454_v10  ;;  %8858 = vmatprep.subr.mxu1 %v5930_v31 }
0x171c   : > { %v6491_v7 = vcombine.low %v6395_v6, %v6402_v9  ;;  %v8291_v56 = vcombine.high %v6395_v6, %v6402_v9  ;;  %8859 = vmatpush3.msra.mxu1 %v5930_v31  ;;  %v6515_v11 = vrot.slane %v6507_v23, %v9502_v48  ;;  %v10298_v18 = vrot.slane %v6508_v24, %v9502_v48 }
0x171d   : > { %v6550_v47 = vrot.slane %v6543_v13, %v9499_v41  ;;  %v6558_v54 = vrot.slane %v8292_v3, %v9499_v41  ;;  %8860 = vmatprep.subr.mxu1 %v5929_v34 }
0x171e   : > { %v6498_v61 = vrot.slane %v6491_v7, %v9499_v41  ;;  %v6506_v15 = vrot.slane %v8291_v56, %v9499_v41  ;;  %8861 = vmatpush3.msra.mxu1 %v5929_v34 }
0x171f   : > { %v6576_v19 = vcombine.high %v6550_v47, %v6558_v54  ;;  %v6575_v52 = vcombine.low %v6550_v47, %v6558_v54  ;;  %8872 = vmatprep.subr.mxu1 %v9240_v0  ;;  %8863 = vmatmul.mubr.msk.f32.vlgmr.msra.gmra.mxu1 %vm629_vm1, %v9114_v5 }
0x1720   : > { %v6524_v26 = vcombine.high %v6498_v61, %v6506_v15  ;;  %v6523_v25 = vcombine.low %v6498_v61, %v6506_v15  ;;  %8876 = vmatprep.mubr.msk.f32.mxu1 %vm9241_vm0, %v9240_v0 }
0x1721   : > { %v6583_v35 = vrot.slane %v6575_v52, %v9502_v48  ;;  %v10292_v12 = vrot.slane %v6576_v19, %v9502_v48 }
0x1722   : > { %v6531_v10 = vrot.slane %v6523_v25, %v9502_v48  ;;  %v10301_v39 = vrot.slane %v6524_v26, %v9502_v48 }
0x1723   : > { %v6607_v53 = vcombine.low %v6583_v35, %v6599_v50  ;;  %v6608_v2 = vcombine.high %v6583_v35, %v6599_v50  ;;  %v6609_v13 = vcombine.low %v10292_v12, %v6606_v36  ;;  %v6610_v3 = vcombine.high %v10292_v12, %v6606_v36 }
0x1724   : > { %v6539_v40 = vcombine.low %v6515_v11, %v6531_v10  ;;  %v6540_v42 = vcombine.high %v6515_v11, %v6531_v10  ;;  %v6541_v43 = vcombine.low %v10298_v18, %v10301_v39  ;;  %v6542_v44 = vcombine.high %v10298_v18, %v10301_v39 }
0x1725   : > { %8866 = vmatpush3.xpose.msk.msra.mxu0 %vm1295_vm2, %v6607_v53  ;;  %8873 = vmatpush3.xpose.msk.msra.mxu1 %vm1295_vm2, %v6608_v2 }
0x1726   : > { %8867 = vmatprep.subr.mxu0 %v9240_v0  ;;  %8874 = vmatprep.subr.mxu1 %v9240_v0 }
0x1729   : > { %8868 = vmatpush3.xpose.msk.msra.mxu0 %vm1295_vm2, %v6539_v40  ;;  %8875 = vmatpush3.xpose.msk.msra.mxu1 %vm1295_vm2, %v6540_v42 }
0x172a   : > { %8879 = vmatprep.subr.mxu0 %v9240_v0  ;;  %8886 = vmatprep.subr.mxu1 %v9240_v0 }
0x17d7   : > { %v6011_v45 = vpop.f32.mrf.mxu1 }
0x17d8   : > { %v6012_v46 = vadd.f32 %v6011_v45, %v5941_v51 }
0x17d9   : > { %v8842_v8 = vpop.f32.mrf.mxu1 }
0x17da   : > { %6174 = vrot.lane.b32.xlu0 %v6012_v46, %s10697_s27  ;;  %6177 = vrot.lane.b32.xlu1 %v6012_v46, %s10696_s4 }
0x17de   : > { %6180 = vrot.lane.b32.xlu0 %v6012_v46, %s10698_s26 }
0x17df   : > { %v8864_v40 = vpop.f32.mrf.mxu1 }
0x17e1   : > { %v6164_v42 = vpop.f32.mrf.mxu1 }
0x184c   : > { %v6175_v47 = vpop.permute.xlu0 %6174  ;;  %v6178_v54 = vpop.permute.xlu1 %6177 }
0x184d   : > { %v6183_v59 = vcombine.low %v6012_v46, %v6178_v54  ;;  %v6184_v60 = vcombine.high %v6012_v46, %v6178_v54 }
0x184f   : > { %v6191_v9 = vrot.slane %v6183_v59, %v9499_v41  ;;  %v6198_v1 = vrot.slane %v6184_v60, %v9499_v41 }
0x1850   : > { %v6181_v62 = vpop.permute.xlu0 %6180 }
0x1851   : > { %v6199_v63 = vcombine.low %v6175_v47, %v6181_v62  ;;  %v6200_v6 = vcombine.high %v6175_v47, %v6181_v62 }
0x1853   : > { %v6207_v19 = vrot.slane %v6199_v63, %v9499_v41  ;;  %v6214_v20 = vrot.slane %v6200_v6, %v9499_v41 }
0x1855   : > { %v6215_v14 = vcombine.low %v6191_v9, %v6207_v19  ;;  %v6216_v21 = vcombine.high %v6191_v9, %v6207_v19  ;;  %v6231_v7 = vcombine.low %v6198_v1, %v6214_v20  ;;  %v6232_v56 = vcombine.high %v6198_v1, %v6214_v20 }
0x1857   : > { %v6223_v30 = vrot.slane %v6215_v14, %v9502_v48  ;;  %v6230_v49 = vrot.slane %v6216_v21, %v9502_v48  ;;  %v6239_v61 = vrot.slane %v6231_v7, %v9502_v48  ;;  %v6246_v15 = vrot.slane %v6232_v56, %v9502_v48  ;;  %v10367_v21 = vld [vmem:[%s10651_s9 + $0x8] sm:$0xff] }
0x1858   : > { %v6097_v7 = vrot.slane %v10367_v21, %v2383_v57 }
0x1859   : > { %v6251_v24 = vcombine.low %v6223_v30, %v6230_v49  ;;  %v8288_v26 = vcombine.high %v6223_v30, %v6230_v49  ;;  %v6267_v52 = vcombine.low %v6239_v61, %v6246_v15  ;;  %v8289_v38 = vcombine.high %v6239_v61, %v6246_v15 }
0x185a   : > { %v6170_v56 = vadd.f32 %v8864_v40, %v6097_v7 }
0x185b   : > { %v6258_v27 = vrot.slane %v6251_v24, %v9499_v41  ;;  %v6266_v31 = vrot.slane %v8288_v26, %v9499_v41  ;;  %v6274_v23 = vrot.slane %v6267_v52, %v9499_v41  ;;  %v6282_v25 = vrot.slane %v8289_v38, %v9499_v41 }
0x185d   : > { %v6283_v34 = vcombine.low %v6258_v27, %v6266_v31  ;;  %v6299_v35 = vcombine.low %v6274_v23, %v6282_v25  ;;  %v6284_v2 = vcombine.high %v6258_v27, %v6266_v31  ;;  %v6300_v5 = vcombine.high %v6274_v23, %v6282_v25 }
0x185f   : > { %v6291_v50 = vrot.slane %v6283_v34, %v9502_v48  ;;  %v6307_v53 = vrot.slane %v6299_v35, %v9502_v48  ;;  %v6298_v12 = vrot.slane %v6284_v2, %v9502_v48  ;;  %v6314_v36 = vrot.slane %v6300_v5, %v9502_v48 }
0x1861   : > { %v6315_v11 = vcombine.low %v6291_v50, %v6307_v53  ;;  %v6316_v10 = vcombine.high %v6291_v50, %v6307_v53  ;;  %v6317_v18 = vcombine.low %v6298_v12, %v6314_v36  ;;  %v6318_v39 = vcombine.high %v6298_v12, %v6314_v36 }
0x1863   : > { %8870 = vmatmul.mubr.msk.f32.vlgmr.msra.gmra.mxu0 %vm1295_vm2, %v6315_v11  ;;  %8877 = vmatmul.mubr.msk.f32.vlgmr.msra.gmra.mxu1 %vm1295_vm2, %v6316_v10 }
0x1864   : > { %8880 = vmatpush3.xpose.msk.msra.mxu0 %vm1295_vm2, %v6609_v13  ;;  %8887 = vmatpush3.xpose.msk.msra.mxu1 %vm1295_vm2, %v6610_v3 }
0x1865   : > { %8881 = vmatprep.subr.mxu0 %v9240_v0  ;;  %8888 = vmatprep.subr.mxu1 %v9240_v0 }
0x1866   : > { %8883 = vmatprep.mubr.msk.f32.mxu0 %vm9241_vm0, %v9240_v0  ;;  %8890 = vmatprep.mubr.msk.f32.mxu1 %vm9241_vm0, %v9240_v0 }
0x1868   : > { %8882 = vmatpush3.xpose.msk.msra.mxu0 %vm1295_vm2, %v6541_v43  ;;  %8889 = vmatpush3.xpose.msk.msra.mxu1 %vm1295_vm2, %v6542_v44 }
0x1869   : > { %8893 = vmatprep.subr.mxu0 %v9240_v0  ;;  %8900 = vmatprep.subr.mxu1 %v9240_v0 }
0x186b   : > { %8884 = vmatmul.mubr.msk.f32.vlgmr.msra.gmra.mxu0 %vm1295_vm2, %v6317_v18  ;;  %8891 = vmatmul.mubr.msk.f32.vlgmr.msra.gmra.mxu1 %vm1295_vm2, %v6318_v39 }
0x186c   : > { %8897 = vmatprep.mubr.msk.f32.mxu0 %vm9241_vm0, %v9240_v0  ;;  %8904 = vmatprep.mubr.msk.f32.mxu1 %vm9241_vm0, %v9240_v0 }
0x1923   : > { %v6978_v13 = vpop.f32.mrf.mxu0  ;;  %v7057_v3 = vpop.f32.mrf.mxu1 }
0x1924   : > { %v7219_v43 = vmul.f32 0.35355338, %v6978_v13  ;;  %v7220_v44 = vmul.f32 0.35355338, %v7057_v3 }
0x1925   : > { %v8871_v51 = vpop.f32.mrf.mxu0  ;;  %v8878_v45 = vpop.f32.mrf.mxu1 }
0x1926   : > { %v7224_v46 = vadd.f32 %v7220_v44, %v9823_v33  ;;  %v7223_v8 = vadd.f32 %v7219_v43, %v9823_v33 }
0x1928   : > { %v7230_v47 = vsel %vm2093_vm4, %v7224_v46, -inf  ;;  %v7227_v54 = vsel %vm2093_vm4, %v7223_v8, -inf }
0x1929   : > { %7231 = vmax.xlane.f32.xlu0 %v7230_v47  ;;  %7228 = vmax.xlane.f32.xlu1 %v7227_v54 }
0x192b   : > { %v7136_v59 = vpop.f32.mrf.mxu0  ;;  %v7215_v60 = vpop.f32.mrf.mxu1 }
0x192c   : > { %v7221_v62 = vmul.f32 0.35355338, %v7136_v59  ;;  %v7222_v63 = vmul.f32 0.35355338, %v7215_v60 }
0x192d   : > { %v8885_v6 = vpop.f32.mrf.mxu0  ;;  %v8892_v9 = vpop.f32.mrf.mxu1 }
0x192e   : > { %v7226_v1 = vadd.f32 %v7222_v63, %v9823_v33  ;;  %v7225_v19 = vadd.f32 %v7221_v62, %v9823_v33  ;;  %v10375_v33 = vadd.f32 %v6164_v42, %v6097_v7 }
0x1930   : > { %v7236_v20 = vsel %vm2093_vm4, %v7226_v1, -inf  ;;  %v7233_v14 = vsel %vm2093_vm4, %v7225_v19, -inf }
0x1931   : > { %7237 = vmax.xlane.f32.xlu1 %v7236_v20  ;;  %7234 = vmax.xlane.f32.xlu0 %v7233_v14 }
0x1942   : > { %6621 = vrot.lane.b32.xlu1 %v6170_v56, %s10696_s4 }
0x1946   : > { %6627 = vrot.lane.b32.xlu1 %v6170_v56, %s10698_s26 }
0x1947   : > { %6615 = vrot.lane.b32.xlu0 %v6170_v56, %s10697_s27 }
0x194b   : > { %6613 = vrot.lane.b32.xlu0 %v10375_v33, %s10697_s27 }
0x19b2   : > { %v7232_v30 = vpop.xlane.xlu0 %7231  ;;  %v7229_v49 = vpop.xlane.xlu1 %7228 }
0x19b3   : > { %v7240_v61 = vsub.f32 %v7224_v46, %v7232_v30  ;;  %v7239_v15 = vsub.f32 %v7223_v8, %v7229_v49 }
0x19b5   : > { %v7245_v24 = vmul.f32 1.442695, %v7240_v61  ;;  %v7243_v26 = vmul.f32 1.442695, %v7239_v15 }
0x19b7   : > { %9084 = vpow2.f32 %v7245_v24 }
0x19b8   : > { %9086 = vpow2.f32 %v7243_v26 }
0x19ba   : > { %v7238_v57 = vpop.xlane.xlu1 %7237  ;;  %v7235_v52 = vpop.xlane.xlu0 %7234 }
0x19bb   : > { %v7242_v38 = vsub.f32 %v7226_v1, %v7238_v57  ;;  %v7241_v27 = vsub.f32 %v7225_v19, %v7235_v52 }
0x19bd   : > { %v7249_v31 = vmul.f32 1.442695, %v7242_v38  ;;  %v7247_v23 = vmul.f32 1.442695, %v7241_v27 }
0x19be   : > { %v6622_v25 = vpop.permute.xlu1 %6621  ;;  %v6616_v50 = vpop.permute.xlu0 %6615 }
0x19bf   : > { %9088 = vpow2.f32 %v7249_v31  ;;  %v6699_v34 = vcombine.low %v6170_v56, %v6622_v25  ;;  %v6700_v35 = vcombine.high %v6170_v56, %v6622_v25 }
0x19c0   : > { %9090 = vpow2.f32 %v7247_v23 }
0x19c1   : > { %v6707_v10 = vrot.slane %v6699_v34, %v9499_v41  ;;  %v6714_v36 = vrot.slane %v6700_v35, %v9499_v41 }
0x19c2   : > { %v6628_v53 = vpop.permute.xlu1 %6627  ;;  %v6614_v31 = vpop.permute.xlu0 %6613 }
0x19c3   : > { %v6715_v2 = vcombine.low %v6616_v50, %v6628_v53  ;;  %v6716_v5 = vcombine.high %v6616_v50, %v6628_v53 }
0x19c4   : > { %v10379_v11 = vpop.eup %9084 }
0x19c5   : > { %v10382_v12 = vpop.eup %9086  ;;  %v6723_v18 = vrot.slane %v6715_v2, %v9499_v41  ;;  %v6730_v39 = vrot.slane %v6716_v5, %v9499_v41  ;;  %v7254_v40 = vsel %vm2093_vm4, %v10379_v11, 0.0 }
0x19c6   : > { %7255 = vadd.xlane.f32.xlu1 %v7254_v40  ;;  %v7251_v42 = vsel %vm2093_vm4, %v10382_v12, 0.0 }
0x19c7   : > { %v6731_v13 = vcombine.low %v6707_v10, %v6723_v18  ;;  %v6732_v3 = vcombine.high %v6707_v10, %v6723_v18  ;;  %v6747_v43 = vcombine.low %v6714_v36, %v6730_v39  ;;  %v6748_v44 = vcombine.high %v6714_v36, %v6730_v39  ;;  %7252 = vadd.xlane.f32.xlu0 %v7251_v42 }
0x19c9   : > { %v6739_v51 = vrot.slane %v6731_v13, %v9502_v48  ;;  %v6746_v45 = vrot.slane %v6732_v3, %v9502_v48  ;;  %v6755_v46 = vrot.slane %v6747_v43, %v9502_v48  ;;  %v6762_v8 = vrot.slane %v6748_v44, %v9502_v48 }
0x19cb   : > { %v6835_v47 = vcombine.low %v6739_v51, %v6746_v45  ;;  %v8296_v54 = vcombine.high %v6739_v51, %v6746_v45  ;;  %v6851_v59 = vcombine.low %v6755_v46, %v6762_v8  ;;  %v8297_v60 = vcombine.high %v6755_v46, %v6762_v8 }
0x19cc   : > { %v10395_v62 = vpop.eup %9088 }
0x19cd   : > { %v10397_v63 = vpop.eup %9090  ;;  %v6842_v6 = vrot.slane %v6835_v47, %v9499_v41  ;;  %v6850_v9 = vrot.slane %v8296_v54, %v9499_v41  ;;  %v6858_v1 = vrot.slane %v6851_v59, %v9499_v41  ;;  %v6866_v19 = vrot.slane %v8297_v60, %v9499_v41 }
0x19ce   : > { %v7260_v20 = vsel %vm2093_vm4, %v10395_v62, 0.0  ;;  %v7257_v14 = vsel %vm2093_vm4, %v10397_v63, 0.0 }
0x19cf   : > { %7261 = vadd.xlane.f32.xlu1 %v7260_v20  ;;  %7258 = vadd.xlane.f32.xlu0 %v7257_v14  ;;  %v6867_v7 = vcombine.low %v6842_v6, %v6850_v9  ;;  %v6883_v56 = vcombine.low %v6858_v1, %v6866_v19  ;;  %v6868_v30 = vcombine.high %v6842_v6, %v6850_v9 }
0x19d0   : > { %v6884_v49 = vcombine.high %v6858_v1, %v6866_v19 }
0x19d1   : > { %v6875_v61 = vrot.slane %v6867_v7, %v9502_v48  ;;  %v6891_v15 = vrot.slane %v6883_v56, %v9502_v48  ;;  %v10410_v24 = vrot.slane %v6868_v30, %v9502_v48 }
0x19d2   : > { %v10413_v26 = vrot.slane %v6884_v49, %v9502_v48 }
0x19d3   : > { %v6899_v57 = vcombine.low %v6875_v61, %v6891_v15  ;;  %v6900_v52 = vcombine.high %v6875_v61, %v6891_v15 }
0x19d4   : > { %v6901_v38 = vcombine.low %v10410_v24, %v10413_v26  ;;  %v6902_v27 = vcombine.high %v10410_v24, %v10413_v26 }
0x19d5   : > { %8894 = vmatpush3.msra.mxu0 %v6899_v57  ;;  %8901 = vmatpush3.msra.mxu1 %v6900_v52 }
0x19d6   : > { %8895 = vmatprep.subr.mxu0 %v9240_v0  ;;  %8902 = vmatprep.subr.mxu1 %v9240_v0 }
0x19e0   : > { %6619 = vrot.lane.b32.xlu1 %v10375_v33, %s10696_s4  ;;  %s9173_s4 = scalar_lea.vmem %s9172_s29, 512 }
0x19e1   : > { %p9175_p8 = scmp.lt.s32.totalorder %s9173_s4, %s9167_s5 }
0x19e3   : > { %p9176_p9 = por %p9175_p8, %p9174_p7 }
0x19e5   : > { %6625 = vrot.lane.b32.xlu0 %v10375_v33, %s10698_s26  ;;  %p9177_p10 = pnand %p9176_p9, %p9170_p6 }
0x1a4f   : > { %v7256_v23 = vpop.xlane.xlu1 %7255 }
0x1a50   : > { %v7253_v25 = vpop.xlane.xlu0 %7252  ;;  %9092 = vrcp.f32 %v7256_v23 }
0x1a51   : > { %9094 = vrcp.f32 %v7253_v25 }
0x1a58   : > { %v7262_v34 = vpop.xlane.xlu1 %7261  ;;  %v7259_v35 = vpop.xlane.xlu0 %7258 }
0x1a59   : > { %9096 = vrcp.f32 %v7262_v34 }
0x1a5a   : > { %9098 = vrcp.f32 %v7259_v35 }
0x1a5c   : > { %v6620_v50 = vpop.permute.xlu1 %6619  ;;  %v6626_v53 = vpop.permute.xlu0 %6625 }
0x1a5d   : > { %v6631_v2 = vcombine.low %v10375_v33, %v6620_v50  ;;  %v6632_v5 = vcombine.high %v10375_v33, %v6620_v50  ;;  %v6647_v10 = vcombine.low %v6614_v31, %v6626_v53  ;;  %v6648_v36 = vcombine.high %v6614_v31, %v6626_v53  ;;  %v9093_v19 = vpop.eup %9092 }
0x1a5e   : > { %v9095_v30 = vpop.eup %9094  ;;  %v7268_v31 = vmul.f32 %v9093_v19, %v10379_v11 }
0x1a5f   : > { %v6639_v18 = vrot.slane %v6631_v2, %v9499_v41  ;;  %v6646_v39 = vrot.slane %v6632_v5, %v9499_v41  ;;  %v6655_v40 = vrot.slane %v6647_v10, %v9499_v41  ;;  %v6662_v42 = vrot.slane %v6648_v36, %v9499_v41 }
0x1a60   : > { %v7267_v52 = vmul.f32 %v9095_v30, %v10382_v12 }
0x1a61   : > { %v6663_v13 = vcombine.low %v6639_v18, %v6655_v40  ;;  %v6664_v3 = vcombine.high %v6639_v18, %v6655_v40  ;;  %v6679_v43 = vcombine.low %v6646_v39, %v6662_v42  ;;  %v6680_v44 = vcombine.high %v6646_v39, %v6662_v42 }
0x1a63   : > { %v6671_v51 = vrot.slane %v6663_v13, %v9502_v48  ;;  %v6678_v33 = vrot.slane %v6664_v3, %v9502_v48  ;;  %v6687_v45 = vrot.slane %v6679_v43, %v9502_v48  ;;  %v6694_v46 = vrot.slane %v6680_v44, %v9502_v48 }
0x1a65   : > { %v6767_v8 = vcombine.low %v6671_v51, %v6678_v33  ;;  %v8294_v47 = vcombine.high %v6671_v51, %v6678_v33  ;;  %v6783_v54 = vcombine.low %v6687_v45, %v6694_v46  ;;  %v8295_v59 = vcombine.high %v6687_v45, %v6694_v46  ;;  %v5936_v46 = vld [vmem:[#allocation5 + $0x1f0] sm:$0xff] }
0x1a66   : > { %v9097_v34 = vpop.eup %9096 }
0x1a67   : > { %v6774_v60 = vrot.slane %v6767_v8, %v9499_v41  ;;  %v6782_v6 = vrot.slane %v8294_v47, %v9499_v41  ;;  %v6790_v9 = vrot.slane %v6783_v54, %v9499_v41  ;;  %v6798_v1 = vrot.slane %v8295_v59, %v9499_v41  ;;  %v9099_v35 = vpop.eup %9098  ;;  %v5935_v8 = vld [vmem:[#allocation5 + $0x1e8] sm:$0xff] }
0x1a68   : > { %v7269_v50 = vmul.f32 %v9099_v35, %v10397_v63  ;;  %v7270_v53 = vmul.f32 %v9097_v34, %v10395_v62  ;;  %v5937_v63 = vld [vmem:[#allocation5 + $0x1f8] sm:$0xff] }
0x1a69   : > { %v6799_v20 = vcombine.low %v6774_v60, %v6782_v6  ;;  %v6815_v14 = vcombine.low %v6790_v9, %v6798_v1  ;;  %v6800_v7 = vcombine.high %v6774_v60, %v6782_v6  ;;  %v6816_v56 = vcombine.high %v6790_v9, %v6798_v1 }
0x1a6b   : > { %v6807_v49 = vrot.slane %v6799_v20, %v9502_v48  ;;  %v6823_v61 = vrot.slane %v6815_v14, %v9502_v48  ;;  %v6814_v23 = vrot.slane %v6800_v7, %v9502_v48  ;;  %v6830_v25 = vrot.slane %v6816_v56, %v9502_v48  ;;  %v5934_v20 = vld [vmem:[#allocation5 + $0x1e0] sm:$0xff] }
0x1a6d   : > { %v6831_v15 = vcombine.low %v6807_v49, %v6823_v61  ;;  %v6832_v57 = vcombine.high %v6807_v49, %v6823_v61  ;;  %v6833_v11 = vcombine.low %v6814_v23, %v6830_v25  ;;  %v6834_v12 = vcombine.high %v6814_v23, %v6830_v25 }
0x1a6f   : > { %8896 = vmatpush3.msra.mxu0 %v6831_v15  ;;  %8903 = vmatpush3.msra.mxu1 %v6832_v57 }
0x1a70   : > { %8898 = vmatmul.mubr.msk.f32.vlgmr.msra.gmra.mxu0 %vm2093_vm4, %v7267_v52  ;;  %8905 = vmatmul.mubr.msk.f32.vlgmr.msra.gmra.mxu1 %vm2093_vm4, %v7268_v31 }
0x1a71   : > { %8907 = vmatprep.subr.mxu0 %v9240_v0  ;;  %8914 = vmatprep.subr.mxu1 %v9240_v0 }
0x1a72   : > { %8908 = vmatpush3.msra.mxu0 %v6901_v38  ;;  %8915 = vmatpush3.msra.mxu1 %v6902_v27 }
0x1a73   : > { %8909 = vmatprep.subr.mxu0 %v9240_v0  ;;  %8916 = vmatprep.subr.mxu1 %v9240_v0 }
0x1a74   : > { %8910 = vmatpush3.msra.mxu0 %v6833_v11  ;;  %8911 = vmatprep.mubr.msk.f32.mxu0 %vm9241_vm0, %v9240_v0 }
0x1a75   : > { %8917 = vmatpush3.msra.mxu1 %v6834_v12  ;;  %8918 = vmatprep.mubr.msk.f32.mxu1 %vm9241_vm0, %v9240_v0 }
0x1a76   : > { %8912 = vmatmul.mubr.msk.f32.vlgmr.msra.gmra.mxu0 %vm2093_vm4, %v7269_v50  ;;  %8919 = vmatmul.mubr.msk.f32.vlgmr.msra.gmra.mxu1 %vm2093_vm4, %v7270_v53 }
0x1a77   : > { %8921 = vmatprep.subr.mxu0 %v9240_v0  ;;  %8929 = vmatprep.mubr.msk.f32.mxu0 %vm9241_vm0, %v9240_v0 }
0x1a78   : > { %8932 = vmatprep.subr.mxu1 %v9240_v0  ;;  %8940 = vmatprep.mubr.msk.f32.mxu1 %vm9241_vm0, %v9240_v0 }
0x1a79   : > { %8922 = vmatpush3.msra.mxu0 %v5937_v63 }
0x1a7a   : > { %8923 = vmatprep.subr.mxu0 %v9240_v0 }
0x1a7b   : > { %8924 = vmatpush3.msra.mxu0 %v5936_v46 }
0x1a7c   : > { %8925 = vmatprep.subr.mxu0 %v9240_v0 }
0x1a7d   : > { %8926 = vmatpush3.msra.mxu0 %v5935_v8 }
0x1a7e   : > { %8927 = vmatprep.subr.mxu0 %v9240_v0 }
0x1a7f   : > { %8928 = vmatpush3.msra.mxu0 %v5934_v20  ;;  %v8325_v20 = vld [vmem:[%s10654_s12 + $0x48] sm:$0xff] }
0x1a80   : > { %8943 = vmatprep.subr.mxu0 %v9240_v0 }
0x1b30   : > { %v7340_v62 = vpop.f32.mrf.mxu0  ;;  %v7413_v24 = vpop.f32.mrf.mxu1 }
0x1b32   : > { %v8899_v26 = vpop.f32.mrf.mxu0  ;;  %v8906_v38 = vpop.f32.mrf.mxu1 }
0x1b36   : > { %v7486_v27 = vpop.f32.mrf.mxu0  ;;  %v7559_v2 = vpop.f32.mrf.mxu1 }
0x1b37   : > { %v7563_v5 = vcombine.low %v7340_v62, %v7486_v27  ;;  %v7564_v10 = vcombine.high %v7340_v62, %v7486_v27  ;;  %v7579_v36 = vcombine.low %v7413_v24, %v7559_v2  ;;  %v7580_v18 = vcombine.high %v7413_v24, %v7559_v2 }
0x1b38   : > { %v8913_v39 = vpop.f32.mrf.mxu0  ;;  %v8920_v40 = vpop.f32.mrf.mxu1 }
0x1b39   : > { %v7571_v42 = vrot.slane %v7563_v5, %v9499_v41  ;;  %v7578_v13 = vrot.slane %v7564_v10, %v9499_v41  ;;  %v7587_v3 = vrot.slane %v7579_v36, %v9499_v41  ;;  %v7594_v43 = vrot.slane %v7580_v18, %v9499_v41 }
0x1b3b   : > { %v7595_v44 = vcombine.low %v7571_v42, %v7587_v3  ;;  %v7596_v51 = vcombine.high %v7571_v42, %v7587_v3  ;;  %v7611_v33 = vcombine.low %v7578_v13, %v7594_v43  ;;  %v7612_v45 = vcombine.high %v7578_v13, %v7594_v43  ;;  %v8318_v42 = vld [vmem:[%s10652_s10 + $0x28] sm:$0xff]  ;;  %v8317_v13 = vld [vmem:[%s10652_s10 + $0x20] sm:$0xff] }
0x1b3d   : > { %v7603_v47 = vrot.slane %v7595_v44, %v9502_v48  ;;  %v7610_v54 = vrot.slane %v7596_v51, %v9502_v48  ;;  %v7619_v59 = vrot.slane %v7611_v33, %v9502_v48  ;;  %v7626_v60 = vrot.slane %v7612_v45, %v9502_v48 }
0x1b3f   : > { %v7631_v6 = vcombine.low %v7603_v47, %v7610_v54  ;;  %v8314_v9 = vcombine.high %v7603_v47, %v7610_v54  ;;  %v7647_v1 = vcombine.low %v7619_v59, %v7626_v60  ;;  %v8315_v19 = vcombine.high %v7619_v59, %v7626_v60 }
0x1b40   : > { %v7808_v47 = vrot.slane %v10248_v58, %v9575_v32  ;;  %v7813_v60 = vrot.slane %v10248_v58, %v9653_v55  ;;  %v8329_v32 = vld [vmem:[%s10654_s12 + $0x68] sm:$0xff]  ;;  %v8328_v55 = vld [vmem:[%s10654_s12 + $0x60] sm:$0xff]  ;;  %v8327_v58 = vld [vmem:[%s10654_s12 + $0x58] sm:$0xff] }
0x1b41   : > { %v7638_v14 = vrot.slane %v7631_v6, %v9499_v41  ;;  %v7646_v7 = vrot.slane %v8314_v9, %v9499_v41  ;;  %v7654_v56 = vrot.slane %v7647_v1, %v9499_v41  ;;  %v7662_v30 = vrot.slane %v8315_v19, %v9499_v41  ;;  %v8330_v1 = vld [vmem:[%s10654_s12 + $0x70] sm:$0xff] }
0x1b42   : > { %v8326_v19 = vld [vmem:[%s10654_s12 + $0x50] sm:$0xff] }
0x1b43   : > { %v7664_v49 = vcombine.high %v7638_v14, %v7646_v7  ;;  %v7680_v61 = vcombine.high %v7654_v56, %v7662_v30  ;;  %v7663_v15 = vcombine.low %v7638_v14, %v7646_v7  ;;  %v7679_v57 = vcombine.low %v7654_v56, %v7662_v30  ;;  %v8324_v14 = vld [vmem:[%s10654_s12 + $0x40] sm:$0xff] }
0x1b45   : > { %v7678_v52 = vrot.slane %v7664_v49, %v9502_v48  ;;  %v7694_v31 = vrot.slane %v7680_v61, %v9502_v48  ;;  %v7671_v23 = vrot.slane %v7663_v15, %v9502_v48  ;;  %v7687_v25 = vrot.slane %v7679_v57, %v9502_v48  ;;  %v602_v49 = vld [vmem:[%s10657_s15] sm:$0x3] }
0x1b46   : > { %v7717_v48 = vrot.slane %v10367_v21, %v4009_v37  ;;  %v8320_v37 = vld [vmem:[%s10652_s10 + $0x38] sm:$0xff]  ;;  %v8319_v21 = vld [vmem:[%s10652_s10 + $0x30] sm:$0xff]  ;;  %v4322_v61 = vrot.slane %v602_v49, %v9466_v17  ;;  %v4327_v57 = vrot.slane %v602_v49, %v9478_v22  ;;  %v8333_v22 = vld [vmem:[%s10655_s13 + $0x1] ss:$0 sm:$0xff] }
0x1b47   : > { %v7697_v34 = vcombine.low %v7678_v52, %v7694_v31  ;;  %v7696_v35 = vcombine.high %v7671_v23, %v7687_v25  ;;  %v7695_v11 = vcombine.low %v7671_v23, %v7687_v25  ;;  %v7698_v41 = vcombine.high %v7678_v52, %v7694_v31  ;;  %8933 = vmatpush3.msra.mxu1 %v8320_v37  ;;  %v8322_v23 = vld [vmem:[%s10702_s6 + $0x1] ss:$0 sm:$0xff] }
0x1b48   : > { %8934 = vmatprep.subr.mxu1 %v9240_v0 }
0x1b49   : > { %7704 = vrot.lane.b32.xlu0 %v7697_v34, %s10699_s2  ;;  %7700 = vrot.lane.b32.xlu1 %v7696_v35, %s10700_s3 }
0x1b4a   : > { %8935 = vmatpush3.msra.mxu1 %v8319_v21 }
0x1b4b   : > { %8936 = vmatprep.subr.mxu1 %v9240_v0 }
0x1b4c   : > { %8937 = vmatpush3.msra.mxu1 %v8318_v42 }
0x1b4d   : > { %7708 = vrot.lane.b32.xlu1 %v7698_v41, %s10701_s21  ;;  %8938 = vmatprep.subr.mxu1 %v9240_v0 }
0x1b4e   : > { %8939 = vmatpush3.msra.mxu1 %v8317_v13 }
0x1bbb   : > { %v7701_v12 = vpop.permute.xlu1 %7700  ;;  %v7705_v50 = vpop.permute.xlu0 %7704 }
0x1bbc   : > { %v7711_v53 = vsel %vm1295_vm2, %v7695_v11, %v7701_v12 }
0x1bbd   : > { %v7712_v62 = vsel %vm2093_vm4, %v7711_v53, %v7705_v50 }
0x1bbf   : > { %v7709_v63 = vpop.permute.xlu1 %7708 }
0x1bc0   : > { %v7713_v24 = vsel %vm2095_vm5, %v7712_v62, %v7709_v63 }
0x1bc1   : > { %8930 = vmatmul.mubr.msk.f32.vlgmr.msra.gmra.mxu0 %vm629_vm1, %v7713_v24 }
0x1bc2   : > { %8959 = vmatprep.mubr.msk.f32.mxu0 %vm9241_vm0, %v9240_v0 }
0x1c81   : > { %v7787_v26 = vpop.f32.mrf.mxu0 }
0x1c82   : > { %v7788_v38 = vadd.f32 %v7787_v26, %v7717_v48 }
0x1c83   : > { %v8931_v27 = vpop.f32.mrf.mxu0 }
0x1c84   : > { %v7791_v2 = vadd.f32 %v7788_v38, %v10047_v4 }
0x1c86   : > { %v7792_v5 = vsel %vm629_vm1, %v7791_v2, 0.0 }
0x1c87   : > { %7793 = vadd.xlane.f32.xlu0 %v7792_v5  ;;  %v9116_v5 = vld [vmem:[%s10656_s14 + $0x8] sm:$0x3f] }
0x1d10   : > { %v7794_v10 = vpop.xlane.xlu0 %7793 }
0x1d11   : > { %v7795_v36 = vmul.f32 0.03125, %v7794_v10  ;;  %v8009_v10 = vrot.slane %v9116_v5, %v9772_v29 }
0x1d13   : > { %v7796_v18 = vsub.f32 %v7791_v2, %v7795_v36 }
0x1d15   : > { %v7797_v39 = vmul.f32 %v7796_v18, %v7796_v18 }
0x1d17   : > { %v7798_v40 = vsel %vm629_vm1, %v7797_v39, 0.0  ;;  %v8014_v39 = vrot.slane %v9116_v5, %v9691_v28 }
0x1d18   : > { %7799 = vadd.xlane.f32.xlu1 %v7798_v40 }
0x1d1c   : > { %4307 = vadd.xlane.f32.xlu1 %v4306_v16 }
0x1da1   : > { %v7800_v3 = vpop.xlane.xlu1 %7799 }
0x1da2   : > { %v7801_v43 = vmul.f32 0.03125, %v7800_v3 }
0x1da4   : > { %v7802_v44 = vadd.f32 1e-05, %v7801_v43 }
0x1da5   : > { %v4308_v51 = vpop.xlane.xlu1 %4307 }
0x1da6   : > { %9100 = vrsqrt.f32 %v7802_v44  ;;  %v4309_v33 = vmul.f32 0.03125, %v4308_v51 }
0x1da8   : > { %v4310_v45 = vsub.f32 %v10047_v4, %v4309_v33  ;;  %v8331_v4 = vld [vmem:[%s10654_s12 + $0x78] sm:$0xff] }
0x1da9   : > { %8944 = vmatpush3.msra.mxu0 %v8331_v4 }
0x1daa   : > { %v4311_v46 = vmul.f32 %v4310_v45, %v4310_v45  ;;  %8945 = vmatprep.subr.mxu0 %v9240_v0 }
0x1dab   : > { %8946 = vmatpush3.msra.mxu0 %v8330_v1 }
0x1dac   : > { %v4312_v8 = vsel %vm629_vm1, %v4311_v46, 0.0  ;;  %8947 = vmatprep.subr.mxu0 %v9240_v0 }
0x1dad   : > { %4313 = vadd.xlane.f32.xlu1 %v4312_v8  ;;  %8948 = vmatpush3.msra.mxu0 %v8329_v32 }
0x1dae   : > { %8949 = vmatprep.subr.mxu0 %v9240_v0 }
0x1daf   : > { %8950 = vmatpush3.msra.mxu0 %v8328_v55 }
0x1db0   : > { %8951 = vmatprep.subr.mxu0 %v9240_v0 }
0x1db1   : > { %8952 = vmatpush3.msra.mxu0 %v8327_v58 }
0x1db2   : > { %8953 = vmatprep.subr.mxu0 %v9240_v0 }
0x1db3   : > { %v9101_v54 = vpop.eup %9100  ;;  %8954 = vmatpush3.msra.mxu0 %v8326_v19 }
0x1db4   : > { %v7804_v59 = vmul.f32 %v9101_v54, %v7796_v18  ;;  %8955 = vmatprep.subr.mxu0 %v9240_v0 }
0x1db5   : > { %8956 = vmatpush3.msra.mxu0 %v8325_v20 }
0x1db6   : > { %v7809_v6 = vmul.f32 %v7808_v47, %v7804_v59  ;;  %8957 = vmatprep.subr.mxu0 %v9240_v0 }
0x1db7   : > { %8958 = vmatpush3.msra.mxu0 %v8324_v14 }
0x1db8   : > { %v7814_v9 = vadd.f32 %v7813_v60, %v7809_v6 }
0x1dba   : > { %8941 = vmatmul.mubr.msk.f32.vlgmr.msra.gmra.mxu1 %vm629_vm1, %v7814_v9 }
0x1e36   : > { %v4314_v7 = vpop.xlane.xlu1 %4313 }
0x1e37   : > { %v4315_v56 = vmul.f32 0.03125, %v4314_v7 }
0x1e39   : > { %v4316_v30 = vadd.f32 1e-05, %v4315_v56 }
0x1e3b   : > { %9102 = vrsqrt.f32 %v4316_v30 }
0x1e48   : > { %v9103_v15 = vpop.eup %9102 }
0x1e49   : > { %v4318_v0 = vmul.f32 %v9103_v15, %v4310_v45 }
0x1e4b   : > { %v4323_v52 = vmul.f32 %v4322_v61, %v4318_v0 }
0x1e4d   : > { %v4328_v31 = vadd.f32 %v4327_v57, %v4323_v52 }
0x1e4f   : > { %4329 = vst.msk [vmem:[%s10569_s28] sm:$0xff] %vm629_vm1, %v4328_v31 }
0x1e7a   : > { %v7897_v25 = vpop.f32.mrf.mxu1 }
0x1e7b   : > { %v7898_v34 = vadd.f32 %v8322_v23, %v7897_v25 }
0x1e7c   : > { %v8942_v17 = vpop.f32.mrf.mxu1 }
0x1e7d   : > { %v7901_v35 = vmax.f32 %v7898_v34, 0.0 }
0x1e7f   : > { %8960 = vmatmul.mubr.msk.f32.vlgmr.msra.gmra.mxu0 %vm4208_vm7, %v7901_v35 }
0x1f3f   : > { %v7988_v11 = vpop.f32.mrf.mxu0 }
0x1f40   : > { %v7989_v41 = vadd.f32 %v8333_v22, %v7988_v11 }
0x1f41   : > { %v8961_v12 = vpop.f32.mrf.mxu0 }
0x1f42   : > { %v7992_v50 = vadd.f32 %v7989_v41, %v7814_v9 }
0x1f44   : > { %v7993_v53 = vsel %vm629_vm1, %v7992_v50, 0.0 }
0x1f45   : > { %7994 = vadd.xlane.f32.xlu0 %v7993_v53 }
0x1fce   : > { %v7995_v63 = vpop.xlane.xlu0 %7994 }
0x1fcf   : > { %v7996_v62 = vmul.f32 0.03125, %v7995_v63 }
0x1fd1   : > { %v7997_v24 = vsub.f32 %v7992_v50, %v7996_v62 }
0x1fd3   : > { %v7998_v48 = vmul.f32 %v7997_v24, %v7997_v24 }
0x1fd5   : > { %v7999_v26 = vsel %vm629_vm1, %v7998_v48, 0.0 }
0x1fd6   : > { %8000 = vadd.xlane.f32.xlu0 %v7999_v26 }
0x205f   : > { %v8001_v38 = vpop.xlane.xlu0 %8000 }
0x2060   : > { %v8002_v27 = vmul.f32 0.03125, %v8001_v38 }
0x2062   : > { %v8003_v2 = vadd.f32 1e-05, %v8002_v27 }
0x2064   : > { %9104 = vrsqrt.f32 %v8003_v2 }
0x2071   : > { %v9105_v36 = vpop.eup %9104 }
0x2072   : > { %v8005_v18 = vmul.f32 %v9105_v36, %v7997_v24 }
0x2074   : > { %v8010_v40 = vmul.f32 %v8009_v10, %v8005_v18 }
0x2076   : > { %v8015_v16 = vadd.f32 %v8014_v39, %v8010_v40 }
0x2078   : > { %v8016_v37 = vsel %vm629_vm1, %v8015_v16, 0.0 }
0x2079   : > { %8017 = vadd.xlane.f32.xlu0 %v8016_v37 }
0x2102   : > { %v8018_v21 = vpop.xlane.xlu0 %8017 }
0x2103   : > { %v8019_v42 = vmul.f32 0.03125, %v8018_v21 }
0x2105   : > { %v8020_v13 = vsub.f32 %v8015_v16, %v8019_v42 }
0x2107   : > { %v8021_v3 = vmul.f32 %v8020_v13, %v8020_v13 }
0x2109   : > { %v8022_v43 = vsel %vm629_vm1, %v8021_v3, 0.0 }
0x210a   : > { %8023 = vadd.xlane.f32.xlu0 %v8022_v43 }
0x2193   : > { %v8024_v29 = vpop.xlane.xlu0 %8023 }
0x2194   : > { %v8025_v44 = vmul.f32 0.03125, %v8024_v29 }
0x2196   : > { %v8026_v28 = vadd.f32 1e-05, %v8025_v44 }
0x2198   : > { %9106 = vrsqrt.f32 %v8026_v28 }
0x21a5   : > { %v9107_v51 = vpop.eup %9106 }
0x21a6   : > { %v8028_v33 = vmul.f32 %v9107_v51, %v8020_v13 }
0x21a8   : > { %v8029_v45 = vmul.f32 %v8028_v33, %v4322_v61 }
0x21aa   : > { %v8030_v46 = vadd.f32 %v8029_v45, %v4327_v57 }
0x21ac   : > { %8335 = vst.msk [vmem:[%s10569_s28 + $0x8] sm:$0xff] %vm629_vm1, %v8030_v46 }
0x21ad   : > { %9180 = shalt.err (!%p9177_p10)
}
0x21ae   : > { %s9181_s19 = scalar_lea.hbm %s10594_s22, 256  ;;  %s9185_s26 = scalar_lea.hbm %s10658_s16, 512 }
0x21af   : > { %p9182_p11 = scmp.ne.s32.totalorder %s10594_s22, %s9181_s19  ;;  %p9186_p0 = scmp.lt.s32.totalorder %s10594_s22, %s10658_s16 }
0x21b0   : > { %p9187_p3 = scmp.lt.s32.totalorder %s9185_s26, %s9181_s19 }
0x21b1   : > { %p9183_p12 = pnand %p9182_p11, %p9382_p1 }
0x21b2   : > { %p9188_p4 = por %p9187_p3, %p9186_p0 }
0x21b3   : > { %p9184_p13 = pneg %p9183_p12 }
0x21b5   : > { %p9189_p2 = pnand %p9188_p4, %p9184_p13 }
0x21b7   : > { %9192 = shalt.err (!%p9189_p2)
}
0x21b8   : > { %s9251_s30 = smov 128   ;;  %s9252_s8 = smov 256  }
0x21b9   : > { %8966 = dma.vmem_to_hbm [thread:$0]  (%p9382_p1), %s10596_s7, 256, %s10594_s22, %s10602_s23, %s9251_s30, %s9252_s8, %s10700_s3  }
0x21ba PF: > { %p8978_p5 = scmp.ge.s32.totalorder %s9233_s17, 2  ;;  %s8061_s11 = sand.u32 1, %s9221_s1  }
0x21bb   : > { %p10703_p6 = scmp.ne.s32.totalorder %s10687_s25, 0  ;;  %s8062_s5 = scalar_lea.sflag [#allocation7], %s8061_s11 }
0x21bd   : > { %p8973_p7 = pnand %p8978_p5, %p10703_p6 }
0x21bf   : > { %p8974_p8 = pneg %p8973_p7 }
0x21c1   : > { %9216 = dma.done.wait (%p8974_p8), %s8062_s5, 256  }
0x21c2   : > { %9218 = vsyncadd (%p8974_p8), %s8062_s5, 4294967040  ;;  %s10704_s18 = sld [smem:[#allocation12_spill]]  ;;  %p37_p9 = scmp.ge.s32.totalorder %s9369_s20, 4  }
0x21c3   : > { %s10705_s11 = sld [smem:[#allocation13_spill]]  ;;  %s10706_s1 = smov %s9225_s0 }
0x21c4   : > { %s10708_s17 = smov %s9369_s20  ;;  %39 = sbr.rel (!%p37_p9) target bundleno = 44 (0x2c), region = 153 }
0x21c8   : > { %s10707_s0 = smov %s10704_s18 }
0x21c9   :  { %8067 = vsyncpa [#allocation6], 1 }
0x21ca   :  { %8069 = vsyncpa [#allocation6 + $0x1], 1 }
0x21cb   :  { %8070 = vsyncpa [#allocation7], 1 }
0x21cc   :  { %8072 = vsyncpa [#allocation7 + $0x1], 1 }

</bundles_post_ra>
